<compile_context>
chip_gen: v5e
topology: v5e:2x2
jax: 0.10.0
libtpu: 0.0.40
codegen_flags: <defaults>
</compile_context>

<pallas_src>
import functools

import jax
import jax.numpy as jnp
from jax.experimental import pallas as pl
from jax.experimental.pallas import tpu as pltpu


# 64 MiB scoped-VMEM cap: plenty on v5e/v6e (128 MiB physical); actual
# per-kernel footprint here is ~10-15 MiB so it also fits v7x's 64 MiB VMEM.
_VMEM_LIMIT = 64 * 1024 * 1024

_NEG_BIG = -1e9   # additive bias masking padded columns in the LSE kernel


def _round_up(x, m):
    return ((x + m - 1) // m) * m


def _pad2d(x, rows, cols):
    r, c = x.shape
    if r == rows and c == cols:
        return x
    return jnp.pad(x, ((0, rows - r), (0, cols - c)))


# ----------------------------- Pallas kernels ------------------------------


def _prop_kernel(adj_ref, emb_ref, sum_ref, z_ref, sum_out_ref, acc_ref, *, tk):
    """K-tiled adj @ emb with fused running-sum update.

    adj_ref:     (tm, tk)  bf16 tile of the (padded) adjacency
    emb_ref:     (kp, dpad) bf16, VMEM-resident full embedding (B operand)
    sum_ref:     (tm, dpad) f32 running layer sum (input)
    z_ref:       (tm, dpad) bf16 this layer's propagation output
    sum_out_ref: (tm, dpad) f32 updated running sum
    acc_ref:     (tm, dpad) f32 scratch accumulator
    """
    kk = pl.program_id(1)

    @pl.when(kk == 0)
    def _():
        acc_ref[...] = jnp.zeros_like(acc_ref)

    k0 = pl.multiple_of(kk * tk, tk)
    acc_ref[...] += jnp.dot(adj_ref[...], emb_ref[pl.ds(k0, tk), :],
                            preferred_element_type=jnp.float32)

    @pl.when(kk == pl.num_programs(1) - 1)
    def _():
        z_ref[...] = acc_ref[...].astype(z_ref.dtype)
        sum_out_ref[...] = sum_ref[...] + acc_ref[...]


def pallas_spmm_acc(adj_p, emb_p, sum_in, *, tm, tk):
    """(mp, kp) @ (kp, dpad) with fused running sum, on pre-padded operands.

    Returns (z bf16, sum_out f32), both (mp, dpad).  B (emb_p) is VMEM
    resident: fetched from HBM exactly once per call.
    """
    mp, kp = adj_p.shape
    kp2, dpad = emb_p.shape
    assert kp == kp2 and sum_in.shape == (mp, dpad)
    assert mp % tm == 0 and kp % tk == 0 and dpad % 128 == 0

    kernel = functools.partial(_prop_kernel, tk=tk)
    z, sum_out = pl.pallas_call(
        kernel,
        out_shape=(jax.ShapeDtypeStruct((mp, dpad), jnp.bfloat16),
                   jax.ShapeDtypeStruct((mp, dpad), jnp.float32)),
        grid=(mp // tm, kp // tk),
        in_specs=[
            pl.BlockSpec((tm, tk), lambda i, kk: (i, kk)),
            pl.BlockSpec((kp, dpad), lambda i, kk: (0, 0)),   # resident B
            pl.BlockSpec((tm, dpad), lambda i, kk: (i, 0)),
        ],
        out_specs=[
            pl.BlockSpec((tm, dpad), lambda i, kk: (i, 0)),
            pl.BlockSpec((tm, dpad), lambda i, kk: (i, 0)),
        ],
        scratch_shapes=[pltpu.VMEM((tm, dpad), jnp.float32)],
        compiler_params=pltpu.CompilerParams(
            dimension_semantics=("parallel", "arbitrary"),
            vmem_limit_bytes=_VMEM_LIMIT),
    )(adj_p, emb_p, sum_in)
    return z, sum_out


def _lse_kernel(g_ref, e_ref, o_ref, m_sc, s_sc, *, inv_temp):
    """Online row-wise log-sum-exp of (g @ e) * inv_temp, tiled over N."""
    ni = pl.program_id(1)

    @pl.when(ni == 0)
    def _():
        m_sc[...] = jnp.full_like(m_sc, -jnp.inf)
        s_sc[...] = jnp.zeros_like(s_sc)

    s = jnp.dot(g_ref[...], e_ref[...],
                preferred_element_type=jnp.float32) * inv_temp
    m_new = jnp.maximum(m_sc[...], jnp.max(s, axis=1, keepdims=True))
    alpha = jnp.exp(m_sc[...] - m_new)
    s_sc[...] = s_sc[...] * alpha + jnp.sum(jnp.exp(s - m_new),
                                            axis=1, keepdims=True)
    m_sc[...] = m_new

    @pl.when(ni == pl.num_programs(1) - 1)
    def _():
        o_ref[...] = m_sc[...] + jnp.log(s_sc[...])


def pallas_lse_rows(g, e, temp, *, tb=None, tn=1024):
    """out[b] = logsumexp_n( g[b] . e[n] / temp ), g: (B, d), e: (N, d).

    E is pre-transposed to (d, N) so the kernel runs a plain (tb,d)@(d,tn)
    MXU matmul; padded columns of N are masked by an appended bias feature
    row (value _NEG_BIG), so there is no per-step VPU compare/select work.
    """
    bsz, d = g.shape
    n, d2 = e.shape
    assert d == d2
    if tb is None:
        # >=2 batch blocks whenever possible (v7x second TensorCore).
        tb = max(16, min(128, _round_up(max(bsz // 2, 1), 16)))
    tb = min(tb, _round_up(bsz, 16))
    bp = _round_up(bsz, tb)
    tn = min(tn, _round_up(n, 128))
    npad = _round_up(n, tn)
    daug = _round_up(d + 1, 16)

    # g augmented with a constant 1 feature; e^T augmented with a bias row
    # that is 0 for valid columns and _NEG_BIG for padded columns.
    g_aug = jnp.concatenate(
        [g.astype(jnp.float32), jnp.ones((bsz, 1), jnp.float32)], axis=1)
    g_aug = _pad2d(g_aug, bp, daug).astype(jnp.bfloat16)
    bias = jnp.where(jnp.arange(npad) < n, 0.0, _NEG_BIG).astype(jnp.float32)
    e_t = _pad2d(e.astype(jnp.float32).T, d, npad)
    e_aug = jnp.concatenate([e_t, bias[None, :]], axis=0)       # (d+1, npad)
    e_aug = _pad2d(e_aug, daug, npad).astype(jnp.bfloat16)

    kernel = functools.partial(_lse_kernel, inv_temp=1.0 / float(temp))
    out = pl.pallas_call(
        kernel,
        out_shape=jax.ShapeDtypeStruct((bp, 1), jnp.float32),
        grid=(bp // tb, npad // tn),
        in_specs=[
            pl.BlockSpec((tb, daug), lambda bi, ni: (bi, 0)),
            pl.BlockSpec((daug, tn), lambda bi, ni: (0, ni)),
        ],
        out_specs=pl.BlockSpec((tb, 1), lambda bi, ni: (bi, 0)),
        scratch_shapes=[pltpu.VMEM((tb, 1), jnp.float32),
                        pltpu.VMEM((tb, 1), jnp.float32)],
        compiler_params=pltpu.CompilerParams(
            dimension_semantics=("parallel", "arbitrary"),
            vmem_limit_bytes=_VMEM_LIMIT),
    )(g_aug, e_aug)
    return out[:bsz, 0]


# ------------------------- one-time buffer precompute -----------------------


def prepare_propagation_buffers(adj_norm, *, tile=512):
    """Pad + bf16-cast adj and adj.T ONCE (hoisted out of the per-step forward)."""
    n_u, n_i = adj_norm.shape
    nup = _round_up(n_u, tile)
    nip = _round_up(n_i, tile)
    adj_p = _pad2d(adj_norm.astype(jnp.bfloat16), nup, nip)
    adjT_p = _pad2d(adj_norm.T.astype(jnp.bfloat16), nip, nup)
    return {"adj_p": adj_p, "adjT_p": adjT_p}


# --------------------------- LightGCL forward ------------------------------


def lightgcl_forward(params, bufs, uids, iids, sign, *,
                     l, temp, lambda_1, lambda_2, tile=512, lse_tn=1024):
    E_u_0 = params["E_u_0"]          # (n_u, d)
    E_i_0 = params["E_i_0"]          # (n_i, d)
    adj_p = bufs["adj_p"]            # (nup, nip) bf16, padded, precomputed
    adjT_p = bufs["adjT_p"]          # (nip, nup) bf16
    u_mul_s = bufs["u_mul_s"]        # (n_u, q)
    v_mul_s = bufs["v_mul_s"]        # (n_i, q)
    ut = bufs["ut"]                  # (q, n_u)
    vt = bufs["vt"]                  # (q, n_i)

    n_u, d = E_u_0.shape
    n_i, _ = E_i_0.shape
    q = ut.shape[0]
    nup, nip = adj_p.shape
    assert adjT_p.shape == (nip, nup)
    assert nup % tile == 0 and nip % tile == 0
    dpad = _round_up(d, 128)

    # TODO(synk): sparse_dropout is stochastic; dropout=0.0 -> identity on adj.

    # Layer-0 seeds; running sums (f32) start at E_*_0 (E_u_list[0] = E_u_0).
    e_u_prev = E_u_0                 # f32 views feeding the tiny SVD products
    e_i_prev = E_i_0
    e_u_prev_p = _pad2d(E_u_0, nup, dpad).astype(jnp.bfloat16)
    e_i_prev_p = _pad2d(E_i_0, nip, dpad).astype(jnp.bfloat16)
    sum_u = _pad2d(E_u_0, nup, dpad)                  # f32 running sum of E_u_list
    sum_i = _pad2d(E_i_0, nip, dpad)
    vt_ei_sum = jnp.zeros((q, d), jnp.float32)
    ut_eu_sum = jnp.zeros((q, d), jnp.float32)

    for _ in range(l):
        # Tiny (q, d) SVD-branch products: plain XLA (launch cost >> work).
        vt_ei_sum = vt_ei_sum + jnp.dot(vt, e_i_prev)
        ut_eu_sum = ut_eu_sum + jnp.dot(ut, e_u_prev)
        # GCN propagation + fused running sums, one adj pass per side.
        z_u_p, sum_u = pallas_spmm_acc(adj_p, e_i_prev_p, sum_u, tm=tile, tk=tile)
        z_i_p, sum_i = pallas_spmm_acc(adjT_p, e_u_prev_p, sum_i, tm=tile, tk=tile)
        e_u_prev_p, e_i_prev_p = z_u_p, z_i_p
        # NOTE: inter-layer feedback is bf16 (MXU inputs); running sums stay f32.
        e_u_prev = z_u_p[:n_u, :d].astype(jnp.float32)
        e_i_prev = z_i_p[:n_i, :d].astype(jnp.float32)

    E_u = sum_u[:n_u, :d]
    E_i = sum_i[:n_i, :d]
    # G_u = E_u_0 + sum_l u_mul_s @ (vt @ E_i^{l-1}) = E_u_0 + u_mul_s @ sum_l vt_ei
    G_u = E_u_0 + jnp.dot(u_mul_s, vt_ei_sum)
    G_i = E_i_0 + jnp.dot(v_mul_s, ut_eu_sum)

    # ----- contrastive (InfoNCE-style) loss -----
    G_u_sel = jnp.take(G_u, uids, axis=0)             # (B, d)
    G_i_sel = jnp.take(G_i, iids, axis=0)
    E_u_sel = jnp.take(E_u, uids, axis=0)
    E_i_sel = jnp.take(E_i, iids, axis=0)

    log_eps = jnp.log(jnp.float32(1e-8))
    lse_u = pallas_lse_rows(G_u_sel, E_u, temp, tn=lse_tn)
    lse_i = pallas_lse_rows(G_i_sel, E_i, temp, tn=lse_tn)
    # log(sum(exp(scores)) + 1e-8) computed stably from the row-wise LSE.
    neg_score = (jnp.logaddexp(lse_u, log_eps).mean()
                 + jnp.logaddexp(lse_i, log_eps).mean())

    pos_u = jnp.clip(jnp.sum(G_u_sel * E_u_sel, axis=1) / temp, -5.0, 5.0).mean()
    pos_i = jnp.clip(jnp.sum(G_i_sel * E_i_sel, axis=1) / temp, -5.0, 5.0).mean()
    loss_s = -(pos_u + pos_i) + neg_score

    # ----- BCE interaction loss -----
    logit = jnp.sum(E_u_sel * E_i_sel, axis=1)
    p = jax.nn.sigmoid(logit)
    log_p = jnp.maximum(jnp.log(p), -100.0)           # BCELoss log clamp
    log_1mp = jnp.maximum(jnp.log(1.0 - p), -100.0)
    loss_r = -(sign * log_p + (1.0 - sign) * log_1mp).mean()

    # ----- L2 regularization over parameters -----
    loss_reg = lambda_2 * (jnp.sum(E_u_0 * E_u_0) + jnp.sum(E_i_0 * E_i_0))

    loss = loss_r + lambda_1 * loss_s + loss_reg
    return loss, loss_r, lambda_1 * loss_s


# --------------------------------- driver ----------------------------------


if __name__ == "__main__":
    n_u, n_i, d, q = 300, 360, 32, 8
    l = 2
    temp = 0.2
    lambda_1 = 0.2
    lambda_2 = 1e-4
    batch = 64
    tile = 256        # small tiles so the demo exercises multi-block grids
    lse_tn = 128

    key = jax.random.PRNGKey(0)
    keys = jax.random.split(key, 11)

    # xavier_uniform_ on (n, m): bound = sqrt(6 / (n + m))
    def xavier(k, n, m):
        bound = (6.0 / (n + m)) ** 0.5
        return jax.random.uniform(k, (n, m), jnp.float32, -bound, bound)

    E_u_0 = xavier(keys[0], n_u, d)
    E_i_0 = xavier(keys[1], n_i, d)

    mask = jax.random.bernoulli(keys[2], 0.1, (n_u, n_i)).astype(jnp.float32)
    adj_norm = mask * jax.random.uniform(keys[3], (n_u, n_i), jnp.float32) * 0.1
    u_mul_s = 0.1 * jax.random.normal(keys[4], (n_u, q), jnp.float32)
    v_mul_s = 0.1 * jax.random.normal(keys[5], (n_i, q), jnp.float32)
    ut = 0.1 * jax.random.normal(keys[6], (q, n_u), jnp.float32)
    vt = 0.1 * jax.random.normal(keys[7], (q, n_i), jnp.float32)

    uids = jax.random.randint(keys[8], (batch,), 0, n_u, jnp.int32)
    iids = jax.random.randint(keys[9], (batch,), 0, n_i, jnp.int32)
    sign = jax.random.bernoulli(keys[10], 0.5, (batch,)).astype(jnp.float32)

    params = {"E_u_0": E_u_0, "E_i_0": E_i_0}
    # One-time precompute of the padded bf16 adjacency and its transpose
    # (hoisted out of the per-step forward, per the performance review).
    bufs = prepare_propagation_buffers(adj_norm, tile=tile)
    bufs.update({"u_mul_s": u_mul_s, "v_mul_s": v_mul_s, "ut": ut, "vt": vt})

    fwd = jax.jit(functools.partial(
        lightgcl_forward, l=l, temp=temp, lambda_1=lambda_1, lambda_2=lambda_2,
        tile=tile, lse_tn=lse_tn))

    loss, loss_r, loss_s_scaled = fwd(params, bufs, uids, iids, sign)
    jax.block_until_ready((loss, loss_r, loss_s_scaled))
    assert bool(jnp.isfinite(loss))
    assert bool(jnp.isfinite(loss_r))
    assert bool(jnp.isfinite(loss_s_scaled))
    print("KERNEL_OK")
</pallas_src>

<mosaic_0001>
module attributes {stable_mosaic.version = 11 : i64} {
  func.func @_prop_kernel(%arg0: i32, %arg1: i32, %arg2: memref<256x256xbf16, #tpu.memory_space<vmem>>, %arg3: memref<512x128xbf16, #tpu.memory_space<vmem>>, %arg4: memref<256x128xf32, #tpu.memory_space<vmem>>, %arg5: memref<256x128xbf16, #tpu.memory_space<vmem>>, %arg6: memref<256x128xf32, #tpu.memory_space<vmem>>, %arg7: memref<256x128xf32, #tpu.memory_space<vmem>>) attributes {dimension_semantics = [#tpu.dimension_semantics<parallel>, #tpu.dimension_semantics<arbitrary>], iteration_bounds = array<i64: 2, 2>, scalar_prefetch = 0 : i64, scratch_operands = 1 : i64, tpu.core_type = #tpu.core_type<tc>, window_params = [{transform_indices = @transform_0, window_bounds = array<i64: 256, 256>}, {pipeline_mode = #tpu.pipeline_mode<synchronous>, transform_indices = @transform_1, window_bounds = array<i64: 512, 128>}, {transform_indices = @transform_2, window_bounds = array<i64: 256, 128>}, {transform_indices = @transform_3, window_bounds = array<i64: 256, 128>}, {transform_indices = @transform_4, window_bounds = array<i64: 256, 128>}]} {
    %c0_i32 = arith.constant 0 : i32
    %0 = arith.cmpi eq, %arg1, %c0_i32 : i32
    %1 = arith.extui %0 : i1 to i32
    %c0_i32_0 = arith.constant 0 : i32
    %2 = arith.cmpi ne, %1, %c0_i32_0 : i32
    scf.if %2 {
      %cst_8 = arith.constant 0.000000e+00 : f32
      %15 = vector.broadcast %cst_8 : f32 to vector<256x128xf32>
      %c0_9 = arith.constant 0 : index
      %c0_10 = arith.constant 0 : index
      %16 = vector.load %arg7[%c0_9, %c0_10] : memref<256x128xf32, #tpu.memory_space<vmem>>, vector<256x128xf32>
      tpu.vector_store %arg7[%c0_9, %c0_10], %15 {strides = array<i32>} : memref<256x128xf32, #tpu.memory_space<vmem>>, vector<256x128xf32>,
    } else {
    }
    %c256_i32 = arith.constant 256 : i32
    %3 = arith.muli %arg1, %c256_i32 : i32
    %4 = tpu.assume_multiple %3, 256 : i32
    %c0 = arith.constant 0 : index
    %c0_1 = arith.constant 0 : index
    %5 = vector.load %arg7[%c0, %c0_1] : memref<256x128xf32, #tpu.memory_space<vmem>>, vector<256x128xf32>
    %c0_2 = arith.constant 0 : index
    %c0_3 = arith.constant 0 : index
    %6 = vector.load %arg2[%c0_2, %c0_3] : memref<256x256xbf16, #tpu.memory_space<vmem>>, vector<256x256xbf16>
    %7 = arith.index_cast %4 : i32 to index
    %c0_4 = arith.constant 0 : index
    %8 = vector.load %arg3[%7, %c0_4] : memref<512x128xbf16, #tpu.memory_space<vmem>>, vector<256x128xbf16>
    %cst = arith.constant dense<0.000000e+00> : vector<256x128xf32>
    %9 = tpu.matmul %6, %8, %cst {dimension_numbers = #tpu.dot_dimension_numbers<[1], [0], [0], [1], [0, 0, 1, 1], [], []>} : vector<256x256xbf16>, vector<256x128xbf16>, vector<256x128xf32> -> vector<256x128xf32>
    %10 = arith.addf %5, %9 : vector<256x128xf32>
    %c0_5 = arith.constant 0 : index
    %c0_6 = arith.constant 0 : index
    %11 = vector.load %arg7[%c0_5, %c0_6] : memref<256x128xf32, #tpu.memory_space<vmem>>, vector<256x128xf32>
    tpu.vector_store %arg7[%c0_5, %c0_6], %10 {strides = array<i32>} : memref<256x128xf32, #tpu.memory_space<vmem>>, vector<256x128xf32>,
    %c1_i32 = arith.constant 1 : i32
    %12 = arith.cmpi eq, %arg1, %c1_i32 : i32
    %13 = arith.extui %12 : i1 to i32
    %c0_i32_7 = arith.constant 0 : i32
    %14 = arith.cmpi ne, %13, %c0_i32_7 : i32
    scf.if %14 {
      %c0_8 = arith.constant 0 : index
      %c0_9 = arith.constant 0 : index
      %15 = vector.load %arg7[%c0_8, %c0_9] : memref<256x128xf32, #tpu.memory_space<vmem>>, vector<256x128xf32>
      %16 = arith.truncf %15 : vector<256x128xf32> to vector<256x128xbf16>
      %c0_10 = arith.constant 0 : index
      %c0_11 = arith.constant 0 : index
      %17 = vector.load %arg5[%c0_10, %c0_11] : memref<256x128xbf16, #tpu.memory_space<vmem>>, vector<256x128xbf16>
      tpu.vector_store %arg5[%c0_10, %c0_11], %16 {strides = array<i32>} : memref<256x128xbf16, #tpu.memory_space<vmem>>, vector<256x128xbf16>,
      %c0_12 = arith.constant 0 : index
      %c0_13 = arith.constant 0 : index
      %18 = vector.load %arg4[%c0_12, %c0_13] : memref<256x128xf32, #tpu.memory_space<vmem>>, vector<256x128xf32>
      %c0_14 = arith.constant 0 : index
      %c0_15 = arith.constant 0 : index
      %19 = vector.load %arg7[%c0_14, %c0_15] : memref<256x128xf32, #tpu.memory_space<vmem>>, vector<256x128xf32>
      %20 = arith.addf %18, %19 : vector<256x128xf32>
      %c0_16 = arith.constant 0 : index
      %c0_17 = arith.constant 0 : index
      %21 = vector.load %arg6[%c0_16, %c0_17] : memref<256x128xf32, #tpu.memory_space<vmem>>, vector<256x128xf32>
      tpu.vector_store %arg6[%c0_16, %c0_17], %20 {strides = array<i32>} : memref<256x128xf32, #tpu.memory_space<vmem>>, vector<256x128xf32>,
    } else {
    }
    return
  }
  func.func @transform_0(%arg0: i32, %arg1: i32) -> (i32, i32) {
    %c0_i32 = arith.constant 0 : i32
    return %arg0, %arg1 : i32, i32
  }
  func.func @transform_1(%arg0: i32, %arg1: i32) -> (i32, i32) {
    %c0_i32 = arith.constant 0 : i32
    %c0_i32_0 = arith.constant 0 : i32
    %c0_i32_1 = arith.constant 0 : i32
    return %c0_i32, %c0_i32_0 : i32, i32
  }
  func.func @transform_2(%arg0: i32, %arg1: i32) -> (i32, i32) {
    %c0_i32 = arith.constant 0 : i32
    %c0_i32_0 = arith.constant 0 : i32
    return %arg0, %c0_i32 : i32, i32
  }
  func.func @transform_3(%arg0: i32, %arg1: i32) -> (i32, i32) {
    %c0_i32 = arith.constant 0 : i32
    %c0_i32_0 = arith.constant 0 : i32
    return %arg0, %c0_i32 : i32, i32
  }
  func.func @transform_4(%arg0: i32, %arg1: i32) -> (i32, i32) {
    %c0_i32 = arith.constant 0 : i32
    %c0_i32_0 = arith.constant 0 : i32
    return %arg0, %c0_i32 : i32, i32
  }
}

module attributes {stable_mosaic.version = 11 : i64} {
  func.func @_prop_kernel(%arg0: i32, %arg1: i32, %arg2: memref<256x256xbf16, #tpu.memory_space<vmem>>, %arg3: memref<512x128xbf16, #tpu.memory_space<vmem>>, %arg4: memref<256x128xf32, #tpu.memory_space<vmem>>, %arg5: memref<256x128xbf16, #tpu.memory_space<vmem>>, %arg6: memref<256x128xf32, #tpu.memory_space<vmem>>, %arg7: memref<256x128xf32, #tpu.memory_space<vmem>>) attributes {dimension_semantics = [#tpu.dimension_semantics<parallel>, #tpu.dimension_semantics<arbitrary>], iteration_bounds = array<i64: 2, 2>, scalar_prefetch = 0 : i64, scratch_operands = 1 : i64, tpu.core_type = #tpu.core_type<tc>, window_params = [{transform_indices = @transform_0, window_bounds = array<i64: 256, 256>}, {pipeline_mode = #tpu.pipeline_mode<synchronous>, transform_indices = @transform_1, window_bounds = array<i64: 512, 128>}, {transform_indices = @transform_2, window_bounds = array<i64: 256, 128>}, {transform_indices = @transform_3, window_bounds = array<i64: 256, 128>}, {transform_indices = @transform_4, window_bounds = array<i64: 256, 128>}]} {
    %c0_i32 = arith.constant 0 : i32
    %0 = arith.cmpi eq, %arg1, %c0_i32 : i32
    %1 = arith.extui %0 : i1 to i32
    %c0_i32_0 = arith.constant 0 : i32
    %2 = arith.cmpi ne, %1, %c0_i32_0 : i32
    scf.if %2 {
      %cst_8 = arith.constant 0.000000e+00 : f32
      %15 = vector.broadcast %cst_8 : f32 to vector<256x128xf32>
      %c0_9 = arith.constant 0 : index
      %c0_10 = arith.constant 0 : index
      %16 = vector.load %arg7[%c0_9, %c0_10] : memref<256x128xf32, #tpu.memory_space<vmem>>, vector<256x128xf32>
      tpu.vector_store %arg7[%c0_9, %c0_10], %15 {strides = array<i32>} : memref<256x128xf32, #tpu.memory_space<vmem>>, vector<256x128xf32>,
    } else {
    }
    %c256_i32 = arith.constant 256 : i32
    %3 = arith.muli %arg1, %c256_i32 : i32
    %4 = tpu.assume_multiple %3, 256 : i32
    %c0 = arith.constant 0 : index
    %c0_1 = arith.constant 0 : index
    %5 = vector.load %arg7[%c0, %c0_1] : memref<256x128xf32, #tpu.memory_space<vmem>>, vector<256x128xf32>
    %c0_2 = arith.constant 0 : index
    %c0_3 = arith.constant 0 : index
    %6 = vector.load %arg2[%c0_2, %c0_3] : memref<256x256xbf16, #tpu.memory_space<vmem>>, vector<256x256xbf16>
    %7 = arith.index_cast %4 : i32 to index
    %c0_4 = arith.constant 0 : index
    %8 = vector.load %arg3[%7, %c0_4] : memref<512x128xbf16, #tpu.memory_space<vmem>>, vector<256x128xbf16>
    %cst = arith.constant dense<0.000000e+00> : vector<256x128xf32>
    %9 = tpu.matmul %6, %8, %cst {dimension_numbers = #tpu.dot_dimension_numbers<[1], [0], [0], [1], [0, 0, 1, 1], [], []>} : vector<256x256xbf16>, vector<256x128xbf16>, vector<256x128xf32> -> vector<256x128xf32>
    %10 = arith.addf %5, %9 : vector<256x128xf32>
    %c0_5 = arith.constant 0 : index
    %c0_6 = arith.constant 0 : index
    %11 = vector.load %arg7[%c0_5, %c0_6] : memref<256x128xf32, #tpu.memory_space<vmem>>, vector<256x128xf32>
    tpu.vector_store %arg7[%c0_5, %c0_6], %10 {strides = array<i32>} : memref<256x128xf32, #tpu.memory_space<vmem>>, vector<256x128xf32>,
    %c1_i32 = arith.constant 1 : i32
    %12 = arith.cmpi eq, %arg1, %c1_i32 : i32
    %13 = arith.extui %12 : i1 to i32
    %c0_i32_7 = arith.constant 0 : i32
    %14 = arith.cmpi ne, %13, %c0_i32_7 : i32
    scf.if %14 {
      %c0_8 = arith.constant 0 : index
      %c0_9 = arith.constant 0 : index
      %15 = vector.load %arg7[%c0_8, %c0_9] : memref<256x128xf32, #tpu.memory_space<vmem>>, vector<256x128xf32>
      %16 = arith.truncf %15 : vector<256x128xf32> to vector<256x128xbf16>
      %c0_10 = arith.constant 0 : index
      %c0_11 = arith.constant 0 : index
      %17 = vector.load %arg5[%c0_10, %c0_11] : memref<256x128xbf16, #tpu.memory_space<vmem>>, vector<256x128xbf16>
      tpu.vector_store %arg5[%c0_10, %c0_11], %16 {strides = array<i32>} : memref<256x128xbf16, #tpu.memory_space<vmem>>, vector<256x128xbf16>,
      %c0_12 = arith.constant 0 : index
      %c0_13 = arith.constant 0 : index
      %18 = vector.load %arg4[%c0_12, %c0_13] : memref<256x128xf32, #tpu.memory_space<vmem>>, vector<256x128xf32>
      %c0_14 = arith.constant 0 : index
      %c0_15 = arith.constant 0 : index
      %19 = vector.load %arg7[%c0_14, %c0_15] : memref<256x128xf32, #tpu.memory_space<vmem>>, vector<256x128xf32>
      %20 = arith.addf %18, %19 : vector<256x128xf32>
      %c0_16 = arith.constant 0 : index
      %c0_17 = arith.constant 0 : index
      %21 = vector.load %arg6[%c0_16, %c0_17] : memref<256x128xf32, #tpu.memory_space<vmem>>, vector<256x128xf32>
      tpu.vector_store %arg6[%c0_16, %c0_17], %20 {strides = array<i32>} : memref<256x128xf32, #tpu.memory_space<vmem>>, vector<256x128xf32>,
    } else {
    }
    return
  }
  func.func @transform_0(%arg0: i32, %arg1: i32) -> (i32, i32) {
    %c0_i32 = arith.constant 0 : i32
    return %arg0, %arg1 : i32, i32
  }
  func.func @transform_1(%arg0: i32, %arg1: i32) -> (i32, i32) {
    %c0_i32 = arith.constant 0 : i32
    %c0_i32_0 = arith.constant 0 : i32
    %c0_i32_1 = arith.constant 0 : i32
    return %c0_i32, %c0_i32_0 : i32, i32
  }
  func.func @transform_2(%arg0: i32, %arg1: i32) -> (i32, i32) {
    %c0_i32 = arith.constant 0 : i32
    %c0_i32_0 = arith.constant 0 : i32
    return %arg0, %c0_i32 : i32, i32
  }
  func.func @transform_3(%arg0: i32, %arg1: i32) -> (i32, i32) {
    %c0_i32 = arith.constant 0 : i32
    %c0_i32_0 = arith.constant 0 : i32
    return %arg0, %c0_i32 : i32, i32
  }
  func.func @transform_4(%arg0: i32, %arg1: i32) -> (i32, i32) {
    %c0_i32 = arith.constant 0 : i32
    %c0_i32_0 = arith.constant 0 : i32
    return %arg0, %c0_i32 : i32, i32
  }
}

module attributes {stable_mosaic.version = 11 : i64} {
  func.func @_lse_kernel(%arg0: i32, %arg1: i32, %arg2: memref<32x48xbf16, #tpu.memory_space<vmem>>, %arg3: memref<48x128xbf16, #tpu.memory_space<vmem>>, %arg4: memref<32x1xf32, #tpu.memory_space<vmem>>, %arg5: memref<32x1xf32, #tpu.memory_space<vmem>>, %arg6: memref<32x1xf32, #tpu.memory_space<vmem>>) attributes {dimension_semantics = [#tpu.dimension_semantics<parallel>, #tpu.dimension_semantics<arbitrary>], iteration_bounds = array<i64: 2, 3>, scalar_prefetch = 0 : i64, scratch_operands = 2 : i64, tpu.core_type = #tpu.core_type<tc>, window_params = [{transform_indices = @transform_0, window_bounds = array<i64: 32, 48>}, {transform_indices = @transform_1, window_bounds = array<i64: 48, 128>}, {transform_indices = @transform_2, window_bounds = array<i64: 32, 1>}]} {
    %c0_i32 = arith.constant 0 : i32
    %0 = arith.cmpi eq, %arg1, %c0_i32 : i32
    %1 = arith.extui %0 : i1 to i32
    %c0_i32_0 = arith.constant 0 : i32
    %2 = arith.cmpi ne, %1, %c0_i32_0 : i32
    scf.if %2 {
      %cst_18 = arith.constant 0xFF800000 : f32
      %28 = vector.broadcast %cst_18 : f32 to vector<32x1xf32>
      %c0_19 = arith.constant 0 : index
      %c0_20 = arith.constant 0 : index
      %29 = vector.load %arg5[%c0_19, %c0_20] : memref<32x1xf32, #tpu.memory_space<vmem>>, vector<32x1xf32>
      tpu.vector_store %arg5[%c0_19, %c0_20], %28 {strides = array<i32>} : memref<32x1xf32, #tpu.memory_space<vmem>>, vector<32x1xf32>,
      %cst_21 = arith.constant 0.000000e+00 : f32
      %30 = vector.broadcast %cst_21 : f32 to vector<32x1xf32>
      %c0_22 = arith.constant 0 : index
      %c0_23 = arith.constant 0 : index
      %31 = vector.load %arg6[%c0_22, %c0_23] : memref<32x1xf32, #tpu.memory_space<vmem>>, vector<32x1xf32>
      tpu.vector_store %arg6[%c0_22, %c0_23], %30 {strides = array<i32>} : memref<32x1xf32, #tpu.memory_space<vmem>>, vector<32x1xf32>,
    } else {
    }
    %c0 = arith.constant 0 : index
    %c0_1 = arith.constant 0 : index
    %3 = vector.load %arg2[%c0, %c0_1] : memref<32x48xbf16, #tpu.memory_space<vmem>>, vector<32x48xbf16>
    %c0_2 = arith.constant 0 : index
    %c0_3 = arith.constant 0 : index
    %4 = vector.load %arg3[%c0_2, %c0_3] : memref<48x128xbf16, #tpu.memory_space<vmem>>, vector<48x128xbf16>
    %cst = arith.constant dense<0.000000e+00> : vector<32x128xf32>
    %5 = tpu.matmul %3, %4, %cst {dimension_numbers = #tpu.dot_dimension_numbers<[1], [0], [0], [1], [0, 0, 1, 1], [], []>} : vector<32x48xbf16>, vector<48x128xbf16>, vector<32x128xf32> -> vector<32x128xf32>
    %cst_4 = arith.constant 5.000000e+00 : f32
    %6 = vector.broadcast %cst_4 : f32 to vector<32x128xf32>
    %7 = arith.mulf %5, %6 : vector<32x128xf32>
    %c0_5 = arith.constant 0 : index
    %c0_6 = arith.constant 0 : index
    %8 = vector.load %arg5[%c0_5, %c0_6] : memref<32x1xf32, #tpu.memory_space<vmem>>, vector<32x1xf32>
    %cst_7 = arith.constant dense<0xFF800000> : vector<32xf32>
    %9 = vector.multi_reduction <maximumf>, %7, %cst_7 [1] : vector<32x128xf32> to vector<32xf32>
    %10 = vector.shape_cast %9 : vector<32xf32> to vector<32x1xf32>
    %11 = arith.maximumf %8, %10 : vector<32x1xf32>
    %c0_8 = arith.constant 0 : index
    %c0_9 = arith.constant 0 : index
    %12 = vector.load %arg5[%c0_8, %c0_9] : memref<32x1xf32, #tpu.memory_space<vmem>>, vector<32x1xf32>
    %13 = arith.subf %12, %11 : vector<32x1xf32>
    %14 = math.exp %13 : vector<32x1xf32>
    %c0_10 = arith.constant 0 : index
    %c0_11 = arith.constant 0 : index
    %15 = vector.load %arg6[%c0_10, %c0_11] : memref<32x1xf32, #tpu.memory_space<vmem>>, vector<32x1xf32>
    %16 = arith.mulf %15, %14 : vector<32x1xf32>
    %17 = vector.broadcast %11 : vector<32x1xf32> to vector<32x128xf32>
    %18 = arith.subf %7, %17 : vector<32x128xf32>
    %19 = math.exp %18 : vector<32x128xf32>
    %cst_12 = arith.constant dense<0.000000e+00> : vector<32xf32>
    %20 = vector.multi_reduction <add>, %19, %cst_12 [1] : vector<32x128xf32> to vector<32xf32>
    %21 = vector.shape_cast %20 : vector<32xf32> to vector<32x1xf32>
    %22 = arith.addf %16, %21 : vector<32x1xf32>
    %c0_13 = arith.constant 0 : index
    %c0_14 = arith.constant 0 : index
    %23 = vector.load %arg6[%c0_13, %c0_14] : memref<32x1xf32, #tpu.memory_space<vmem>>, vector<32x1xf32>
    tpu.vector_store %arg6[%c0_13, %c0_14], %22 {strides = array<i32>} : memref<32x1xf32, #tpu.memory_space<vmem>>, vector<32x1xf32>,
    %c0_15 = arith.constant 0 : index
    %c0_16 = arith.constant 0 : index
    %24 = vector.load %arg5[%c0_15, %c0_16] : memref<32x1xf32, #tpu.memory_space<vmem>>, vector<32x1xf32>
    tpu.vector_store %arg5[%c0_15, %c0_16], %11 {strides = array<i32>} : memref<32x1xf32, #tpu.memory_space<vmem>>, vector<32x1xf32>,
    %c2_i32 = arith.constant 2 : i32
    %25 = arith.cmpi eq, %arg1, %c2_i32 : i32
    %26 = arith.extui %25 : i1 to i32
    %c0_i32_17 = arith.constant 0 : i32
    %27 = arith.cmpi ne, %26, %c0_i32_17 : i32
    scf.if %27 {
      %c0_18 = arith.constant 0 : index
      %c0_19 = arith.constant 0 : index
      %28 = vector.load %arg5[%c0_18, %c0_19] : memref<32x1xf32, #tpu.memory_space<vmem>>, vector<32x1xf32>
      %c0_20 = arith.constant 0 : index
      %c0_21 = arith.constant 0 : index
      %29 = vector.load %arg6[%c0_20, %c0_21] : memref<32x1xf32, #tpu.memory_space<vmem>>, vector<32x1xf32>
      %30 = math.log %29 : vector<32x1xf32>
      %31 = arith.addf %28, %30 : vector<32x1xf32>
      %c0_22 = arith.constant 0 : index
      %c0_23 = arith.constant 0 : index
      %32 = vector.load %arg4[%c0_22, %c0_23] : memref<32x1xf32, #tpu.memory_space<vmem>>, vector<32x1xf32>
      tpu.vector_store %arg4[%c0_22, %c0_23], %31 {strides = array<i32>} : memref<32x1xf32, #tpu.memory_space<vmem>>, vector<32x1xf32>,
    } else {
    }
    return
  }
  func.func @transform_0(%arg0: i32, %arg1: i32) -> (i32, i32) {
    %c0_i32 = arith.constant 0 : i32
    %c0_i32_0 = arith.constant 0 : i32
    return %arg0, %c0_i32 : i32, i32
  }
  func.func @transform_1(%arg0: i32, %arg1: i32) -> (i32, i32) {
    %c0_i32 = arith.constant 0 : i32
    %c0_i32_0 = arith.constant 0 : i32
    return %c0_i32, %arg1 : i32, i32
  }
  func.func @transform_2(%arg0: i32, %arg1: i32) -> (i32, i32) {
    %c0_i32 = arith.constant 0 : i32
    %c0_i32_0 = arith.constant 0 : i32
    return %arg0, %c0_i32 : i32, i32
  }
}

</mosaic_0001>

<bundles_post_ra>
// kernel: lightgcl_forward.8
= control target key start
LH: loop header
LB: loop body
LE: loop exit
PB: predicated region body
PF: predicated region fallthrough
CT: control target
= control target key end

     0   :  { %s2564_s0 = inlined_call_operand.vmem [shape: bf16[512,512], index: 0, kind: input, shape index: {}]   ;;  %s2565_s1 = inlined_call_operand.vmem [shape: bf16[512,128], index: 1, kind: input, shape index: {}]   ;;  %s2566_s2 = inlined_call_operand.vmem [shape: f32[512,128], index: 2, kind: input, shape index: {}]   ;;  %s2567_s3 = inlined_call_operand.hbm [shape: bf16[512,128], index: 3, kind: output, shape index: {0}]   ;;  %s2568_s4 = inlined_call_operand.vmem [shape: f32[512,128], index: 4, kind: output, shape index: {1}]  }
   0x1   :  { %2571 = sst [smem:[#allocation9_spill]] %s2564_s0 }
   0x2   :  { %10 = vsyncpa [#allocation5], 0 }
   0x3   :  { %12 = vsyncpa [#allocation5 + $0x1], 0  ;;  %s2029_s15 = smov 0   ;;  %s2031_s16 = smov 0  }
   0x4   :  { %s2033_s17 = smov 0   ;;  %s2035_s18 = smov 0  }
   0x5   :  { %s2037_s19 = smov 0   ;;  %s2039_s20 = smov 0  }
   0x6   :  { %s2041_s21 = smov 0   ;;  %s2043_s22 = smov 0  }
   0x7   :  { %s2045_s23 = smov 0   ;;  %s2047_s24 = smov 0  }
   0x8 LB: > { %s1421_s25 = sadd.s32 4294967295, %s1999_s24   ;;  %s1422_s26 = sadd.s32 4294967294, %s1999_s24   ;;  %s1999_s24 = sphi %s2047_s24, %s18_s24   ;;  %s1995_s23 = sphi %s2045_s23, %s2588_s23   ;;  %s1991_s22 = sphi %s2043_s22, %s2587_s22   ;;  %s1987_s21 = sphi %s2041_s21, %s2586_s21   ;;  %s1983_s20 = sphi %s2039_s20, %s2585_s20   ;;  %s1979_s19 = sphi %s2037_s19, %s2584_s19   ;;  %s1975_s18 = sphi %s2035_s18, %s2583_s18   ;;  %s1971_s17 = sphi %s2033_s17, %s2582_s17   ;;  %s1967_s16 = sphi %s2031_s16, %s2581_s16   ;;  %s1963_s15 = sphi %s2029_s15, %s2580_s15  }
   0x9   : > { %s27_s27 = sadd.s32 1, %s1991_s22  ;;  %s30_s28 = sadd.s32 1, %s1995_s23 }
   0xa   : > { %p28_p0 = scmp.ge.s32.totalorder %s27_s27, 2  ;;  %s39_s29 = sadd.s32 1, %s1979_s19 }
   0xb   : > { %p46_p1 = scmp.ne.s32.totalorder %s1979_s19, %s1975_s18  ;;  %p47_p2 = scmp.eq.s32.totalorder %s1999_s24, 0 }
   0xc   : > { %s2590_s27 = smov (%p28_p0, %s27_s27), 0  ;;  %s2592_s28 = smov (!%p28_p0, %s30_s28), %s1995_s23 }
   0xd   : > { %2572 = sst [smem:[#allocation7_spill]] %s2590_s27  ;;  %s35_s30 = ssub.s32 %s1991_s22, %s2590_s27 }
   0xe   : > { %p2092_p3 = por %p47_p2, %p46_p1  ;;  %p32_p4 = scmp.ge.s32.totalorder %s2592_s28, 2 }
   0xf   : > { %s112_s6 = sadd.s32 1, %s1971_s17  ;;  %p122_p5 = scmp.ne.s32.totalorder %s1971_s17, %s1967_s16 }
  0x10   : > { %p123_p6 = scmp.eq.s32.totalorder %s1421_s25, 3  ;;  %s2594_s28 = smov (%p32_p4, %s2592_s28), 0 }
  0x11   : > { %2574 = sst [smem:[#allocation8_spill]] %s2594_s28  ;;  %p128_p8 = scmp.ne.s32.totalorder %s1967_s16, %s1963_s15 }
  0x12   : > { %p2101_p7 = por %p123_p6, %p122_p5  ;;  %s34_s8 = ssub.s32 %s1995_s23, %s2594_s28 }
  0x13   : > { %p129_p9 = scmp.eq.s32.totalorder %s1422_s26, 3  ;;  %s36_s9 = sor.u32 %s35_s30, %s34_s8 }
  0x14   : > { %p110_p10 = scmp.eq.s32.totalorder %s34_s8, 0  ;;  %p37_p11 = scmp.eq.s32.totalorder %s36_s9, 0 }
  0x15   : > { %p2109_p12 = por %p129_p9, %p128_p8  ;;  %p1424_p13 = scmp.ge.s32.totalorder %s1999_s24, 4 }
  0x16   : > { %s2114_s11 = scalar_select %p110_p10, %s1971_s17, %s112_s6  }
  0x17   : > { %s2117_s12 = scalar_select %p37_p11, %s1979_s19, %s39_s29  }
  0x18   : > { %174 = sbr.rel (%p1424_p13) target bundleno = 71 (0x47), region = 20 }
  0x1d   : > { %177 = sbr.rel (!%p2092_p3) target bundleno = 71 (0x47), region = 24  ;;  %s179_s13 = sand.u32 (%p2092_p3), 1, %s1979_s19  }
  0x1e   : > { %s1427_s14 = sshll.u32 (%p2092_p3), %s1991_s22, 1  ;;  %s1425_s25 = sshll.u32 (%p2092_p3), %s179_s13, 8 }
  0x1f   : > { %s1638_s26 = sshll.u32 (%p2092_p3), %s1995_s23, 7  ;;  %s2577_s0 = sld [smem:[#allocation9_spill]] (%p2092_p3) }
  0x20   : > { %s185_s30 = sadd.s32 (%p2092_p3), %s1638_s26, %s1427_s14  ;;  %s2133_s5 = scalar_lea.vmem (%p2092_p3), [#allocation3], %s1425_s25 }
  0x21   : > { %s1429_s8 = sshll.u32 (%p2092_p3), %s185_s30, 2 }
  0x25   : > { %s2128_s29 = scalar_lea.vmem %s2577_s0, %s1429_s8 }
  0x26   : > { %v278_v0 = vld [vmem:[%s2128_s29] sm:$0xff]  ;;  %v280_v1 = vld [vmem:[%s2128_s29 + $0x10] sm:$0xff] }
  0x27   : > { %v282_v2 = vld [vmem:[%s2128_s29 + $0x20] sm:$0xff]  ;;  %279 = vst [vmem:[%s2133_s5] sm:$0xff] %v278_v0  ;;  %v284_v3 = vld [vmem:[%s2128_s29 + $0x30] sm:$0xff] }
  0x28   : > { %281 = vst [vmem:[%s2133_s5 + $0x8] sm:$0xff] %v280_v1  ;;  %v286_v4 = vld [vmem:[%s2128_s29 + $0x40] sm:$0xff]  ;;  %v288_v5 = vld [vmem:[%s2128_s29 + $0x50] sm:$0xff] }
  0x29   : > { %283 = vst [vmem:[%s2133_s5 + $0x10] sm:$0xff] %v282_v2  ;;  %v290_v6 = vld [vmem:[%s2128_s29 + $0x60] sm:$0xff]  ;;  %v292_v7 = vld [vmem:[%s2128_s29 + $0x70] sm:$0xff] }
  0x2a   : > { %285 = vst [vmem:[%s2133_s5 + $0x18] sm:$0xff] %v284_v3  ;;  %v294_v8 = vld [vmem:[%s2128_s29 + $0x80] sm:$0xff]  ;;  %v296_v9 = vld [vmem:[%s2128_s29 + $0x90] sm:$0xff] }
  0x2b   : > { %287 = vst [vmem:[%s2133_s5 + $0x20] sm:$0xff] %v286_v4  ;;  %v298_v10 = vld [vmem:[%s2128_s29 + $0xa0] sm:$0xff]  ;;  %v300_v11 = vld [vmem:[%s2128_s29 + $0xb0] sm:$0xff] }
  0x2c   : > { %289 = vst [vmem:[%s2133_s5 + $0x28] sm:$0xff] %v288_v5  ;;  %v302_v12 = vld [vmem:[%s2128_s29 + $0xc0] sm:$0xff]  ;;  %v304_v13 = vld [vmem:[%s2128_s29 + $0xd0] sm:$0xff] }
  0x2d   : > { %291 = vst [vmem:[%s2133_s5 + $0x30] sm:$0xff] %v290_v6  ;;  %v306_v14 = vld [vmem:[%s2128_s29 + $0xe0] sm:$0xff]  ;;  %v308_v15 = vld [vmem:[%s2128_s29 + $0xf0] sm:$0xff] }
  0x2e   : > { %293 = vst [vmem:[%s2133_s5 + $0x38] sm:$0xff] %v292_v7  ;;  %v310_v16 = vld [vmem:[%s2128_s29 + $0x100] sm:$0xff]  ;;  %v312_v17 = vld [vmem:[%s2128_s29 + $0x110] sm:$0xff] }
  0x2f   : > { %295 = vst [vmem:[%s2133_s5 + $0x40] sm:$0xff] %v294_v8  ;;  %v314_v18 = vld [vmem:[%s2128_s29 + $0x120] sm:$0xff]  ;;  %v316_v19 = vld [vmem:[%s2128_s29 + $0x130] sm:$0xff] }
  0x30   : > { %297 = vst [vmem:[%s2133_s5 + $0x48] sm:$0xff] %v296_v9  ;;  %v318_v20 = vld [vmem:[%s2128_s29 + $0x140] sm:$0xff]  ;;  %v320_v21 = vld [vmem:[%s2128_s29 + $0x150] sm:$0xff] }
  0x31   : > { %299 = vst [vmem:[%s2133_s5 + $0x50] sm:$0xff] %v298_v10  ;;  %v322_v22 = vld [vmem:[%s2128_s29 + $0x160] sm:$0xff]  ;;  %v324_v23 = vld [vmem:[%s2128_s29 + $0x170] sm:$0xff] }
  0x32   : > { %301 = vst [vmem:[%s2133_s5 + $0x58] sm:$0xff] %v300_v11  ;;  %v326_v24 = vld [vmem:[%s2128_s29 + $0x180] sm:$0xff]  ;;  %v328_v25 = vld [vmem:[%s2128_s29 + $0x190] sm:$0xff] }
  0x33   : > { %303 = vst [vmem:[%s2133_s5 + $0x60] sm:$0xff] %v302_v12  ;;  %v330_v26 = vld [vmem:[%s2128_s29 + $0x1a0] sm:$0xff]  ;;  %v332_v27 = vld [vmem:[%s2128_s29 + $0x1b0] sm:$0xff] }
  0x34   : > { %305 = vst [vmem:[%s2133_s5 + $0x68] sm:$0xff] %v304_v13  ;;  %v334_v28 = vld [vmem:[%s2128_s29 + $0x1c0] sm:$0xff]  ;;  %v336_v29 = vld [vmem:[%s2128_s29 + $0x1d0] sm:$0xff] }
  0x35   : > { %307 = vst [vmem:[%s2133_s5 + $0x70] sm:$0xff] %v306_v14  ;;  %v338_v30 = vld [vmem:[%s2128_s29 + $0x1e0] sm:$0xff]  ;;  %v340_v31 = vld [vmem:[%s2128_s29 + $0x1f0] sm:$0xff] }
  0x36   : > { %309 = vst [vmem:[%s2133_s5 + $0x78] sm:$0xff] %v308_v15 }
  0x37   : > { %311 = vst [vmem:[%s2133_s5 + $0x80] sm:$0xff] %v310_v16 }
  0x38   : > { %313 = vst [vmem:[%s2133_s5 + $0x88] sm:$0xff] %v312_v17 }
  0x39   : > { %315 = vst [vmem:[%s2133_s5 + $0x90] sm:$0xff] %v314_v18 }
  0x3a   : > { %317 = vst [vmem:[%s2133_s5 + $0x98] sm:$0xff] %v316_v19 }
  0x3b   : > { %319 = vst [vmem:[%s2133_s5 + $0xa0] sm:$0xff] %v318_v20 }
  0x3c   : > { %321 = vst [vmem:[%s2133_s5 + $0xa8] sm:$0xff] %v320_v21 }
  0x3d   : > { %323 = vst [vmem:[%s2133_s5 + $0xb0] sm:$0xff] %v322_v22 }
  0x3e   : > { %325 = vst [vmem:[%s2133_s5 + $0xb8] sm:$0xff] %v324_v23 }
  0x3f   : > { %327 = vst [vmem:[%s2133_s5 + $0xc0] sm:$0xff] %v326_v24 }
  0x40   : > { %329 = vst [vmem:[%s2133_s5 + $0xc8] sm:$0xff] %v328_v25 }
  0x41   : > { %331 = vst [vmem:[%s2133_s5 + $0xd0] sm:$0xff] %v330_v26 }
  0x42   : > { %333 = vst [vmem:[%s2133_s5 + $0xd8] sm:$0xff] %v332_v27 }
  0x43   : > { %335 = vst [vmem:[%s2133_s5 + $0xe0] sm:$0xff] %v334_v28 }
  0x44   : > { %337 = vst [vmem:[%s2133_s5 + $0xe8] sm:$0xff] %v336_v29 }
  0x45   : > { %339 = vst [vmem:[%s2133_s5 + $0xf0] sm:$0xff] %v338_v30 }
  0x46   : > { %341 = vst [vmem:[%s2133_s5 + $0xf8] sm:$0xff] %v340_v31 }
  0x47 PF: > { %p1430_p0 = scmp.ge.s32.totalorder %s1999_s24, 1  ;;  %p355_p1 = scmp.lt.s32.totalorder %s1999_s24, 5 }
  0x49   : > { %p356_p2 = pnand %p1430_p0, %p355_p1 }
  0x4a   : > { %s362_s13 = sand.u32 (!%p356_p2), 1, %s1975_s18   ;;  %s387_s14 = sand.u32 (!%p356_p2), 1, %s1967_s16  }
  0x4b   : > { %359 = sbr.rel (%p356_p2) target bundleno = 479 (0x1df), region = 66  ;;  %s1431_s25 = sshll.u32 (!%p356_p2), %s362_s13, 8 }
  0x4c   : > { %s1432_s26 = sshll.u32 (!%p356_p2), %s387_s14, 7  ;;  %s1433_s30 = sshll.u32 (!%p356_p2), %s1987_s21, 5 }
  0x4d   : > { %p400_p3 = scmp.lt.s32.totalorder (!%p356_p2), %s1433_s30, 63  ;;  %s2213_s27 = scalar_lea.vmem (!%p356_p2), [#allocation3], %s1431_s25 }
  0x4e   : > { %s2215_s18 = scalar_lea.vmem (!%p356_p2), [#allocation4], %s1432_s26  ;;  %p1437_p4 = scmp.ne.s32.totalorder (!%p356_p2), %s1983_s20, 0 }
  0x50   : > { %s2596_s30 = smov (!%p400_p3, %s1433_s30), 63  ;;  %415 = sbr.rel (%p1437_p4) target bundleno = 118 (0x76), region = 74 }
  0x51   : > { %s1434_s8 = sshll.u32 %s2596_s30, 3 }
  0x52   : > { %s2206_s29 = scalar_lea.vmem %s2566_s2, %s1434_s8  ;;  %s2211_s28 = scalar_lea.vmem %s2568_s4, %s1434_s8 }
  0x55   : > { %v2001_v32 = vmov 0.0  }
  0x56   : > { %416 = vst [vmem:[#allocation2 + $0xb0] sm:$0xff] %v2001_v32 }
  0x57   : > { %417 = vst [vmem:[#allocation2] sm:$0xff] %v2001_v32 }
  0x58   : > { %418 = vst [vmem:[#allocation2 + $0xd8] sm:$0xff] %v2001_v32 }
  0x59   : > { %419 = vst [vmem:[#allocation2 + $0x18] sm:$0xff] %v2001_v32 }
  0x5a   : > { %420 = vst [vmem:[#allocation2 + $0x50] sm:$0xff] %v2001_v32 }
  0x5b   : > { %421 = vst [vmem:[#allocation2 + $0x68] sm:$0xff] %v2001_v32 }
  0x5c   : > { %422 = vst [vmem:[#allocation2 + $0x30] sm:$0xff] %v2001_v32 }
  0x5d   : > { %423 = vst [vmem:[#allocation2 + $0x48] sm:$0xff] %v2001_v32 }
  0x5e   : > { %424 = vst [vmem:[#allocation2 + $0x80] sm:$0xff] %v2001_v32 }
  0x5f   : > { %425 = vst [vmem:[#allocation2 + $0x88] sm:$0xff] %v2001_v32 }
  0x60   : > { %426 = vst [vmem:[#allocation2 + $0xe8] sm:$0xff] %v2001_v32 }
  0x61   : > { %427 = vst [vmem:[#allocation2 + $0xb8] sm:$0xff] %v2001_v32 }
  0x62   : > { %428 = vst [vmem:[#allocation2 + $0x60] sm:$0xff] %v2001_v32 }
  0x63   : > { %429 = vst [vmem:[#allocation2 + $0xf0] sm:$0xff] %v2001_v32 }
  0x64   : > { %430 = vst [vmem:[#allocation2 + $0x8] sm:$0xff] %v2001_v32 }
  0x65   : > { %431 = vst [vmem:[#allocation2 + $0x78] sm:$0xff] %v2001_v32 }
  0x66   : > { %432 = vst [vmem:[#allocation2 + $0x38] sm:$0xff] %v2001_v32 }
  0x67   : > { %433 = vst [vmem:[#allocation2 + $0x58] sm:$0xff] %v2001_v32 }
  0x68   : > { %434 = vst [vmem:[#allocation2 + $0x40] sm:$0xff] %v2001_v32 }
  0x69   : > { %435 = vst [vmem:[#allocation2 + $0xc8] sm:$0xff] %v2001_v32 }
  0x6a   : > { %436 = vst [vmem:[#allocation2 + $0xe0] sm:$0xff] %v2001_v32 }
  0x6b   : > { %437 = vst [vmem:[#allocation2 + $0x90] sm:$0xff] %v2001_v32 }
  0x6c   : > { %438 = vst [vmem:[#allocation2 + $0x70] sm:$0xff] %v2001_v32 }
  0x6d   : > { %439 = vst [vmem:[#allocation2 + $0xc0] sm:$0xff] %v2001_v32 }
  0x6e   : > { %440 = vst [vmem:[#allocation2 + $0xa8] sm:$0xff] %v2001_v32 }
  0x6f   : > { %441 = vst [vmem:[#allocation2 + $0xd0] sm:$0xff] %v2001_v32 }
  0x70   : > { %442 = vst [vmem:[#allocation2 + $0x10] sm:$0xff] %v2001_v32 }
  0x71   : > { %443 = vst [vmem:[#allocation2 + $0x28] sm:$0xff] %v2001_v32 }
  0x72   : > { %444 = vst [vmem:[#allocation2 + $0xa0] sm:$0xff] %v2001_v32 }
  0x73   : > { %445 = vst [vmem:[#allocation2 + $0xf8] sm:$0xff] %v2001_v32 }
  0x74   : > { %446 = vst [vmem:[#allocation2 + $0x20] sm:$0xff] %v2001_v32 }
  0x75   : > { %447 = vst [vmem:[#allocation2 + $0x98] sm:$0xff] %v2001_v32 }
  0x76 PF: > { %s1438_s0 = sshll.u32 %s1983_s20, 8  ;;  %v1442_v47 = vld [vmem:[%s2213_s27] sm:$0xf]  ;;  %v1640_v49 = vld [vmem:[%s2213_s27 + $0x4] sm:$0xf0]  ;;  %p1632_p5 = scmp.ne.s32.totalorder %s1983_s20, 1 }
  0x77   : > { %s513_s13 = sshra.s32 %s1438_s0, 3  ;;  %v1506_v50 = vld [vmem:[%s2213_s27 + $0x80] sm:$0xf]  ;;  %v1656_v52 = vld [vmem:[%s2213_s27 + $0x84] sm:$0xf0]  ;;  %v1443_v57 = vor.u32 %v1640_v49, %v1442_v47 }
  0x78   : > { %s1439_s25 = sshll.u32 %s513_s13, 2  ;;  %v1639_v53 = vld [vmem:[%s2213_s27 + $0x4] sm:$0xf]  ;;  %v1444_v54 = vld [vmem:[%s2213_s27 + $0x8] sm:$0xf0]  ;;  %v1507_v58 = vor.u32 %v1656_v52, %v1506_v50 }
  0x79   : > { %s2222_s8 = scalar_lea.vmem %s2565_s1, %s1439_s25  ;;  %v1655_v55 = vld [vmem:[%s2213_s27 + $0x84] sm:$0xf]  ;;  %v1508_v56 = vld [vmem:[%s2213_s27 + $0x88] sm:$0xf0]  ;;  %v1447_v59 = vor.u32 %v1639_v53, %v1444_v54  ;;  %v1450_v61 = vld [vmem:[%s2213_s27 + $0x10] sm:$0xf] }
  0x7a   : > { %v1678_v33 = vld [vmem:[%s2222_s8 + $0x38] sm:$0xff]  ;;  %v1677_v35 = vld [vmem:[%s2222_s8 + $0x30] sm:$0xff]  ;;  %v1676_v37 = vld [vmem:[%s2222_s8 + $0x28] sm:$0xff]  ;;  %v1511_v60 = vor.u32 %v1655_v55, %v1508_v56 }
  0x7b   : > { %v1686_v34 = vld [vmem:[%s2222_s8 + $0x78] sm:$0xff]  ;;  %805 = vmatpush.bf16.msra.mxu0 %v1678_v33  ;;  %1783 = vmatpush.bf16.msra.mxu2 %v1678_v33  ;;  %v1685_v36 = vld [vmem:[%s2222_s8 + $0x70] sm:$0xff]  ;;  %v1684_v38 = vld [vmem:[%s2222_s8 + $0x68] sm:$0xff] }
  0x7c   : > { %894 = vmatpush.bf16.msra.mxu1 %v1686_v34  ;;  %1791 = vmatpush.bf16.msra.mxu3 %v1686_v34  ;;  %v1675_v39 = vld [vmem:[%s2222_s8 + $0x20] sm:$0xff]  ;;  %v1674_v41 = vld [vmem:[%s2222_s8 + $0x18] sm:$0xff]  ;;  %v1673_v43 = vld [vmem:[%s2222_s8 + $0x10] sm:$0xff] }
  0x7d   : > { %v1683_v40 = vld [vmem:[%s2222_s8 + $0x60] sm:$0xff]  ;;  %v1682_v42 = vld [vmem:[%s2222_s8 + $0x58] sm:$0xff]  ;;  %v1681_v44 = vld [vmem:[%s2222_s8 + $0x50] sm:$0xff] }
  0x7e   : > { %v1672_v45 = vld [vmem:[%s2222_s8 + $0x8] sm:$0xff]  ;;  %v1671_v48 = vld [vmem:[%s2222_s8] sm:$0xff]  ;;  %v1642_v62 = vld [vmem:[%s2213_s27 + $0x14] sm:$0xf0] }
  0x7f   : > { %806 = vmatpush.bf16.msra.mxu0 %v1677_v35  ;;  %1784 = vmatpush.bf16.msra.mxu2 %v1677_v35  ;;  %v1680_v46 = vld [vmem:[%s2222_s8 + $0x48] sm:$0xff]  ;;  %v1679_v51 = vld [vmem:[%s2222_s8 + $0x40] sm:$0xff]  ;;  %v1514_v63 = vld [vmem:[%s2213_s27 + $0x90] sm:$0xf]  ;;  %v1451_v5 = vor.u32 %v1642_v62, %v1450_v61 }
  0x80   : > { %895 = vmatpush.bf16.msra.mxu1 %v1685_v36  ;;  %1792 = vmatpush.bf16.msra.mxu3 %v1685_v36  ;;  %v1658_v0 = vld [vmem:[%s2213_s27 + $0x94] sm:$0xf0]  ;;  %v1641_v1 = vld [vmem:[%s2213_s27 + $0x14] sm:$0xf]  ;;  %v1452_v2 = vld [vmem:[%s2213_s27 + $0x18] sm:$0xf0] }
  0x81   : > { %v1657_v3 = vld [vmem:[%s2213_s27 + $0x94] sm:$0xf]  ;;  %v1516_v4 = vld [vmem:[%s2213_s27 + $0x98] sm:$0xf0]  ;;  %v1515_v6 = vor.u32 %v1658_v0, %v1514_v63  ;;  %v1455_v7 = vor.u32 %v1641_v1, %v1452_v2  ;;  %v1458_v9 = vld [vmem:[%s2213_s27 + $0x20] sm:$0xf] }
  0x82   : > { %v1519_v8 = vor.u32 %v1657_v3, %v1516_v4  ;;  %v1644_v10 = vld [vmem:[%s2213_s27 + $0x24] sm:$0xf0]  ;;  %v1522_v11 = vld [vmem:[%s2213_s27 + $0xa0] sm:$0xf]  ;;  %v1643_v13 = vld [vmem:[%s2213_s27 + $0x24] sm:$0xf] }
  0x83   : > { %807 = vmatpush.bf16.msra.mxu0 %v1676_v37  ;;  %1785 = vmatpush.bf16.msra.mxu2 %v1676_v37  ;;  %v1660_v12 = vld [vmem:[%s2213_s27 + $0xa4] sm:$0xf0]  ;;  %v1460_v14 = vld [vmem:[%s2213_s27 + $0x28] sm:$0xf0]  ;;  %v1659_v15 = vld [vmem:[%s2213_s27 + $0xa4] sm:$0xf]  ;;  %v1459_v17 = vor.u32 %v1644_v10, %v1458_v9 }
  0x84   : > { %896 = vmatpush.bf16.msra.mxu1 %v1684_v38  ;;  %1793 = vmatpush.bf16.msra.mxu3 %v1684_v38  ;;  %v1524_v16 = vld [vmem:[%s2213_s27 + $0xa8] sm:$0xf0]  ;;  %v1523_v18 = vor.u32 %v1660_v12, %v1522_v11  ;;  %v1463_v19 = vor.u32 %v1643_v13, %v1460_v14  ;;  %v1466_v21 = vld [vmem:[%s2213_s27 + $0x30] sm:$0xf]  ;;  %v1646_v22 = vld [vmem:[%s2213_s27 + $0x34] sm:$0xf0] }
  0x85   : > { %v1527_v20 = vor.u32 %v1659_v15, %v1524_v16  ;;  %v1530_v23 = vld [vmem:[%s2213_s27 + $0xb0] sm:$0xf]  ;;  %v1662_v24 = vld [vmem:[%s2213_s27 + $0xb4] sm:$0xf0]  ;;  %v1645_v25 = vld [vmem:[%s2213_s27 + $0x34] sm:$0xf]  ;;  %v1467_v29 = vor.u32 %v1646_v22, %v1466_v21 }
  0x86   : > { %v1468_v26 = vld [vmem:[%s2213_s27 + $0x38] sm:$0xf0]  ;;  %v1661_v27 = vld [vmem:[%s2213_s27 + $0xb4] sm:$0xf]  ;;  %v1531_v30 = vor.u32 %v1662_v24, %v1530_v23  ;;  %v1474_v33 = vld [vmem:[%s2213_s27 + $0x40] sm:$0xf] }
  0x87   : > { %808 = vmatpush.bf16.msra.mxu0 %v1675_v39  ;;  %1786 = vmatpush.bf16.msra.mxu2 %v1675_v39  ;;  %v1532_v28 = vld [vmem:[%s2213_s27 + $0xb8] sm:$0xf0]  ;;  %v1471_v31 = vor.u32 %v1645_v25, %v1468_v26  ;;  %v1648_v34 = vld [vmem:[%s2213_s27 + $0x44] sm:$0xf0]  ;;  %v1538_v35 = vld [vmem:[%s2213_s27 + $0xc0] sm:$0xf] }
  0x88   : > { %897 = vmatpush.bf16.msra.mxu1 %v1683_v40  ;;  %1794 = vmatpush.bf16.msra.mxu3 %v1683_v40  ;;  %v1535_v32 = vor.u32 %v1661_v27, %v1532_v28  ;;  %v1664_v36 = vld [vmem:[%s2213_s27 + $0xc4] sm:$0xf0]  ;;  %v1647_v37 = vld [vmem:[%s2213_s27 + $0x44] sm:$0xf]  ;;  %v1476_v38 = vld [vmem:[%s2213_s27 + $0x48] sm:$0xf0] }
  0x89   : > { %v1663_v39 = vld [vmem:[%s2213_s27 + $0xc4] sm:$0xf]  ;;  %v1540_v40 = vld [vmem:[%s2213_s27 + $0xc8] sm:$0xf0]  ;;  %v1546_v47 = vld [vmem:[%s2213_s27 + $0xd0] sm:$0xf] }
  0x8a   : > { %v1649_v49 = vld [vmem:[%s2213_s27 + $0x54] sm:$0xf]  ;;  %v1484_v50 = vld [vmem:[%s2213_s27 + $0x58] sm:$0xf0]  ;;  %v1651_v61 = vld [vmem:[%s2213_s27 + $0x64] sm:$0xf] }
  0x8b   : > { %809 = vmatpush.bf16.msra.mxu0 %v1674_v41  ;;  %1787 = vmatpush.bf16.msra.mxu2 %v1674_v41  ;;  %v1475_v41 = vor.u32 %v1648_v34, %v1474_v33  ;;  %v1548_v52 = vld [vmem:[%s2213_s27 + $0xd8] sm:$0xf0]  ;;  %v1487_v55 = vor.u32 %v1649_v49, %v1484_v50  ;;  %v1492_v62 = vld [vmem:[%s2213_s27 + $0x68] sm:$0xf0]  ;;  %v1667_v63 = vld [vmem:[%s2213_s27 + $0xe4] sm:$0xf] }
  0x8c   : > { %898 = vmatpush.bf16.msra.mxu1 %v1682_v42  ;;  %1795 = vmatpush.bf16.msra.mxu3 %v1682_v42  ;;  %v1539_v42 = vor.u32 %v1664_v36, %v1538_v35  ;;  %v1556_v0 = vld [vmem:[%s2213_s27 + $0xe8] sm:$0xf0]  ;;  %v1495_v3 = vor.u32 %v1651_v61, %v1492_v62  ;;  %v1653_v9 = vld [vmem:[%s2213_s27 + $0x74] sm:$0xf]  ;;  %v1500_v10 = vld [vmem:[%s2213_s27 + $0x78] sm:$0xf0] }
  0x8d   : > { %v1559_v4 = vor.u32 %v1667_v63, %v1556_v0  ;;  %v1669_v11 = vld [vmem:[%s2213_s27 + $0xf4] sm:$0xf]  ;;  %v1564_v12 = vld [vmem:[%s2213_s27 + $0xf8] sm:$0xf0]  ;;  %v1503_v15 = vor.u32 %v1653_v9, %v1500_v10  ;;  %v450_v27 = vld [vmem:[#allocation2] sm:$0xff] }
  0x8e   : > { %v1567_v16 = vor.u32 %v1669_v11, %v1564_v12  ;;  %v465_v23 = vld [vmem:[#allocation2 + $0x38] sm:$0xff]  ;;  %v469_v63 = vld [vmem:[#allocation2 + $0xe0] sm:$0xff]  ;;  %v470_v9 = vld [vmem:[#allocation2 + $0x90] sm:$0xff] }
  0x8f   : > { %810 = vmatpush.bf16.msra.mxu0 %v1673_v43  ;;  %1788 = vmatpush.bf16.msra.mxu2 %v1673_v43  ;;  %v1479_v43 = vor.u32 %v1647_v37, %v1476_v38  ;;  %v466_v33 = vld [vmem:[#allocation2 + $0x58] sm:$0xff] }
  0x90   : > { %899 = vmatpush.bf16.msra.mxu1 %v1681_v44  ;;  %1796 = vmatpush.bf16.msra.mxu3 %v1681_v44  ;;  %v1543_v44 = vor.u32 %v1663_v39, %v1540_v40  ;;  %v451_v37 = vld [vmem:[#allocation2 + $0xd8] sm:$0xff] }
  0x93   : > { %811 = vmatpush.bf16.msra.mxu0 %v1672_v45  ;;  %1789 = vmatpush.bf16.msra.mxu2 %v1672_v45  ;;  %v1482_v45 = vld [vmem:[%s2213_s27 + $0x50] sm:$0xf] }
  0x94   : > { %900 = vmatpush.bf16.msra.mxu1 %v1680_v46  ;;  %1797 = vmatpush.bf16.msra.mxu3 %v1680_v46  ;;  %v1650_v46 = vld [vmem:[%s2213_s27 + $0x54] sm:$0xf0] }
  0x95   : > { %v1483_v53 = vor.u32 %v1650_v46, %v1482_v45 }
  0x97   : > { %812 = vmatpush.bf16.msra.mxu0 %v1671_v48  ;;  %1790 = vmatpush.bf16.msra.mxu2 %v1671_v48  ;;  %v1666_v48 = vld [vmem:[%s2213_s27 + $0xd4] sm:$0xf0] }
  0x98   : > { %901 = vmatpush.bf16.msra.mxu1 %v1679_v51  ;;  %1798 = vmatpush.bf16.msra.mxu3 %v1679_v51  ;;  %v1665_v51 = vld [vmem:[%s2213_s27 + $0xd4] sm:$0xf]  ;;  %v1547_v54 = vor.u32 %v1666_v48, %v1546_v47  ;;  %v452_v47 = vld [vmem:[#allocation2 + $0x18] sm:$0xff] }
  0x99   : > { %v1551_v56 = vor.u32 %v1665_v51, %v1548_v52 }
  0x9a   : > { %813 = vmatmul.bf16.vlgmr.msra.gmra.mxu0 %v1443_v57  ;;  %853 = vmatmul.bf16.vlgmr.msra.gmra.mxu2 %v1507_v58  ;;  %v1490_v57 = vld [vmem:[%s2213_s27 + $0x60] sm:$0xf]  ;;  %v1652_v58 = vld [vmem:[%s2213_s27 + $0x64] sm:$0xf0] }
  0x9b   : > { %902 = vmatmul.bf16.vlgmr.msra.gmra.mxu1 %v1447_v59  ;;  %942 = vmatmul.bf16.vlgmr.msra.gmra.mxu3 %v1511_v60  ;;  %v1554_v59 = vld [vmem:[%s2213_s27 + $0xe0] sm:$0xf]  ;;  %v1668_v60 = vld [vmem:[%s2213_s27 + $0xe4] sm:$0xf0]  ;;  %v1491_v1 = vor.u32 %v1652_v58, %v1490_v57  ;;  %v453_v57 = vld [vmem:[#allocation2 + $0x50] sm:$0xff] }
  0x9c   : > { %v1555_v2 = vor.u32 %v1668_v60, %v1554_v59 }
  0xaa   : > { %818 = vmatmul.bf16.gmra.mxu0 %v1451_v5  ;;  %858 = vmatmul.bf16.gmra.mxu2 %v1515_v6  ;;  %v1498_v5 = vld [vmem:[%s2213_s27 + $0x70] sm:$0xf]  ;;  %v1654_v6 = vld [vmem:[%s2213_s27 + $0x74] sm:$0xf0] }
  0xab   : > { %907 = vmatmul.bf16.gmra.mxu1 %v1455_v7  ;;  %947 = vmatmul.bf16.gmra.mxu3 %v1519_v8  ;;  %v1562_v7 = vld [vmem:[%s2213_s27 + $0xf0] sm:$0xf]  ;;  %v1670_v8 = vld [vmem:[%s2213_s27 + $0xf4] sm:$0xf0]  ;;  %v1499_v13 = vor.u32 %v1654_v6, %v1498_v5 }
  0xac   : > { %v1563_v14 = vor.u32 %v1670_v8, %v1562_v7 }
  0xba   : > { %823 = vmatmul.bf16.gmra.mxu0 %v1459_v17  ;;  %863 = vmatmul.bf16.gmra.mxu2 %v1523_v18  ;;  %v449_v18 = vld [vmem:[#allocation2 + $0xb0] sm:$0xff] }
  0xbb   : > { %912 = vmatmul.bf16.gmra.mxu1 %v1463_v19  ;;  %952 = vmatmul.bf16.gmra.mxu3 %v1527_v20 }
  0xca   : > { %828 = vmatmul.bf16.gmra.mxu0 %v1467_v29  ;;  %868 = vmatmul.bf16.gmra.mxu2 %v1531_v30 }
  0xcb   : > { %917 = vmatmul.bf16.gmra.mxu1 %v1471_v31  ;;  %957 = vmatmul.bf16.gmra.mxu3 %v1535_v32 }
  0xda   : > { %833 = vmatmul.bf16.gmra.mxu0 %v1475_v41  ;;  %873 = vmatmul.bf16.gmra.mxu2 %v1539_v42 }
  0xdb   : > { %922 = vmatmul.bf16.gmra.mxu1 %v1479_v43  ;;  %962 = vmatmul.bf16.gmra.mxu3 %v1543_v44  ;;  %v467_v43 = vld [vmem:[#allocation2 + $0x40] sm:$0xff] }
  0xea   : > { %838 = vmatmul.bf16.gmra.mxu0 %v1483_v53  ;;  %878 = vmatmul.bf16.gmra.mxu2 %v1547_v54  ;;  %v468_v53 = vld [vmem:[#allocation2 + $0xc8] sm:$0xff] }
  0xeb   : > { %927 = vmatmul.bf16.gmra.mxu1 %v1487_v55  ;;  %967 = vmatmul.bf16.gmra.mxu3 %v1551_v56 }
  0xfa   : > { %843 = vmatmul.bf16.gmra.mxu0 %v1491_v1  ;;  %883 = vmatmul.bf16.gmra.mxu2 %v1555_v2 }
  0xfb   : > { %932 = vmatmul.bf16.gmra.mxu1 %v1495_v3  ;;  %972 = vmatmul.bf16.gmra.mxu3 %v1559_v4  ;;  %v454_v3 = vld [vmem:[#allocation2 + $0x68] sm:$0xff] }
 0x10a   : > { %848 = vmatmul.bf16.gmra.mxu0 %v1499_v13  ;;  %888 = vmatmul.bf16.gmra.mxu2 %v1563_v14  ;;  %v455_v13 = vld [vmem:[#allocation2 + $0x30] sm:$0xff] }
 0x10b   : > { %937 = vmatmul.bf16.gmra.mxu1 %v1503_v15  ;;  %977 = vmatmul.bf16.gmra.mxu3 %v1567_v16 }
 0x117   : > { %v814_v17 = vpop.f32.mrf.mxu0 }
 0x118   : > { %v903_v19 = vpop.f32.mrf.mxu1 }
 0x119   : > { %v904_v20 = vadd.f32 %v903_v19, %v814_v17  ;;  %v471_v19 = vld [vmem:[#allocation2 + $0x70] sm:$0xff] }
 0x11b   : > { %v983_v21 = vadd.f32 %v904_v20, %v449_v18 }
 0x11d   : > { %1015 = vst [vmem:[#allocation2 + $0xb0] sm:$0xff] %v983_v21  ;;  %v854_v22 = vpop.f32.mrf.mxu2 }
 0x11e   : > { %v943_v24 = vpop.f32.mrf.mxu3 }
 0x11f   : > { %v944_v25 = vadd.f32 %v943_v24, %v854_v22  ;;  %v816_v26 = vpop.f32.mrf.mxu0 }
 0x120   : > { %v905_v28 = vpop.f32.mrf.mxu1 }
 0x121   : > { %v999_v29 = vadd.f32 %v944_v25, %v465_v23  ;;  %v906_v30 = vadd.f32 %v905_v28, %v816_v26  ;;  %v456_v23 = vld [vmem:[#allocation2 + $0x48] sm:$0xff] }
 0x123   : > { %1031 = vst [vmem:[#allocation2 + $0x38] sm:$0xff] %v999_v29  ;;  %v984_v31 = vadd.f32 %v906_v30, %v450_v27  ;;  %v472_v29 = vld [vmem:[#allocation2 + $0xc0] sm:$0xff] }
 0x125   : > { %1016 = vst [vmem:[#allocation2] sm:$0xff] %v984_v31  ;;  %v856_v32 = vpop.f32.mrf.mxu2 }
 0x126   : > { %v945_v34 = vpop.f32.mrf.mxu3 }
 0x127   : > { %v946_v35 = vadd.f32 %v945_v34, %v856_v32  ;;  %v819_v36 = vpop.f32.mrf.mxu0 }
 0x128   : > { %v908_v38 = vpop.f32.mrf.mxu1 }
 0x129   : > { %v1000_v39 = vadd.f32 %v946_v35, %v466_v33  ;;  %v909_v40 = vadd.f32 %v908_v38, %v819_v36  ;;  %v457_v33 = vld [vmem:[#allocation2 + $0x80] sm:$0xff] }
 0x12b   : > { %1032 = vst [vmem:[#allocation2 + $0x58] sm:$0xff] %v1000_v39  ;;  %v985_v41 = vadd.f32 %v909_v40, %v451_v37  ;;  %v473_v39 = vld [vmem:[#allocation2 + $0xa8] sm:$0xff] }
 0x12d   : > { %1017 = vst [vmem:[#allocation2 + $0xd8] sm:$0xff] %v985_v41  ;;  %v859_v42 = vpop.f32.mrf.mxu2 }
 0x12e   : > { %v948_v44 = vpop.f32.mrf.mxu3 }
 0x12f   : > { %v949_v45 = vadd.f32 %v948_v44, %v859_v42  ;;  %v821_v46 = vpop.f32.mrf.mxu0 }
 0x130   : > { %v910_v48 = vpop.f32.mrf.mxu1 }
 0x131   : > { %v1001_v49 = vadd.f32 %v949_v45, %v467_v43  ;;  %v911_v50 = vadd.f32 %v910_v48, %v821_v46  ;;  %v458_v43 = vld [vmem:[#allocation2 + $0x88] sm:$0xff] }
 0x133   : > { %1033 = vst [vmem:[#allocation2 + $0x40] sm:$0xff] %v1001_v49  ;;  %v986_v51 = vadd.f32 %v911_v50, %v452_v47  ;;  %v474_v49 = vld [vmem:[#allocation2 + $0xd0] sm:$0xff] }
 0x135   : > { %1018 = vst [vmem:[#allocation2 + $0x18] sm:$0xff] %v986_v51  ;;  %v861_v52 = vpop.f32.mrf.mxu2 }
 0x136   : > { %v950_v54 = vpop.f32.mrf.mxu3 }
 0x137   : > { %v951_v55 = vadd.f32 %v950_v54, %v861_v52  ;;  %v824_v56 = vpop.f32.mrf.mxu0 }
 0x138   : > { %v913_v58 = vpop.f32.mrf.mxu1 }
 0x139   : > { %v1002_v59 = vadd.f32 %v951_v55, %v468_v53  ;;  %v914_v60 = vadd.f32 %v913_v58, %v824_v56  ;;  %v459_v53 = vld [vmem:[#allocation2 + $0xe8] sm:$0xff] }
 0x13b   : > { %1034 = vst [vmem:[#allocation2 + $0xc8] sm:$0xff] %v1002_v59  ;;  %v987_v61 = vadd.f32 %v914_v60, %v453_v57  ;;  %v475_v59 = vld [vmem:[#allocation2 + $0x10] sm:$0xff] }
 0x13d   : > { %1019 = vst [vmem:[#allocation2 + $0x50] sm:$0xff] %v987_v61  ;;  %v864_v62 = vpop.f32.mrf.mxu2 }
 0x13e   : > { %v953_v0 = vpop.f32.mrf.mxu3 }
 0x13f   : > { %v954_v1 = vadd.f32 %v953_v0, %v864_v62  ;;  %v826_v2 = vpop.f32.mrf.mxu0 }
 0x140   : > { %v915_v4 = vpop.f32.mrf.mxu1 }
 0x141   : > { %v1003_v5 = vadd.f32 %v954_v1, %v469_v63  ;;  %v916_v6 = vadd.f32 %v915_v4, %v826_v2  ;;  %v460_v63 = vld [vmem:[#allocation2 + $0xb8] sm:$0xff] }
 0x143   : > { %1035 = vst [vmem:[#allocation2 + $0xe0] sm:$0xff] %v1003_v5  ;;  %v988_v7 = vadd.f32 %v916_v6, %v454_v3  ;;  %v476_v5 = vld [vmem:[#allocation2 + $0x28] sm:$0xff] }
 0x145   : > { %1020 = vst [vmem:[#allocation2 + $0x68] sm:$0xff] %v988_v7  ;;  %v866_v8 = vpop.f32.mrf.mxu2 }
 0x146   : > { %v955_v10 = vpop.f32.mrf.mxu3 }
 0x147   : > { %v956_v11 = vadd.f32 %v955_v10, %v866_v8  ;;  %v829_v12 = vpop.f32.mrf.mxu0 }
 0x148   : > { %v918_v14 = vpop.f32.mrf.mxu1 }
 0x149   : > { %v1004_v15 = vadd.f32 %v956_v11, %v470_v9  ;;  %v919_v16 = vadd.f32 %v918_v14, %v829_v12  ;;  %v461_v9 = vld [vmem:[#allocation2 + $0x60] sm:$0xff] }
 0x14b   : > { %1036 = vst [vmem:[#allocation2 + $0x90] sm:$0xff] %v1004_v15  ;;  %v989_v17 = vadd.f32 %v919_v16, %v455_v13  ;;  %v477_v15 = vld [vmem:[#allocation2 + $0xa0] sm:$0xff] }
 0x14d   : > { %1021 = vst [vmem:[#allocation2 + $0x30] sm:$0xff] %v989_v17  ;;  %v869_v18 = vpop.f32.mrf.mxu2 }
 0x14e   : > { %v958_v20 = vpop.f32.mrf.mxu3 }
 0x14f   : > { %v959_v21 = vadd.f32 %v958_v20, %v869_v18  ;;  %v831_v22 = vpop.f32.mrf.mxu0 }
 0x150   : > { %v920_v24 = vpop.f32.mrf.mxu1 }
 0x151   : > { %v1005_v25 = vadd.f32 %v959_v21, %v471_v19  ;;  %v921_v26 = vadd.f32 %v920_v24, %v831_v22  ;;  %v462_v19 = vld [vmem:[#allocation2 + $0xf0] sm:$0xff] }
 0x153   : > { %1037 = vst [vmem:[#allocation2 + $0x70] sm:$0xff] %v1005_v25  ;;  %v990_v27 = vadd.f32 %v921_v26, %v456_v23  ;;  %v478_v25 = vld [vmem:[#allocation2 + $0xf8] sm:$0xff] }
 0x155   : > { %1022 = vst [vmem:[#allocation2 + $0x48] sm:$0xff] %v990_v27  ;;  %v871_v28 = vpop.f32.mrf.mxu2 }
 0x156   : > { %v960_v30 = vpop.f32.mrf.mxu3 }
 0x157   : > { %v961_v31 = vadd.f32 %v960_v30, %v871_v28  ;;  %v834_v32 = vpop.f32.mrf.mxu0 }
 0x158   : > { %v923_v34 = vpop.f32.mrf.mxu1 }
 0x159   : > { %v1006_v35 = vadd.f32 %v961_v31, %v472_v29  ;;  %v924_v36 = vadd.f32 %v923_v34, %v834_v32  ;;  %v463_v29 = vld [vmem:[#allocation2 + $0x8] sm:$0xff] }
 0x15b   : > { %1038 = vst [vmem:[#allocation2 + $0xc0] sm:$0xff] %v1006_v35  ;;  %v991_v37 = vadd.f32 %v924_v36, %v457_v33  ;;  %v479_v35 = vld [vmem:[#allocation2 + $0x20] sm:$0xff] }
 0x15d   : > { %1023 = vst [vmem:[#allocation2 + $0x80] sm:$0xff] %v991_v37  ;;  %v874_v38 = vpop.f32.mrf.mxu2 }
 0x15e   : > { %v963_v40 = vpop.f32.mrf.mxu3 }
 0x15f   : > { %v964_v41 = vadd.f32 %v963_v40, %v874_v38  ;;  %v836_v42 = vpop.f32.mrf.mxu0 }
 0x160   : > { %v925_v44 = vpop.f32.mrf.mxu1 }
 0x161   : > { %v1007_v45 = vadd.f32 %v964_v41, %v473_v39  ;;  %v926_v46 = vadd.f32 %v925_v44, %v836_v42  ;;  %v464_v39 = vld [vmem:[#allocation2 + $0x78] sm:$0xff] }
 0x163   : > { %1039 = vst [vmem:[#allocation2 + $0xa8] sm:$0xff] %v1007_v45  ;;  %v992_v47 = vadd.f32 %v926_v46, %v458_v43  ;;  %v480_v45 = vld [vmem:[#allocation2 + $0x98] sm:$0xff] }
 0x165   : > { %1024 = vst [vmem:[#allocation2 + $0x88] sm:$0xff] %v992_v47  ;;  %v876_v48 = vpop.f32.mrf.mxu2 }
 0x166   : > { %v965_v50 = vpop.f32.mrf.mxu3 }
 0x167   : > { %v966_v51 = vadd.f32 %v965_v50, %v876_v48  ;;  %v839_v52 = vpop.f32.mrf.mxu0 }
 0x168   : > { %v928_v54 = vpop.f32.mrf.mxu1 }
 0x169   : > { %v1008_v55 = vadd.f32 %v966_v51, %v474_v49  ;;  %v929_v56 = vadd.f32 %v928_v54, %v839_v52 }
 0x16b   : > { %1040 = vst [vmem:[#allocation2 + $0xd0] sm:$0xff] %v1008_v55  ;;  %v993_v57 = vadd.f32 %v929_v56, %v459_v53 }
 0x16d   : > { %1025 = vst [vmem:[#allocation2 + $0xe8] sm:$0xff] %v993_v57  ;;  %v879_v58 = vpop.f32.mrf.mxu2 }
 0x16e   : > { %v968_v60 = vpop.f32.mrf.mxu3 }
 0x16f   : > { %v969_v61 = vadd.f32 %v968_v60, %v879_v58  ;;  %v841_v62 = vpop.f32.mrf.mxu0 }
 0x170   : > { %v930_v0 = vpop.f32.mrf.mxu1 }
 0x171   : > { %v1009_v1 = vadd.f32 %v969_v61, %v475_v59  ;;  %v931_v2 = vadd.f32 %v930_v0, %v841_v62 }
 0x173   : > { %1041 = vst [vmem:[#allocation2 + $0x10] sm:$0xff] %v1009_v1  ;;  %v994_v3 = vadd.f32 %v931_v2, %v460_v63 }
 0x175   : > { %1026 = vst [vmem:[#allocation2 + $0xb8] sm:$0xff] %v994_v3  ;;  %v881_v4 = vpop.f32.mrf.mxu2 }
 0x176   : > { %v970_v6 = vpop.f32.mrf.mxu3 }
 0x177   : > { %v971_v7 = vadd.f32 %v970_v6, %v881_v4  ;;  %v844_v8 = vpop.f32.mrf.mxu0 }
 0x178   : > { %v933_v10 = vpop.f32.mrf.mxu1 }
 0x179   : > { %v1010_v11 = vadd.f32 %v971_v7, %v476_v5  ;;  %v934_v12 = vadd.f32 %v933_v10, %v844_v8 }
 0x17b   : > { %1042 = vst [vmem:[#allocation2 + $0x28] sm:$0xff] %v1010_v11  ;;  %v995_v13 = vadd.f32 %v934_v12, %v461_v9 }
 0x17d   : > { %1027 = vst [vmem:[#allocation2 + $0x60] sm:$0xff] %v995_v13  ;;  %v884_v14 = vpop.f32.mrf.mxu2 }
 0x17e   : > { %v973_v16 = vpop.f32.mrf.mxu3 }
 0x17f   : > { %v974_v17 = vadd.f32 %v973_v16, %v884_v14  ;;  %v846_v18 = vpop.f32.mrf.mxu0 }
 0x180   : > { %v935_v20 = vpop.f32.mrf.mxu1 }
 0x181   : > { %v1011_v21 = vadd.f32 %v974_v17, %v477_v15  ;;  %v936_v22 = vadd.f32 %v935_v20, %v846_v18 }
 0x183   : > { %1043 = vst [vmem:[#allocation2 + $0xa0] sm:$0xff] %v1011_v21  ;;  %v996_v23 = vadd.f32 %v936_v22, %v462_v19 }
 0x185   : > { %1028 = vst [vmem:[#allocation2 + $0xf0] sm:$0xff] %v996_v23  ;;  %v886_v24 = vpop.f32.mrf.mxu2 }
 0x186   : > { %v975_v26 = vpop.f32.mrf.mxu3 }
 0x187   : > { %v976_v27 = vadd.f32 %v975_v26, %v886_v24  ;;  %v849_v28 = vpop.f32.mrf.mxu0 }
 0x188   : > { %v938_v30 = vpop.f32.mrf.mxu1 }
 0x189   : > { %v1012_v31 = vadd.f32 %v976_v27, %v478_v25  ;;  %v939_v32 = vadd.f32 %v938_v30, %v849_v28 }
 0x18b   : > { %1044 = vst [vmem:[#allocation2 + $0xf8] sm:$0xff] %v1012_v31  ;;  %v997_v33 = vadd.f32 %v939_v32, %v463_v29 }
 0x18d   : > { %1029 = vst [vmem:[#allocation2 + $0x8] sm:$0xff] %v997_v33  ;;  %v889_v34 = vpop.f32.mrf.mxu2 }
 0x18e   : > { %v978_v36 = vpop.f32.mrf.mxu3 }
 0x18f   : > { %v979_v37 = vadd.f32 %v978_v36, %v889_v34  ;;  %v851_v38 = vpop.f32.mrf.mxu0 }
 0x190   : > { %v940_v40 = vpop.f32.mrf.mxu1 }
 0x191   : > { %v1013_v41 = vadd.f32 %v979_v37, %v479_v35  ;;  %v941_v42 = vadd.f32 %v940_v40, %v851_v38 }
 0x193   : > { %1045 = vst [vmem:[#allocation2 + $0x20] sm:$0xff] %v1013_v41  ;;  %v998_v43 = vadd.f32 %v941_v42, %v464_v39 }
 0x195   : > { %1030 = vst [vmem:[#allocation2 + $0x78] sm:$0xff] %v998_v43  ;;  %v891_v44 = vpop.f32.mrf.mxu2 }
 0x196   : > { %v980_v46 = vpop.f32.mrf.mxu3 }
 0x197   : > { %v981_v47 = vadd.f32 %v980_v46, %v891_v44  ;;  %1050 = sbr.rel (%p1632_p5) target bundleno = 463 (0x1cf), region = 78 }
 0x199   : > { %v1014_v48 = vadd.f32 %v981_v47, %v480_v45 }
 0x19b   : > { %1046 = vst [vmem:[#allocation2 + $0x98] sm:$0xff] %v1014_v48 }
 0x19c   : > { %v2305_v49 = vld [vmem:[#allocation2 + $0xb0] sm:$0xff]  ;;  %v2307_v50 = vld [vmem:[#allocation2] sm:$0xff]  ;;  %v2309_v51 = vld [vmem:[#allocation2 + $0xd8] sm:$0xff] }
 0x19d   : > { %v1691_v52 = vpack.c.bf16 %v2307_v50, %v2305_v49  ;;  %v2313_v53 = vld [vmem:[#allocation2 + $0x18] sm:$0xff]  ;;  %v2315_v54 = vld [vmem:[#allocation2 + $0x50] sm:$0xff]  ;;  %v2317_v55 = vld [vmem:[#allocation2 + $0x68] sm:$0xff] }
 0x19e   : > { %v1696_v56 = vpack.c.bf16 %v2313_v53, %v2309_v51  ;;  %v1701_v57 = vpack.c.bf16 %v2317_v55, %v2315_v54  ;;  %v2323_v58 = vld [vmem:[#allocation2 + $0x30] sm:$0xff]  ;;  %v2325_v59 = vld [vmem:[#allocation2 + $0x48] sm:$0xff]  ;;  %v2327_v60 = vld [vmem:[#allocation2 + $0x80] sm:$0xff] }
 0x19f   : > { %1692 = vst [vmem:[%s2215_s18] sm:$0xff] %v1691_v52   ;;  %v1706_v61 = vpack.c.bf16 %v2325_v59, %v2323_v58  ;;  %v2332_v62 = vld [vmem:[#allocation2 + $0x88] sm:$0xff]  ;;  %v2336_v0 = vld [vmem:[#allocation2 + $0xb8] sm:$0xff]  ;;  %v2343_v3 = vld [vmem:[#allocation2 + $0x60] sm:$0xff] }
 0x1a0   : > { %v2334_v63 = vld [vmem:[#allocation2 + $0xe8] sm:$0xff]  ;;  %1768 = vst [vmem:[%s2215_s18 + $0x8] sm:$0xff] %v1696_v56   ;;  %v1711_v1 = vpack.c.bf16 %v2332_v62, %v2327_v60  ;;  %v2345_v4 = vld [vmem:[#allocation2 + $0xf0] sm:$0xff]  ;;  %v2352_v7 = vld [vmem:[#allocation2 + $0x78] sm:$0xff] }
 0x1a1   : > { %v1716_v2 = vpack.c.bf16 %v2336_v0, %v2334_v63  ;;  %v2347_v5 = vld [vmem:[#allocation2 + $0x8] sm:$0xff]  ;;  %1769 = vst [vmem:[%s2215_s18 + $0x10] sm:$0xff] %v1701_v57   ;;  %v1721_v6 = vpack.c.bf16 %v2345_v4, %v2343_v3  ;;  %v2354_v8 = vld [vmem:[#allocation2 + $0x38] sm:$0xff]  ;;  %v2361_v11 = vld [vmem:[#allocation2 + $0x40] sm:$0xff] }
 0x1a2   : > { %v2356_v9 = vld [vmem:[#allocation2 + $0x58] sm:$0xff]  ;;  %1770 = vst [vmem:[%s2215_s18 + $0x18] sm:$0xff] %v1706_v61   ;;  %v1726_v10 = vpack.c.bf16 %v2352_v7, %v2347_v5  ;;  %v2363_v12 = vld [vmem:[#allocation2 + $0xc8] sm:$0xff]  ;;  %v2365_v13 = vld [vmem:[#allocation2 + $0xe0] sm:$0xff] }
 0x1a3   : > { %1771 = vst [vmem:[%s2215_s18 + $0x20] sm:$0xff] %v1711_v1   ;;  %v1731_v14 = vpack.c.bf16 %v2356_v9, %v2354_v8  ;;  %v2370_v15 = vld [vmem:[#allocation2 + $0x90] sm:$0xff]  ;;  %v2374_v17 = vld [vmem:[#allocation2 + $0xc0] sm:$0xff]  ;;  %v1736_v18 = vpack.c.bf16 %v2363_v12, %v2361_v11  ;;  %v2379_v19 = vld [vmem:[#allocation2 + $0xa8] sm:$0xff] }
 0x1a4   : > { %v2372_v16 = vld [vmem:[#allocation2 + $0x70] sm:$0xff]  ;;  %1772 = vst [vmem:[%s2215_s18 + $0x28] sm:$0xff] %v1716_v2   ;;  %v1741_v21 = vpack.c.bf16 %v2370_v15, %v2365_v13  ;;  %v2388_v23 = vld [vmem:[#allocation2 + $0x28] sm:$0xff]  ;;  %v2393_v25 = vld [vmem:[#allocation2 + $0xa0] sm:$0xff] }
 0x1a5   : > { %v2381_v20 = vld [vmem:[#allocation2 + $0xd0] sm:$0xff]  ;;  %1773 = vst [vmem:[%s2215_s18 + $0x30] sm:$0xff] %v1721_v6   ;;  %v1746_v24 = vpack.c.bf16 %v2374_v17, %v2372_v16  ;;  %v2395_v26 = vld [vmem:[#allocation2 + $0xf8] sm:$0xff]  ;;  %v2400_v28 = vld [vmem:[#allocation2 + $0x20] sm:$0xff] }
 0x1a6   : > { %v2386_v22 = vld [vmem:[#allocation2 + $0x10] sm:$0xff]  ;;  %1774 = vst [vmem:[%s2215_s18 + $0x38] sm:$0xff] %v1726_v10   ;;  %v1751_v27 = vpack.c.bf16 %v2381_v20, %v2379_v19  ;;  %v2402_v29 = vld [vmem:[#allocation2 + $0x98] sm:$0xff]  ;;  %v1147_v31 = vld [vmem:[%s2206_s29] sm:$0xff]  ;;  %v1761_v32 = vpack.c.bf16 %v2395_v26, %v2393_v25 }
 0x1a7   : > { %1775 = vst [vmem:[%s2215_s18 + $0x40] sm:$0xff] %v1731_v14   ;;  %v1756_v30 = vpack.c.bf16 %v2388_v23, %v2386_v22  ;;  %v1148_v33 = vld [vmem:[%s2206_s29 + $0x8] sm:$0xff]  ;;  %v1766_v34 = vpack.c.bf16 %v2402_v29, %v2400_v28  ;;  %v1149_v35 = vld [vmem:[%s2206_s29 + $0x10] sm:$0xff]  ;;  %v1211_v36 = vadd.f32 %v1147_v31, %v2305_v49  ;;  %v1150_v37 = vld [vmem:[%s2206_s29 + $0x18] sm:$0xff] }
 0x1a8   : > { %1776 = vst [vmem:[%s2215_s18 + $0x48] sm:$0xff] %v1736_v18   ;;  %v1212_v38 = vadd.f32 %v1148_v33, %v2307_v50  ;;  %v1151_v39 = vld [vmem:[%s2206_s29 + $0x20] sm:$0xff]  ;;  %v1213_v40 = vadd.f32 %v1149_v35, %v2309_v51  ;;  %v1152_v41 = vld [vmem:[%s2206_s29 + $0x28] sm:$0xff]  ;;  %v1214_v42 = vadd.f32 %v1150_v37, %v2313_v53  ;;  %v1153_v43 = vld [vmem:[%s2206_s29 + $0x30] sm:$0xff] }
 0x1a9   : > { %1777 = vst [vmem:[%s2215_s18 + $0x50] sm:$0xff] %v1741_v21   ;;  %v1215_v44 = vadd.f32 %v1151_v39, %v2315_v54  ;;  %v1154_v45 = vld [vmem:[%s2206_s29 + $0x38] sm:$0xff]  ;;  %v1216_v46 = vadd.f32 %v1152_v41, %v2317_v55  ;;  %v1155_v47 = vld [vmem:[%s2206_s29 + $0x40] sm:$0xff]  ;;  %v1217_v48 = vadd.f32 %v1153_v43, %v2323_v58  ;;  %v1156_v49 = vld [vmem:[%s2206_s29 + $0x48] sm:$0xff] }
 0x1aa   : > { %1778 = vst [vmem:[%s2215_s18 + $0x58] sm:$0xff] %v1746_v24   ;;  %v1218_v50 = vadd.f32 %v1154_v45, %v2325_v59  ;;  %v1157_v51 = vld [vmem:[%s2206_s29 + $0x50] sm:$0xff]  ;;  %v1219_v52 = vadd.f32 %v1155_v47, %v2327_v60  ;;  %v1158_v53 = vld [vmem:[%s2206_s29 + $0x58] sm:$0xff]  ;;  %v1220_v54 = vadd.f32 %v1156_v49, %v2332_v62  ;;  %v1159_v55 = vld [vmem:[%s2206_s29 + $0x60] sm:$0xff] }
 0x1ab   : > { %1779 = vst [vmem:[%s2215_s18 + $0x60] sm:$0xff] %v1751_v27   ;;  %v1221_v56 = vadd.f32 %v1157_v51, %v2334_v63  ;;  %v1160_v57 = vld [vmem:[%s2206_s29 + $0x68] sm:$0xff]  ;;  %v1222_v58 = vadd.f32 %v1158_v53, %v2336_v0  ;;  %v1161_v59 = vld [vmem:[%s2206_s29 + $0x70] sm:$0xff]  ;;  %v1223_v60 = vadd.f32 %v1159_v55, %v2343_v3  ;;  %v1162_v61 = vld [vmem:[%s2206_s29 + $0x78] sm:$0xff] }
 0x1ac   : > { %1780 = vst [vmem:[%s2215_s18 + $0x68] sm:$0xff] %v1756_v30   ;;  %v1224_v62 = vadd.f32 %v1160_v57, %v2345_v4  ;;  %v1163_v63 = vld [vmem:[%s2206_s29 + $0x80] sm:$0xff]  ;;  %v1225_v1 = vadd.f32 %v1161_v59, %v2347_v5  ;;  %v1164_v0 = vld [vmem:[%s2206_s29 + $0x88] sm:$0xff]  ;;  %v1226_v2 = vadd.f32 %v1162_v61, %v2352_v7  ;;  %v1165_v3 = vld [vmem:[%s2206_s29 + $0x90] sm:$0xff] }
 0x1ad   : > { %1781 = vst [vmem:[%s2215_s18 + $0x70] sm:$0xff] %v1761_v32   ;;  %v1227_v6 = vadd.f32 %v1163_v63, %v2354_v8  ;;  %v1166_v4 = vld [vmem:[%s2206_s29 + $0x98] sm:$0xff]  ;;  %v1228_v10 = vadd.f32 %v1164_v0, %v2356_v9  ;;  %v1167_v5 = vld [vmem:[%s2206_s29 + $0xa0] sm:$0xff]  ;;  %v1229_v14 = vadd.f32 %v1165_v3, %v2361_v11  ;;  %v1168_v7 = vld [vmem:[%s2206_s29 + $0xa8] sm:$0xff] }
 0x1ae   : > { %1782 = vst [vmem:[%s2215_s18 + $0x78] sm:$0xff] %v1766_v34   ;;  %v1230_v18 = vadd.f32 %v1166_v4, %v2363_v12  ;;  %v1169_v8 = vld [vmem:[%s2206_s29 + $0xb0] sm:$0xff]  ;;  %v1231_v21 = vadd.f32 %v1167_v5, %v2365_v13  ;;  %v1170_v9 = vld [vmem:[%s2206_s29 + $0xb8] sm:$0xff]  ;;  %v1232_v24 = vadd.f32 %v1168_v7, %v2370_v15  ;;  %v1171_v11 = vld [vmem:[%s2206_s29 + $0xc0] sm:$0xff] }
 0x1af   : > { %1243 = vst [vmem:[%s2211_s28] sm:$0xff] %v1211_v36  ;;  %v1233_v27 = vadd.f32 %v1169_v8, %v2372_v16  ;;  %v1172_v12 = vld [vmem:[%s2206_s29 + $0xc8] sm:$0xff]  ;;  %v1234_v30 = vadd.f32 %v1170_v9, %v2374_v17  ;;  %v1173_v13 = vld [vmem:[%s2206_s29 + $0xd0] sm:$0xff]  ;;  %v1235_v31 = vadd.f32 %v1171_v11, %v2379_v19  ;;  %v1174_v15 = vld [vmem:[%s2206_s29 + $0xd8] sm:$0xff] }
 0x1b0   : > { %1244 = vst [vmem:[%s2211_s28 + $0x8] sm:$0xff] %v1212_v38  ;;  %v1236_v32 = vadd.f32 %v1172_v12, %v2381_v20  ;;  %v1175_v33 = vld [vmem:[%s2206_s29 + $0xe0] sm:$0xff]  ;;  %v1237_v16 = vadd.f32 %v1173_v13, %v2386_v22  ;;  %v1176_v17 = vld [vmem:[%s2206_s29 + $0xe8] sm:$0xff]  ;;  %v1238_v34 = vadd.f32 %v1174_v15, %v2388_v23  ;;  %v1177_v35 = vld [vmem:[%s2206_s29 + $0xf0] sm:$0xff] }
 0x1b1   : > { %1245 = vst [vmem:[%s2211_s28 + $0x10] sm:$0xff] %v1213_v40  ;;  %v1239_v19 = vadd.f32 %v1175_v33, %v2393_v25  ;;  %v1178_v36 = vld [vmem:[%s2206_s29 + $0xf8] sm:$0xff]  ;;  %v1240_v20 = vadd.f32 %v1176_v17, %v2395_v26  ;;  %v1241_v37 = vadd.f32 %v1177_v35, %v2400_v28 }
 0x1b2   : > { %1246 = vst [vmem:[%s2211_s28 + $0x18] sm:$0xff] %v1214_v42  ;;  %v1242_v22 = vadd.f32 %v1178_v36, %v2402_v29 }
 0x1b3   : > { %1247 = vst [vmem:[%s2211_s28 + $0x20] sm:$0xff] %v1215_v44 }
 0x1b4   : > { %1248 = vst [vmem:[%s2211_s28 + $0x28] sm:$0xff] %v1216_v46 }
 0x1b5   : > { %1249 = vst [vmem:[%s2211_s28 + $0x30] sm:$0xff] %v1217_v48 }
 0x1b6   : > { %1250 = vst [vmem:[%s2211_s28 + $0x38] sm:$0xff] %v1218_v50 }
 0x1b7   : > { %1251 = vst [vmem:[%s2211_s28 + $0x40] sm:$0xff] %v1219_v52 }
 0x1b8   : > { %1252 = vst [vmem:[%s2211_s28 + $0x48] sm:$0xff] %v1220_v54 }
 0x1b9   : > { %1253 = vst [vmem:[%s2211_s28 + $0x50] sm:$0xff] %v1221_v56 }
 0x1ba   : > { %1254 = vst [vmem:[%s2211_s28 + $0x58] sm:$0xff] %v1222_v58 }
 0x1bb   : > { %1255 = vst [vmem:[%s2211_s28 + $0x60] sm:$0xff] %v1223_v60 }
 0x1bc   : > { %1256 = vst [vmem:[%s2211_s28 + $0x68] sm:$0xff] %v1224_v62 }
 0x1bd   : > { %1257 = vst [vmem:[%s2211_s28 + $0x70] sm:$0xff] %v1225_v1 }
 0x1be   : > { %1258 = vst [vmem:[%s2211_s28 + $0x78] sm:$0xff] %v1226_v2 }
 0x1bf   : > { %1259 = vst [vmem:[%s2211_s28 + $0x80] sm:$0xff] %v1227_v6 }
 0x1c0   : > { %1260 = vst [vmem:[%s2211_s28 + $0x88] sm:$0xff] %v1228_v10 }
 0x1c1   : > { %1261 = vst [vmem:[%s2211_s28 + $0x90] sm:$0xff] %v1229_v14 }
 0x1c2   : > { %1262 = vst [vmem:[%s2211_s28 + $0x98] sm:$0xff] %v1230_v18 }
 0x1c3   : > { %1263 = vst [vmem:[%s2211_s28 + $0xa0] sm:$0xff] %v1231_v21 }
 0x1c4   : > { %1264 = vst [vmem:[%s2211_s28 + $0xa8] sm:$0xff] %v1232_v24 }
 0x1c5   : > { %1265 = vst [vmem:[%s2211_s28 + $0xb0] sm:$0xff] %v1233_v27 }
 0x1c6   : > { %1266 = vst [vmem:[%s2211_s28 + $0xb8] sm:$0xff] %v1234_v30 }
 0x1c7   : > { %1267 = vst [vmem:[%s2211_s28 + $0xc0] sm:$0xff] %v1235_v31 }
 0x1c8   : > { %1268 = vst [vmem:[%s2211_s28 + $0xc8] sm:$0xff] %v1236_v32 }
 0x1c9   : > { %1269 = vst [vmem:[%s2211_s28 + $0xd0] sm:$0xff] %v1237_v16 }
 0x1ca   : > { %1270 = vst [vmem:[%s2211_s28 + $0xd8] sm:$0xff] %v1238_v34 }
 0x1cb   : > { %1271 = vst [vmem:[%s2211_s28 + $0xe0] sm:$0xff] %v1239_v19 }
 0x1cc   : > { %1272 = vst [vmem:[%s2211_s28 + $0xe8] sm:$0xff] %v1240_v20 }
 0x1cd   : > { %1273 = vst [vmem:[%s2211_s28 + $0xf0] sm:$0xff] %v1241_v37 }
 0x1ce   : > { %1274 = vst [vmem:[%s2211_s28 + $0xf8] sm:$0xff] %v1242_v22 }
 0x1cf PF: > { %s1687_s20 = sshll.u32 %s1987_s21, 7  ;;  %s1293_s29 = sshll.u32 %s2215_s18, 4  ;;  %s1294_s29 = int_to_ptr.vmem [resolvable:$true] %s1293_s29 }
 0x1d0   : > { %s1292_s6 = scalar_lea.hbm %s2567_s3, %s1687_s20  ;;  %s1276_s0 = scalar_lea.sflag [#allocation5], %s387_s14 }
 0x1d1   : > { %s1295_s5 = sshll.u32 %s1292_s6, 4  ;;  %s1909_s21 = scalar_lea.hbm %s2567_s3, 256  ;;  %s1296_s5 = int_to_ptr.hbm [resolvable:$true] %s1295_s5 }
 0x1d2   : > { %s1903_s13 = sshra.s32 %s1296_s5, 4  ;;  %s1904_s13 = int_to_ptr.hbm [resolvable:$true] %s1903_s13 }
 0x1d3   : > { %s1905_s25 = scalar_lea.hbm %s1904_s13, 128  ;;  %p1910_p10 = scmp.lt.s32.totalorder %s1904_s13, %s2567_s3 }
 0x1d4   : > { %p1906_p6 = scmp.ne.s32.totalorder %s1904_s13, %s1905_s25  ;;  %p1911_p11 = scmp.lt.s32.totalorder %s1909_s21, %s1905_s25 }
 0x1d6   : > { %p1907_p8 = pnand %p1906_p6, %p2101_p7  ;;  %p1912_p13 = por %p1911_p11, %p1910_p10 }
 0x1d8   : > { %p1908_p9 = pneg %p1907_p8 }
 0x1da   : > { %p1913_p0 = pnand %p1912_p13, %p1908_p9 }
 0x1dc   : > { %1916 = shalt.err (!%p1913_p0)
}
 0x1dd   : > { %s2002_s14 = smov 64   ;;  %s2003_s18 = smov 4  }
 0x1de   : > { %1799 = dma.vmem_to_hbm [thread:$0]  (%p2101_p7), %s1294_s29, 2048, %s1296_s5, %s1276_s0, %s2002_s14, %s2002_s14, %s2003_s18  }
 0x1df PF: > { %p1805_p1 = scmp.ge.s32.totalorder %s1999_s24, 2  ;;  %s1314_s20 = sand.u32 1, %s1963_s15  }
 0x1e0   : > { %s1315_s27 = scalar_lea.sflag [#allocation5], %s1314_s20 }
 0x1e1   : > { %p1802_p2 = pnand %p1805_p1, %p2109_p12 }
 0x1e3   : > { %p1803_p3 = pneg %p1802_p2 }
 0x1e5   : > { %1958 = dma.done.wait (%p1803_p3), %s1315_s27, 2048  }
 0x1e6   : > { %1960 = vsyncadd (%p1803_p3), %s1315_s27, 4294965248  ;;  %s18_s24 = sadd.s32 1, %s1999_s24   ;;  %s2578_s7 = sld [smem:[#allocation7_spill]] }
 0x1e7   : > { %p15_p4 = scmp.ge.s32.totalorder %s18_s24, 6   ;;  %s2579_s9 = sld [smem:[#allocation8_spill]] }
 0x1e8   : > { %s2580_s15 = smov %s1967_s16  ;;  %s2581_s16 = smov %s1971_s17 }
 0x1e9   : > { %s2582_s17 = smov %s2114_s11  ;;  %s2583_s18 = smov %s1979_s19 }
 0x1ea   : > { %s2584_s19 = smov %s2117_s12  ;;  %s2585_s20 = smov %s1991_s22 }
 0x1eb   : > { %s2586_s21 = smov %s1995_s23  ;;  %17 = sbr.rel (!%p15_p4) target bundleno = 8 (0x8), region = 134 }
 0x1ec   : > { %s2587_s22 = smov %s2578_s7 }
 0x1ed   : > { %s2588_s23 = smov %s2579_s9 }
 0x1f0   :  { %1329 = vsyncpa [#allocation5], 1 }
 0x1f1   :  { %1331 = vsyncpa [#allocation5 + $0x1], 1 }

// kernel: lightgcl_forward.7
= control target key start
LH: loop header
LB: loop body
LE: loop exit
PB: predicated region body
PF: predicated region fallthrough
CT: control target
= control target key end

     0   :  { %s1916_s15 = smov 0   ;;  %s1918_s16 = smov 0   ;;  %s2382_s0 = inlined_call_operand.vmem [shape: bf16[512,512], index: 0, kind: input, shape index: {}]   ;;  %s2383_s1 = inlined_call_operand.vmem [shape: bf16[512,128], index: 1, kind: input, shape index: {}]   ;;  %s2384_s2 = inlined_call_operand.vmem [shape: f32[512,128], index: 2, kind: input, shape index: {}]   ;;  %s2385_s3 = inlined_call_operand.vmem [shape: bf16[512,128], index: 3, kind: output, shape index: {0}]   ;;  %s2386_s4 = inlined_call_operand.vmem [shape: f32[512,128], index: 4, kind: output, shape index: {1}]  }
   0x1   :  { %s1920_s17 = smov 0   ;;  %s1922_s18 = smov 0  }
   0x2   :  { %s1924_s19 = smov 0   ;;  %s1926_s20 = smov 0  }
   0x3   :  { %s1928_s21 = smov 0  }
   0x4 LB: > { %s24_s22 = sadd.s32 1, %s1880_s19  ;;  %s27_s23 = sadd.s32 1, %s1884_s20  ;;  %s1888_s21 = sphi %s1928_s21, %s15_s21   ;;  %s1884_s20 = sphi %s1926_s20, %s2392_s20   ;;  %s1880_s19 = sphi %s1924_s19, %s2391_s19   ;;  %s1876_s18 = sphi %s1922_s18, %s2390_s18   ;;  %s1872_s17 = sphi %s1920_s17, %s2389_s17   ;;  %s1868_s16 = sphi %s1918_s16, %s2388_s16   ;;  %s1864_s15 = sphi %s1916_s15, %s2387_s15  }
   0x5   : > { %p25_p0 = scmp.ge.s32.totalorder %s24_s22, 2  ;;  %p43_p1 = scmp.ne.s32.totalorder %s1868_s16, %s1864_s15 }
   0x6   : > { %p44_p2 = scmp.eq.s32.totalorder %s1888_s21, 0  ;;  %s36_s27 = sadd.s32 1, %s1868_s16 }
   0x7   : > { %s2394_s22 = smov (%p25_p0, %s24_s22), 0  ;;  %s2396_s23 = smov (!%p25_p0, %s27_s23), %s1884_s20 }
   0x8   : > { %p45_p3 = por %p44_p2, %p43_p1  ;;  %p29_p4 = scmp.ge.s32.totalorder %s2396_s23, 2 }
   0x9   : > { %s32_s24 = ssub.s32 %s1880_s19, %s2394_s22  ;;  %p1405_p6 = scmp.ge.s32.totalorder %s1888_s21, 4 }
   0xa   : > { %s2398_s23 = smov (%p29_p4, %s2396_s23), 0 }
   0xb   : > { %s31_s25 = ssub.s32 %s1884_s20, %s2398_s23  ;;  %171 = sbr.rel (%p1405_p6) target bundleno = 55 (0x37), region = 20 }
   0xc   : > { %s33_s26 = sor.u32 %s32_s24, %s31_s25 }
   0xd   : > { %p34_p5 = scmp.eq.s32.totalorder %s33_s26, 0 }
   0xf   : > { %s1967_s28 = scalar_select %p34_p5, %s1868_s16, %s36_s27  }
  0x10   : > { %174 = sbr.rel (!%p45_p3) target bundleno = 55 (0x37), region = 24  ;;  %s176_s29 = sand.u32 (%p45_p3), 1, %s1868_s16  }
  0x11   : > { %s1408_s30 = sshll.u32 (%p45_p3), %s1880_s19, 1  ;;  %s1406_s5 = sshll.u32 (%p45_p3), %s176_s29, 8 }
  0x12   : > { %s1617_s6 = sshll.u32 (%p45_p3), %s1884_s20, 7  ;;  %s1981_s12 = scalar_lea.vmem (%p45_p3), [#allocation3], %s1406_s5 }
  0x13   : > { %s182_s7 = sadd.s32 (%p45_p3), %s1617_s6, %s1408_s30 }
  0x14   : > { %s1410_s8 = sshll.u32 (%p45_p3), %s182_s7, 2 }
  0x15   : > { %s1976_s11 = scalar_lea.vmem %s2382_s0, %s1410_s8 }
  0x16   : > { %v275_v0 = vld [vmem:[%s1976_s11] sm:$0xff]  ;;  %v277_v1 = vld [vmem:[%s1976_s11 + $0x10] sm:$0xff] }
  0x17   : > { %v279_v2 = vld [vmem:[%s1976_s11 + $0x20] sm:$0xff]  ;;  %276 = vst [vmem:[%s1981_s12] sm:$0xff] %v275_v0  ;;  %v281_v3 = vld [vmem:[%s1976_s11 + $0x30] sm:$0xff] }
  0x18   : > { %278 = vst [vmem:[%s1981_s12 + $0x8] sm:$0xff] %v277_v1  ;;  %v283_v4 = vld [vmem:[%s1976_s11 + $0x40] sm:$0xff]  ;;  %v285_v5 = vld [vmem:[%s1976_s11 + $0x50] sm:$0xff] }
  0x19   : > { %280 = vst [vmem:[%s1981_s12 + $0x10] sm:$0xff] %v279_v2  ;;  %v287_v6 = vld [vmem:[%s1976_s11 + $0x60] sm:$0xff]  ;;  %v289_v7 = vld [vmem:[%s1976_s11 + $0x70] sm:$0xff] }
  0x1a   : > { %282 = vst [vmem:[%s1981_s12 + $0x18] sm:$0xff] %v281_v3  ;;  %v291_v8 = vld [vmem:[%s1976_s11 + $0x80] sm:$0xff]  ;;  %v293_v9 = vld [vmem:[%s1976_s11 + $0x90] sm:$0xff] }
  0x1b   : > { %284 = vst [vmem:[%s1981_s12 + $0x20] sm:$0xff] %v283_v4  ;;  %v295_v10 = vld [vmem:[%s1976_s11 + $0xa0] sm:$0xff]  ;;  %v297_v11 = vld [vmem:[%s1976_s11 + $0xb0] sm:$0xff] }
  0x1c   : > { %286 = vst [vmem:[%s1981_s12 + $0x28] sm:$0xff] %v285_v5  ;;  %v299_v12 = vld [vmem:[%s1976_s11 + $0xc0] sm:$0xff]  ;;  %v301_v13 = vld [vmem:[%s1976_s11 + $0xd0] sm:$0xff] }
  0x1d   : > { %288 = vst [vmem:[%s1981_s12 + $0x30] sm:$0xff] %v287_v6  ;;  %v303_v14 = vld [vmem:[%s1976_s11 + $0xe0] sm:$0xff]  ;;  %v305_v15 = vld [vmem:[%s1976_s11 + $0xf0] sm:$0xff] }
  0x1e   : > { %290 = vst [vmem:[%s1981_s12 + $0x38] sm:$0xff] %v289_v7  ;;  %v307_v16 = vld [vmem:[%s1976_s11 + $0x100] sm:$0xff]  ;;  %v309_v17 = vld [vmem:[%s1976_s11 + $0x110] sm:$0xff] }
  0x1f   : > { %292 = vst [vmem:[%s1981_s12 + $0x40] sm:$0xff] %v291_v8  ;;  %v311_v18 = vld [vmem:[%s1976_s11 + $0x120] sm:$0xff]  ;;  %v313_v19 = vld [vmem:[%s1976_s11 + $0x130] sm:$0xff] }
  0x20   : > { %294 = vst [vmem:[%s1981_s12 + $0x48] sm:$0xff] %v293_v9  ;;  %v315_v20 = vld [vmem:[%s1976_s11 + $0x140] sm:$0xff]  ;;  %v317_v21 = vld [vmem:[%s1976_s11 + $0x150] sm:$0xff] }
  0x21   : > { %296 = vst [vmem:[%s1981_s12 + $0x50] sm:$0xff] %v295_v10  ;;  %v319_v22 = vld [vmem:[%s1976_s11 + $0x160] sm:$0xff]  ;;  %v321_v23 = vld [vmem:[%s1976_s11 + $0x170] sm:$0xff] }
  0x22   : > { %298 = vst [vmem:[%s1981_s12 + $0x58] sm:$0xff] %v297_v11  ;;  %v323_v24 = vld [vmem:[%s1976_s11 + $0x180] sm:$0xff]  ;;  %v325_v25 = vld [vmem:[%s1976_s11 + $0x190] sm:$0xff] }
  0x23   : > { %300 = vst [vmem:[%s1981_s12 + $0x60] sm:$0xff] %v299_v12  ;;  %v327_v26 = vld [vmem:[%s1976_s11 + $0x1a0] sm:$0xff]  ;;  %v329_v27 = vld [vmem:[%s1976_s11 + $0x1b0] sm:$0xff] }
  0x24   : > { %302 = vst [vmem:[%s1981_s12 + $0x68] sm:$0xff] %v301_v13  ;;  %v331_v28 = vld [vmem:[%s1976_s11 + $0x1c0] sm:$0xff]  ;;  %v333_v29 = vld [vmem:[%s1976_s11 + $0x1d0] sm:$0xff] }
  0x25   : > { %304 = vst [vmem:[%s1981_s12 + $0x70] sm:$0xff] %v303_v14  ;;  %v335_v30 = vld [vmem:[%s1976_s11 + $0x1e0] sm:$0xff]  ;;  %v337_v31 = vld [vmem:[%s1976_s11 + $0x1f0] sm:$0xff] }
  0x26   : > { %306 = vst [vmem:[%s1981_s12 + $0x78] sm:$0xff] %v305_v15 }
  0x27   : > { %308 = vst [vmem:[%s1981_s12 + $0x80] sm:$0xff] %v307_v16 }
  0x28   : > { %310 = vst [vmem:[%s1981_s12 + $0x88] sm:$0xff] %v309_v17 }
  0x29   : > { %312 = vst [vmem:[%s1981_s12 + $0x90] sm:$0xff] %v311_v18 }
  0x2a   : > { %314 = vst [vmem:[%s1981_s12 + $0x98] sm:$0xff] %v313_v19 }
  0x2b   : > { %316 = vst [vmem:[%s1981_s12 + $0xa0] sm:$0xff] %v315_v20 }
  0x2c   : > { %318 = vst [vmem:[%s1981_s12 + $0xa8] sm:$0xff] %v317_v21 }
  0x2d   : > { %320 = vst [vmem:[%s1981_s12 + $0xb0] sm:$0xff] %v319_v22 }
  0x2e   : > { %322 = vst [vmem:[%s1981_s12 + $0xb8] sm:$0xff] %v321_v23 }
  0x2f   : > { %324 = vst [vmem:[%s1981_s12 + $0xc0] sm:$0xff] %v323_v24 }
  0x30   : > { %326 = vst [vmem:[%s1981_s12 + $0xc8] sm:$0xff] %v325_v25 }
  0x31   : > { %328 = vst [vmem:[%s1981_s12 + $0xd0] sm:$0xff] %v327_v26 }
  0x32   : > { %330 = vst [vmem:[%s1981_s12 + $0xd8] sm:$0xff] %v329_v27 }
  0x33   : > { %332 = vst [vmem:[%s1981_s12 + $0xe0] sm:$0xff] %v331_v28 }
  0x34   : > { %334 = vst [vmem:[%s1981_s12 + $0xe8] sm:$0xff] %v333_v29 }
  0x35   : > { %336 = vst [vmem:[%s1981_s12 + $0xf0] sm:$0xff] %v335_v30 }
  0x36   : > { %338 = vst [vmem:[%s1981_s12 + $0xf8] sm:$0xff] %v337_v31 }
  0x37 PF: > { %p1411_p7 = scmp.ge.s32.totalorder %s1888_s21, 1  ;;  %p352_p8 = scmp.lt.s32.totalorder %s1888_s21, 5 }
  0x39   : > { %p353_p9 = pnand %p1411_p7, %p352_p8 }
  0x3a   : > { %s359_s13 = sand.u32 (!%p353_p9), 1, %s1864_s15   ;;  %s1413_s14 = sshll.u32 (!%p353_p9), %s1876_s18, 5 }
  0x3b   : > { %356 = sbr.rel (%p353_p9) target bundleno = 447 (0x1bf), region = 66  ;;  %s1412_s24 = sshll.u32 (!%p353_p9), %s359_s13, 8 }
  0x3c   : > { %p397_p10 = scmp.lt.s32.totalorder (!%p353_p9), %s1413_s14, 63  ;;  %s2063_s18 = scalar_lea.vmem (!%p353_p9), [#allocation3], %s1412_s24 }
  0x3d   : > { %p1419_p11 = scmp.ne.s32.totalorder (!%p353_p9), %s1872_s17, 0 }
  0x40   : > { %s2400_s14 = smov (!%p397_p10, %s1413_s14), 63  ;;  %417 = sbr.rel (%p1419_p11) target bundleno = 102 (0x66), region = 74 }
  0x41   : > { %s1414_s25 = sshll.u32 %s2400_s14, 3  ;;  %s1416_s26 = sshll.u32 %s2400_s14, 2 }
  0x42   : > { %s2051_s30 = scalar_lea.vmem %s2384_s2, %s1414_s25  ;;  %s2056_s7 = scalar_lea.vmem %s2385_s3, %s1416_s26 }
  0x43   : > { %s2061_s15 = scalar_lea.vmem %s2386_s4, %s1414_s25 }
  0x45   : > { %v1890_v32 = vmov 0.0  }
  0x46   : > { %418 = vst [vmem:[#allocation2 + $0xb0] sm:$0xff] %v1890_v32 }
  0x47   : > { %419 = vst [vmem:[#allocation2] sm:$0xff] %v1890_v32 }
  0x48   : > { %420 = vst [vmem:[#allocation2 + $0xd8] sm:$0xff] %v1890_v32 }
  0x49   : > { %421 = vst [vmem:[#allocation2 + $0x18] sm:$0xff] %v1890_v32 }
  0x4a   : > { %422 = vst [vmem:[#allocation2 + $0x50] sm:$0xff] %v1890_v32 }
  0x4b   : > { %423 = vst [vmem:[#allocation2 + $0x68] sm:$0xff] %v1890_v32 }
  0x4c   : > { %424 = vst [vmem:[#allocation2 + $0x30] sm:$0xff] %v1890_v32 }
  0x4d   : > { %425 = vst [vmem:[#allocation2 + $0x48] sm:$0xff] %v1890_v32 }
  0x4e   : > { %426 = vst [vmem:[#allocation2 + $0x80] sm:$0xff] %v1890_v32 }
  0x4f   : > { %427 = vst [vmem:[#allocation2 + $0x88] sm:$0xff] %v1890_v32 }
  0x50   : > { %428 = vst [vmem:[#allocation2 + $0xe8] sm:$0xff] %v1890_v32 }
  0x51   : > { %429 = vst [vmem:[#allocation2 + $0xb8] sm:$0xff] %v1890_v32 }
  0x52   : > { %430 = vst [vmem:[#allocation2 + $0x60] sm:$0xff] %v1890_v32 }
  0x53   : > { %431 = vst [vmem:[#allocation2 + $0xf0] sm:$0xff] %v1890_v32 }
  0x54   : > { %432 = vst [vmem:[#allocation2 + $0x8] sm:$0xff] %v1890_v32 }
  0x55   : > { %433 = vst [vmem:[#allocation2 + $0x78] sm:$0xff] %v1890_v32 }
  0x56   : > { %434 = vst [vmem:[#allocation2 + $0x38] sm:$0xff] %v1890_v32 }
  0x57   : > { %435 = vst [vmem:[#allocation2 + $0x58] sm:$0xff] %v1890_v32 }
  0x58   : > { %436 = vst [vmem:[#allocation2 + $0x40] sm:$0xff] %v1890_v32 }
  0x59   : > { %437 = vst [vmem:[#allocation2 + $0xc8] sm:$0xff] %v1890_v32 }
  0x5a   : > { %438 = vst [vmem:[#allocation2 + $0xe0] sm:$0xff] %v1890_v32 }
  0x5b   : > { %439 = vst [vmem:[#allocation2 + $0x90] sm:$0xff] %v1890_v32 }
  0x5c   : > { %440 = vst [vmem:[#allocation2 + $0x70] sm:$0xff] %v1890_v32 }
  0x5d   : > { %441 = vst [vmem:[#allocation2 + $0xc0] sm:$0xff] %v1890_v32 }
  0x5e   : > { %442 = vst [vmem:[#allocation2 + $0xa8] sm:$0xff] %v1890_v32 }
  0x5f   : > { %443 = vst [vmem:[#allocation2 + $0xd0] sm:$0xff] %v1890_v32 }
  0x60   : > { %444 = vst [vmem:[#allocation2 + $0x10] sm:$0xff] %v1890_v32 }
  0x61   : > { %445 = vst [vmem:[#allocation2 + $0x28] sm:$0xff] %v1890_v32 }
  0x62   : > { %446 = vst [vmem:[#allocation2 + $0xa0] sm:$0xff] %v1890_v32 }
  0x63   : > { %447 = vst [vmem:[#allocation2 + $0xf8] sm:$0xff] %v1890_v32 }
  0x64   : > { %448 = vst [vmem:[#allocation2 + $0x20] sm:$0xff] %v1890_v32 }
  0x65   : > { %449 = vst [vmem:[#allocation2 + $0x98] sm:$0xff] %v1890_v32 }
  0x66 PF: > { %s1420_s10 = sshll.u32 %s1872_s17, 8  ;;  %v1424_v47 = vld [vmem:[%s2063_s18] sm:$0xf]  ;;  %v1619_v49 = vld [vmem:[%s2063_s18 + $0x4] sm:$0xf0]  ;;  %p1614_p12 = scmp.ne.s32.totalorder %s1872_s17, 1 }
  0x67   : > { %s515_s11 = sshra.s32 %s1420_s10, 3  ;;  %v1488_v50 = vld [vmem:[%s2063_s18 + $0x80] sm:$0xf]  ;;  %v1635_v52 = vld [vmem:[%s2063_s18 + $0x84] sm:$0xf0]  ;;  %v1425_v57 = vor.u32 %v1619_v49, %v1424_v47 }
  0x68   : > { %s1421_s12 = sshll.u32 %s515_s11, 2  ;;  %v1618_v53 = vld [vmem:[%s2063_s18 + $0x4] sm:$0xf]  ;;  %v1426_v54 = vld [vmem:[%s2063_s18 + $0x8] sm:$0xf0]  ;;  %v1489_v58 = vor.u32 %v1635_v52, %v1488_v50 }
  0x69   : > { %s2070_s24 = scalar_lea.vmem %s2383_s1, %s1421_s12  ;;  %v1634_v55 = vld [vmem:[%s2063_s18 + $0x84] sm:$0xf]  ;;  %v1490_v56 = vld [vmem:[%s2063_s18 + $0x88] sm:$0xf0]  ;;  %v1429_v59 = vor.u32 %v1618_v53, %v1426_v54  ;;  %v1432_v61 = vld [vmem:[%s2063_s18 + $0x10] sm:$0xf] }
  0x6a   : > { %v1657_v33 = vld [vmem:[%s2070_s24 + $0x38] sm:$0xff]  ;;  %v1656_v35 = vld [vmem:[%s2070_s24 + $0x30] sm:$0xff]  ;;  %v1655_v37 = vld [vmem:[%s2070_s24 + $0x28] sm:$0xff]  ;;  %v1493_v60 = vor.u32 %v1634_v55, %v1490_v56 }
  0x6b   : > { %v1665_v34 = vld [vmem:[%s2070_s24 + $0x78] sm:$0xff]  ;;  %807 = vmatpush.bf16.msra.mxu0 %v1657_v33  ;;  %1761 = vmatpush.bf16.msra.mxu2 %v1657_v33  ;;  %v1664_v36 = vld [vmem:[%s2070_s24 + $0x70] sm:$0xff]  ;;  %v1663_v38 = vld [vmem:[%s2070_s24 + $0x68] sm:$0xff] }
  0x6c   : > { %896 = vmatpush.bf16.msra.mxu1 %v1665_v34  ;;  %1769 = vmatpush.bf16.msra.mxu3 %v1665_v34  ;;  %v1654_v39 = vld [vmem:[%s2070_s24 + $0x20] sm:$0xff]  ;;  %v1653_v41 = vld [vmem:[%s2070_s24 + $0x18] sm:$0xff]  ;;  %v1652_v43 = vld [vmem:[%s2070_s24 + $0x10] sm:$0xff] }
  0x6d   : > { %v1662_v40 = vld [vmem:[%s2070_s24 + $0x60] sm:$0xff]  ;;  %v1661_v42 = vld [vmem:[%s2070_s24 + $0x58] sm:$0xff]  ;;  %v1660_v44 = vld [vmem:[%s2070_s24 + $0x50] sm:$0xff] }
  0x6e   : > { %v1651_v45 = vld [vmem:[%s2070_s24 + $0x8] sm:$0xff]  ;;  %v1650_v48 = vld [vmem:[%s2070_s24] sm:$0xff]  ;;  %v1621_v62 = vld [vmem:[%s2063_s18 + $0x14] sm:$0xf0] }
  0x6f   : > { %808 = vmatpush.bf16.msra.mxu0 %v1656_v35  ;;  %1762 = vmatpush.bf16.msra.mxu2 %v1656_v35  ;;  %v1659_v46 = vld [vmem:[%s2070_s24 + $0x48] sm:$0xff]  ;;  %v1658_v51 = vld [vmem:[%s2070_s24 + $0x40] sm:$0xff]  ;;  %v1496_v63 = vld [vmem:[%s2063_s18 + $0x90] sm:$0xf]  ;;  %v1433_v5 = vor.u32 %v1621_v62, %v1432_v61 }
  0x70   : > { %897 = vmatpush.bf16.msra.mxu1 %v1664_v36  ;;  %1770 = vmatpush.bf16.msra.mxu3 %v1664_v36  ;;  %v1637_v0 = vld [vmem:[%s2063_s18 + $0x94] sm:$0xf0]  ;;  %v1620_v1 = vld [vmem:[%s2063_s18 + $0x14] sm:$0xf]  ;;  %v1434_v2 = vld [vmem:[%s2063_s18 + $0x18] sm:$0xf0] }
  0x71   : > { %v1636_v3 = vld [vmem:[%s2063_s18 + $0x94] sm:$0xf]  ;;  %v1498_v4 = vld [vmem:[%s2063_s18 + $0x98] sm:$0xf0]  ;;  %v1497_v6 = vor.u32 %v1637_v0, %v1496_v63  ;;  %v1437_v7 = vor.u32 %v1620_v1, %v1434_v2  ;;  %v1440_v9 = vld [vmem:[%s2063_s18 + $0x20] sm:$0xf] }
  0x72   : > { %v1501_v8 = vor.u32 %v1636_v3, %v1498_v4  ;;  %v1623_v10 = vld [vmem:[%s2063_s18 + $0x24] sm:$0xf0]  ;;  %v1504_v11 = vld [vmem:[%s2063_s18 + $0xa0] sm:$0xf]  ;;  %v1622_v13 = vld [vmem:[%s2063_s18 + $0x24] sm:$0xf] }
  0x73   : > { %809 = vmatpush.bf16.msra.mxu0 %v1655_v37  ;;  %1763 = vmatpush.bf16.msra.mxu2 %v1655_v37  ;;  %v1639_v12 = vld [vmem:[%s2063_s18 + $0xa4] sm:$0xf0]  ;;  %v1442_v14 = vld [vmem:[%s2063_s18 + $0x28] sm:$0xf0]  ;;  %v1638_v15 = vld [vmem:[%s2063_s18 + $0xa4] sm:$0xf]  ;;  %v1441_v17 = vor.u32 %v1623_v10, %v1440_v9 }
  0x74   : > { %898 = vmatpush.bf16.msra.mxu1 %v1663_v38  ;;  %1771 = vmatpush.bf16.msra.mxu3 %v1663_v38  ;;  %v1506_v16 = vld [vmem:[%s2063_s18 + $0xa8] sm:$0xf0]  ;;  %v1505_v18 = vor.u32 %v1639_v12, %v1504_v11  ;;  %v1445_v19 = vor.u32 %v1622_v13, %v1442_v14  ;;  %v1448_v21 = vld [vmem:[%s2063_s18 + $0x30] sm:$0xf]  ;;  %v1625_v22 = vld [vmem:[%s2063_s18 + $0x34] sm:$0xf0] }
  0x75   : > { %v1509_v20 = vor.u32 %v1638_v15, %v1506_v16  ;;  %v1512_v23 = vld [vmem:[%s2063_s18 + $0xb0] sm:$0xf]  ;;  %v1641_v24 = vld [vmem:[%s2063_s18 + $0xb4] sm:$0xf0]  ;;  %v1624_v25 = vld [vmem:[%s2063_s18 + $0x34] sm:$0xf]  ;;  %v1449_v29 = vor.u32 %v1625_v22, %v1448_v21 }
  0x76   : > { %v1450_v26 = vld [vmem:[%s2063_s18 + $0x38] sm:$0xf0]  ;;  %v1640_v27 = vld [vmem:[%s2063_s18 + $0xb4] sm:$0xf]  ;;  %v1513_v30 = vor.u32 %v1641_v24, %v1512_v23  ;;  %v1456_v33 = vld [vmem:[%s2063_s18 + $0x40] sm:$0xf] }
  0x77   : > { %810 = vmatpush.bf16.msra.mxu0 %v1654_v39  ;;  %1764 = vmatpush.bf16.msra.mxu2 %v1654_v39  ;;  %v1514_v28 = vld [vmem:[%s2063_s18 + $0xb8] sm:$0xf0]  ;;  %v1453_v31 = vor.u32 %v1624_v25, %v1450_v26  ;;  %v1627_v34 = vld [vmem:[%s2063_s18 + $0x44] sm:$0xf0]  ;;  %v1520_v35 = vld [vmem:[%s2063_s18 + $0xc0] sm:$0xf] }
  0x78   : > { %899 = vmatpush.bf16.msra.mxu1 %v1662_v40  ;;  %1772 = vmatpush.bf16.msra.mxu3 %v1662_v40  ;;  %v1517_v32 = vor.u32 %v1640_v27, %v1514_v28  ;;  %v1643_v36 = vld [vmem:[%s2063_s18 + $0xc4] sm:$0xf0]  ;;  %v1626_v37 = vld [vmem:[%s2063_s18 + $0x44] sm:$0xf]  ;;  %v1458_v38 = vld [vmem:[%s2063_s18 + $0x48] sm:$0xf0] }
  0x79   : > { %v1642_v39 = vld [vmem:[%s2063_s18 + $0xc4] sm:$0xf]  ;;  %v1522_v40 = vld [vmem:[%s2063_s18 + $0xc8] sm:$0xf0]  ;;  %v1528_v47 = vld [vmem:[%s2063_s18 + $0xd0] sm:$0xf] }
  0x7a   : > { %v1628_v49 = vld [vmem:[%s2063_s18 + $0x54] sm:$0xf]  ;;  %v1466_v50 = vld [vmem:[%s2063_s18 + $0x58] sm:$0xf0]  ;;  %v1630_v61 = vld [vmem:[%s2063_s18 + $0x64] sm:$0xf] }
  0x7b   : > { %811 = vmatpush.bf16.msra.mxu0 %v1653_v41  ;;  %1765 = vmatpush.bf16.msra.mxu2 %v1653_v41  ;;  %v1457_v41 = vor.u32 %v1627_v34, %v1456_v33  ;;  %v1530_v52 = vld [vmem:[%s2063_s18 + $0xd8] sm:$0xf0]  ;;  %v1469_v55 = vor.u32 %v1628_v49, %v1466_v50  ;;  %v1474_v62 = vld [vmem:[%s2063_s18 + $0x68] sm:$0xf0]  ;;  %v1646_v63 = vld [vmem:[%s2063_s18 + $0xe4] sm:$0xf] }
  0x7c   : > { %900 = vmatpush.bf16.msra.mxu1 %v1661_v42  ;;  %1773 = vmatpush.bf16.msra.mxu3 %v1661_v42  ;;  %v1521_v42 = vor.u32 %v1643_v36, %v1520_v35  ;;  %v1538_v0 = vld [vmem:[%s2063_s18 + $0xe8] sm:$0xf0]  ;;  %v1477_v3 = vor.u32 %v1630_v61, %v1474_v62  ;;  %v1632_v9 = vld [vmem:[%s2063_s18 + $0x74] sm:$0xf]  ;;  %v1482_v10 = vld [vmem:[%s2063_s18 + $0x78] sm:$0xf0] }
  0x7d   : > { %v1541_v4 = vor.u32 %v1646_v63, %v1538_v0  ;;  %v1648_v11 = vld [vmem:[%s2063_s18 + $0xf4] sm:$0xf]  ;;  %v1546_v12 = vld [vmem:[%s2063_s18 + $0xf8] sm:$0xf0]  ;;  %v1485_v15 = vor.u32 %v1632_v9, %v1482_v10  ;;  %v452_v27 = vld [vmem:[#allocation2] sm:$0xff] }
  0x7e   : > { %v1549_v16 = vor.u32 %v1648_v11, %v1546_v12  ;;  %v467_v23 = vld [vmem:[#allocation2 + $0x38] sm:$0xff]  ;;  %v471_v63 = vld [vmem:[#allocation2 + $0xe0] sm:$0xff]  ;;  %v472_v9 = vld [vmem:[#allocation2 + $0x90] sm:$0xff] }
  0x7f   : > { %812 = vmatpush.bf16.msra.mxu0 %v1652_v43  ;;  %1766 = vmatpush.bf16.msra.mxu2 %v1652_v43  ;;  %v1461_v43 = vor.u32 %v1626_v37, %v1458_v38  ;;  %v468_v33 = vld [vmem:[#allocation2 + $0x58] sm:$0xff] }
  0x80   : > { %901 = vmatpush.bf16.msra.mxu1 %v1660_v44  ;;  %1774 = vmatpush.bf16.msra.mxu3 %v1660_v44  ;;  %v1525_v44 = vor.u32 %v1642_v39, %v1522_v40  ;;  %v453_v37 = vld [vmem:[#allocation2 + $0xd8] sm:$0xff] }
  0x83   : > { %813 = vmatpush.bf16.msra.mxu0 %v1651_v45  ;;  %1767 = vmatpush.bf16.msra.mxu2 %v1651_v45  ;;  %v1464_v45 = vld [vmem:[%s2063_s18 + $0x50] sm:$0xf] }
  0x84   : > { %902 = vmatpush.bf16.msra.mxu1 %v1659_v46  ;;  %1775 = vmatpush.bf16.msra.mxu3 %v1659_v46  ;;  %v1629_v46 = vld [vmem:[%s2063_s18 + $0x54] sm:$0xf0] }
  0x85   : > { %v1465_v53 = vor.u32 %v1629_v46, %v1464_v45 }
  0x87   : > { %814 = vmatpush.bf16.msra.mxu0 %v1650_v48  ;;  %1768 = vmatpush.bf16.msra.mxu2 %v1650_v48  ;;  %v1645_v48 = vld [vmem:[%s2063_s18 + $0xd4] sm:$0xf0] }
  0x88   : > { %903 = vmatpush.bf16.msra.mxu1 %v1658_v51  ;;  %1776 = vmatpush.bf16.msra.mxu3 %v1658_v51  ;;  %v1644_v51 = vld [vmem:[%s2063_s18 + $0xd4] sm:$0xf]  ;;  %v1529_v54 = vor.u32 %v1645_v48, %v1528_v47  ;;  %v454_v47 = vld [vmem:[#allocation2 + $0x18] sm:$0xff] }
  0x89   : > { %v1533_v56 = vor.u32 %v1644_v51, %v1530_v52 }
  0x8a   : > { %815 = vmatmul.bf16.vlgmr.msra.gmra.mxu0 %v1425_v57  ;;  %855 = vmatmul.bf16.vlgmr.msra.gmra.mxu2 %v1489_v58  ;;  %v1472_v57 = vld [vmem:[%s2063_s18 + $0x60] sm:$0xf]  ;;  %v1631_v58 = vld [vmem:[%s2063_s18 + $0x64] sm:$0xf0] }
  0x8b   : > { %904 = vmatmul.bf16.vlgmr.msra.gmra.mxu1 %v1429_v59  ;;  %944 = vmatmul.bf16.vlgmr.msra.gmra.mxu3 %v1493_v60  ;;  %v1536_v59 = vld [vmem:[%s2063_s18 + $0xe0] sm:$0xf]  ;;  %v1647_v60 = vld [vmem:[%s2063_s18 + $0xe4] sm:$0xf0]  ;;  %v1473_v1 = vor.u32 %v1631_v58, %v1472_v57  ;;  %v455_v57 = vld [vmem:[#allocation2 + $0x50] sm:$0xff] }
  0x8c   : > { %v1537_v2 = vor.u32 %v1647_v60, %v1536_v59 }
  0x9a   : > { %820 = vmatmul.bf16.gmra.mxu0 %v1433_v5  ;;  %860 = vmatmul.bf16.gmra.mxu2 %v1497_v6  ;;  %v1480_v5 = vld [vmem:[%s2063_s18 + $0x70] sm:$0xf]  ;;  %v1633_v6 = vld [vmem:[%s2063_s18 + $0x74] sm:$0xf0] }
  0x9b   : > { %909 = vmatmul.bf16.gmra.mxu1 %v1437_v7  ;;  %949 = vmatmul.bf16.gmra.mxu3 %v1501_v8  ;;  %v1544_v7 = vld [vmem:[%s2063_s18 + $0xf0] sm:$0xf]  ;;  %v1649_v8 = vld [vmem:[%s2063_s18 + $0xf4] sm:$0xf0]  ;;  %v1481_v13 = vor.u32 %v1633_v6, %v1480_v5 }
  0x9c   : > { %v1545_v14 = vor.u32 %v1649_v8, %v1544_v7 }
  0xaa   : > { %825 = vmatmul.bf16.gmra.mxu0 %v1441_v17  ;;  %865 = vmatmul.bf16.gmra.mxu2 %v1505_v18  ;;  %v451_v18 = vld [vmem:[#allocation2 + $0xb0] sm:$0xff] }
  0xab   : > { %914 = vmatmul.bf16.gmra.mxu1 %v1445_v19  ;;  %954 = vmatmul.bf16.gmra.mxu3 %v1509_v20 }
  0xba   : > { %830 = vmatmul.bf16.gmra.mxu0 %v1449_v29  ;;  %870 = vmatmul.bf16.gmra.mxu2 %v1513_v30 }
  0xbb   : > { %919 = vmatmul.bf16.gmra.mxu1 %v1453_v31  ;;  %959 = vmatmul.bf16.gmra.mxu3 %v1517_v32 }
  0xca   : > { %835 = vmatmul.bf16.gmra.mxu0 %v1457_v41  ;;  %875 = vmatmul.bf16.gmra.mxu2 %v1521_v42 }
  0xcb   : > { %924 = vmatmul.bf16.gmra.mxu1 %v1461_v43  ;;  %964 = vmatmul.bf16.gmra.mxu3 %v1525_v44  ;;  %v469_v43 = vld [vmem:[#allocation2 + $0x40] sm:$0xff] }
  0xda   : > { %840 = vmatmul.bf16.gmra.mxu0 %v1465_v53  ;;  %880 = vmatmul.bf16.gmra.mxu2 %v1529_v54  ;;  %v470_v53 = vld [vmem:[#allocation2 + $0xc8] sm:$0xff] }
  0xdb   : > { %929 = vmatmul.bf16.gmra.mxu1 %v1469_v55  ;;  %969 = vmatmul.bf16.gmra.mxu3 %v1533_v56 }
  0xea   : > { %845 = vmatmul.bf16.gmra.mxu0 %v1473_v1  ;;  %885 = vmatmul.bf16.gmra.mxu2 %v1537_v2 }
  0xeb   : > { %934 = vmatmul.bf16.gmra.mxu1 %v1477_v3  ;;  %974 = vmatmul.bf16.gmra.mxu3 %v1541_v4  ;;  %v456_v3 = vld [vmem:[#allocation2 + $0x68] sm:$0xff] }
  0xfa   : > { %850 = vmatmul.bf16.gmra.mxu0 %v1481_v13  ;;  %890 = vmatmul.bf16.gmra.mxu2 %v1545_v14  ;;  %v457_v13 = vld [vmem:[#allocation2 + $0x30] sm:$0xff] }
  0xfb   : > { %939 = vmatmul.bf16.gmra.mxu1 %v1485_v15  ;;  %979 = vmatmul.bf16.gmra.mxu3 %v1549_v16 }
 0x107   : > { %v816_v17 = vpop.f32.mrf.mxu0 }
 0x108   : > { %v905_v19 = vpop.f32.mrf.mxu1 }
 0x109   : > { %v906_v20 = vadd.f32 %v905_v19, %v816_v17  ;;  %v473_v19 = vld [vmem:[#allocation2 + $0x70] sm:$0xff] }
 0x10b   : > { %v985_v21 = vadd.f32 %v906_v20, %v451_v18 }
 0x10d   : > { %1017 = vst [vmem:[#allocation2 + $0xb0] sm:$0xff] %v985_v21  ;;  %v856_v22 = vpop.f32.mrf.mxu2 }
 0x10e   : > { %v945_v24 = vpop.f32.mrf.mxu3 }
 0x10f   : > { %v946_v25 = vadd.f32 %v945_v24, %v856_v22  ;;  %v818_v26 = vpop.f32.mrf.mxu0 }
 0x110   : > { %v907_v28 = vpop.f32.mrf.mxu1 }
 0x111   : > { %v1001_v29 = vadd.f32 %v946_v25, %v467_v23  ;;  %v908_v30 = vadd.f32 %v907_v28, %v818_v26  ;;  %v458_v23 = vld [vmem:[#allocation2 + $0x48] sm:$0xff] }
 0x113   : > { %1033 = vst [vmem:[#allocation2 + $0x38] sm:$0xff] %v1001_v29  ;;  %v986_v31 = vadd.f32 %v908_v30, %v452_v27  ;;  %v474_v29 = vld [vmem:[#allocation2 + $0xc0] sm:$0xff] }
 0x115   : > { %1018 = vst [vmem:[#allocation2] sm:$0xff] %v986_v31  ;;  %v858_v32 = vpop.f32.mrf.mxu2 }
 0x116   : > { %v947_v34 = vpop.f32.mrf.mxu3 }
 0x117   : > { %v948_v35 = vadd.f32 %v947_v34, %v858_v32  ;;  %v821_v36 = vpop.f32.mrf.mxu0 }
 0x118   : > { %v910_v38 = vpop.f32.mrf.mxu1 }
 0x119   : > { %v1002_v39 = vadd.f32 %v948_v35, %v468_v33  ;;  %v911_v40 = vadd.f32 %v910_v38, %v821_v36  ;;  %v459_v33 = vld [vmem:[#allocation2 + $0x80] sm:$0xff] }
 0x11b   : > { %1034 = vst [vmem:[#allocation2 + $0x58] sm:$0xff] %v1002_v39  ;;  %v987_v41 = vadd.f32 %v911_v40, %v453_v37  ;;  %v475_v39 = vld [vmem:[#allocation2 + $0xa8] sm:$0xff] }
 0x11d   : > { %1019 = vst [vmem:[#allocation2 + $0xd8] sm:$0xff] %v987_v41  ;;  %v861_v42 = vpop.f32.mrf.mxu2 }
 0x11e   : > { %v950_v44 = vpop.f32.mrf.mxu3 }
 0x11f   : > { %v951_v45 = vadd.f32 %v950_v44, %v861_v42  ;;  %v823_v46 = vpop.f32.mrf.mxu0 }
 0x120   : > { %v912_v48 = vpop.f32.mrf.mxu1 }
 0x121   : > { %v1003_v49 = vadd.f32 %v951_v45, %v469_v43  ;;  %v913_v50 = vadd.f32 %v912_v48, %v823_v46  ;;  %v460_v43 = vld [vmem:[#allocation2 + $0x88] sm:$0xff] }
 0x123   : > { %1035 = vst [vmem:[#allocation2 + $0x40] sm:$0xff] %v1003_v49  ;;  %v988_v51 = vadd.f32 %v913_v50, %v454_v47  ;;  %v476_v49 = vld [vmem:[#allocation2 + $0xd0] sm:$0xff] }
 0x125   : > { %1020 = vst [vmem:[#allocation2 + $0x18] sm:$0xff] %v988_v51  ;;  %v863_v52 = vpop.f32.mrf.mxu2 }
 0x126   : > { %v952_v54 = vpop.f32.mrf.mxu3 }
 0x127   : > { %v953_v55 = vadd.f32 %v952_v54, %v863_v52  ;;  %v826_v56 = vpop.f32.mrf.mxu0 }
 0x128   : > { %v915_v58 = vpop.f32.mrf.mxu1 }
 0x129   : > { %v1004_v59 = vadd.f32 %v953_v55, %v470_v53  ;;  %v916_v60 = vadd.f32 %v915_v58, %v826_v56  ;;  %v461_v53 = vld [vmem:[#allocation2 + $0xe8] sm:$0xff] }
 0x12b   : > { %1036 = vst [vmem:[#allocation2 + $0xc8] sm:$0xff] %v1004_v59  ;;  %v989_v61 = vadd.f32 %v916_v60, %v455_v57  ;;  %v477_v59 = vld [vmem:[#allocation2 + $0x10] sm:$0xff] }
 0x12d   : > { %1021 = vst [vmem:[#allocation2 + $0x50] sm:$0xff] %v989_v61  ;;  %v866_v62 = vpop.f32.mrf.mxu2 }
 0x12e   : > { %v955_v0 = vpop.f32.mrf.mxu3 }
 0x12f   : > { %v956_v1 = vadd.f32 %v955_v0, %v866_v62  ;;  %v828_v2 = vpop.f32.mrf.mxu0 }
 0x130   : > { %v917_v4 = vpop.f32.mrf.mxu1 }
 0x131   : > { %v1005_v5 = vadd.f32 %v956_v1, %v471_v63  ;;  %v918_v6 = vadd.f32 %v917_v4, %v828_v2  ;;  %v462_v63 = vld [vmem:[#allocation2 + $0xb8] sm:$0xff] }
 0x133   : > { %1037 = vst [vmem:[#allocation2 + $0xe0] sm:$0xff] %v1005_v5  ;;  %v990_v7 = vadd.f32 %v918_v6, %v456_v3  ;;  %v478_v5 = vld [vmem:[#allocation2 + $0x28] sm:$0xff] }
 0x135   : > { %1022 = vst [vmem:[#allocation2 + $0x68] sm:$0xff] %v990_v7  ;;  %v868_v8 = vpop.f32.mrf.mxu2 }
 0x136   : > { %v957_v10 = vpop.f32.mrf.mxu3 }
 0x137   : > { %v958_v11 = vadd.f32 %v957_v10, %v868_v8  ;;  %v831_v12 = vpop.f32.mrf.mxu0 }
 0x138   : > { %v920_v14 = vpop.f32.mrf.mxu1 }
 0x139   : > { %v1006_v15 = vadd.f32 %v958_v11, %v472_v9  ;;  %v921_v16 = vadd.f32 %v920_v14, %v831_v12  ;;  %v463_v9 = vld [vmem:[#allocation2 + $0x60] sm:$0xff] }
 0x13b   : > { %1038 = vst [vmem:[#allocation2 + $0x90] sm:$0xff] %v1006_v15  ;;  %v991_v17 = vadd.f32 %v921_v16, %v457_v13  ;;  %v479_v15 = vld [vmem:[#allocation2 + $0xa0] sm:$0xff] }
 0x13d   : > { %1023 = vst [vmem:[#allocation2 + $0x30] sm:$0xff] %v991_v17  ;;  %v871_v18 = vpop.f32.mrf.mxu2 }
 0x13e   : > { %v960_v20 = vpop.f32.mrf.mxu3 }
 0x13f   : > { %v961_v21 = vadd.f32 %v960_v20, %v871_v18  ;;  %v833_v22 = vpop.f32.mrf.mxu0 }
 0x140   : > { %v922_v24 = vpop.f32.mrf.mxu1 }
 0x141   : > { %v1007_v25 = vadd.f32 %v961_v21, %v473_v19  ;;  %v923_v26 = vadd.f32 %v922_v24, %v833_v22  ;;  %v464_v19 = vld [vmem:[#allocation2 + $0xf0] sm:$0xff] }
 0x143   : > { %1039 = vst [vmem:[#allocation2 + $0x70] sm:$0xff] %v1007_v25  ;;  %v992_v27 = vadd.f32 %v923_v26, %v458_v23  ;;  %v480_v25 = vld [vmem:[#allocation2 + $0xf8] sm:$0xff] }
 0x145   : > { %1024 = vst [vmem:[#allocation2 + $0x48] sm:$0xff] %v992_v27  ;;  %v873_v28 = vpop.f32.mrf.mxu2 }
 0x146   : > { %v962_v30 = vpop.f32.mrf.mxu3 }
 0x147   : > { %v963_v31 = vadd.f32 %v962_v30, %v873_v28  ;;  %v836_v32 = vpop.f32.mrf.mxu0 }
 0x148   : > { %v925_v34 = vpop.f32.mrf.mxu1 }
 0x149   : > { %v1008_v35 = vadd.f32 %v963_v31, %v474_v29  ;;  %v926_v36 = vadd.f32 %v925_v34, %v836_v32  ;;  %v465_v29 = vld [vmem:[#allocation2 + $0x8] sm:$0xff] }
 0x14b   : > { %1040 = vst [vmem:[#allocation2 + $0xc0] sm:$0xff] %v1008_v35  ;;  %v993_v37 = vadd.f32 %v926_v36, %v459_v33  ;;  %v481_v35 = vld [vmem:[#allocation2 + $0x20] sm:$0xff] }
 0x14d   : > { %1025 = vst [vmem:[#allocation2 + $0x80] sm:$0xff] %v993_v37  ;;  %v876_v38 = vpop.f32.mrf.mxu2 }
 0x14e   : > { %v965_v40 = vpop.f32.mrf.mxu3 }
 0x14f   : > { %v966_v41 = vadd.f32 %v965_v40, %v876_v38  ;;  %v838_v42 = vpop.f32.mrf.mxu0 }
 0x150   : > { %v927_v44 = vpop.f32.mrf.mxu1 }
 0x151   : > { %v1009_v45 = vadd.f32 %v966_v41, %v475_v39  ;;  %v928_v46 = vadd.f32 %v927_v44, %v838_v42  ;;  %v466_v39 = vld [vmem:[#allocation2 + $0x78] sm:$0xff] }
 0x153   : > { %1041 = vst [vmem:[#allocation2 + $0xa8] sm:$0xff] %v1009_v45  ;;  %v994_v47 = vadd.f32 %v928_v46, %v460_v43  ;;  %v482_v45 = vld [vmem:[#allocation2 + $0x98] sm:$0xff] }
 0x155   : > { %1026 = vst [vmem:[#allocation2 + $0x88] sm:$0xff] %v994_v47  ;;  %v878_v48 = vpop.f32.mrf.mxu2 }
 0x156   : > { %v967_v50 = vpop.f32.mrf.mxu3 }
 0x157   : > { %v968_v51 = vadd.f32 %v967_v50, %v878_v48  ;;  %v841_v52 = vpop.f32.mrf.mxu0 }
 0x158   : > { %v930_v54 = vpop.f32.mrf.mxu1 }
 0x159   : > { %v1010_v55 = vadd.f32 %v968_v51, %v476_v49  ;;  %v931_v56 = vadd.f32 %v930_v54, %v841_v52 }
 0x15b   : > { %1042 = vst [vmem:[#allocation2 + $0xd0] sm:$0xff] %v1010_v55  ;;  %v995_v57 = vadd.f32 %v931_v56, %v461_v53 }
 0x15d   : > { %1027 = vst [vmem:[#allocation2 + $0xe8] sm:$0xff] %v995_v57  ;;  %v881_v58 = vpop.f32.mrf.mxu2 }
 0x15e   : > { %v970_v60 = vpop.f32.mrf.mxu3 }
 0x15f   : > { %v971_v61 = vadd.f32 %v970_v60, %v881_v58  ;;  %v843_v62 = vpop.f32.mrf.mxu0 }
 0x160   : > { %v932_v0 = vpop.f32.mrf.mxu1 }
 0x161   : > { %v1011_v1 = vadd.f32 %v971_v61, %v477_v59  ;;  %v933_v2 = vadd.f32 %v932_v0, %v843_v62 }
 0x163   : > { %1043 = vst [vmem:[#allocation2 + $0x10] sm:$0xff] %v1011_v1  ;;  %v996_v3 = vadd.f32 %v933_v2, %v462_v63 }
 0x165   : > { %1028 = vst [vmem:[#allocation2 + $0xb8] sm:$0xff] %v996_v3  ;;  %v883_v4 = vpop.f32.mrf.mxu2 }
 0x166   : > { %v972_v6 = vpop.f32.mrf.mxu3 }
 0x167   : > { %v973_v7 = vadd.f32 %v972_v6, %v883_v4  ;;  %v846_v8 = vpop.f32.mrf.mxu0 }
 0x168   : > { %v935_v10 = vpop.f32.mrf.mxu1 }
 0x169   : > { %v1012_v11 = vadd.f32 %v973_v7, %v478_v5  ;;  %v936_v12 = vadd.f32 %v935_v10, %v846_v8 }
 0x16b   : > { %1044 = vst [vmem:[#allocation2 + $0x28] sm:$0xff] %v1012_v11  ;;  %v997_v13 = vadd.f32 %v936_v12, %v463_v9 }
 0x16d   : > { %1029 = vst [vmem:[#allocation2 + $0x60] sm:$0xff] %v997_v13  ;;  %v886_v14 = vpop.f32.mrf.mxu2 }
 0x16e   : > { %v975_v16 = vpop.f32.mrf.mxu3 }
 0x16f   : > { %v976_v17 = vadd.f32 %v975_v16, %v886_v14  ;;  %v848_v18 = vpop.f32.mrf.mxu0 }
 0x170   : > { %v937_v20 = vpop.f32.mrf.mxu1 }
 0x171   : > { %v1013_v21 = vadd.f32 %v976_v17, %v479_v15  ;;  %v938_v22 = vadd.f32 %v937_v20, %v848_v18 }
 0x173   : > { %1045 = vst [vmem:[#allocation2 + $0xa0] sm:$0xff] %v1013_v21  ;;  %v998_v23 = vadd.f32 %v938_v22, %v464_v19 }
 0x175   : > { %1030 = vst [vmem:[#allocation2 + $0xf0] sm:$0xff] %v998_v23  ;;  %v888_v24 = vpop.f32.mrf.mxu2 }
 0x176   : > { %v977_v26 = vpop.f32.mrf.mxu3 }
 0x177   : > { %v978_v27 = vadd.f32 %v977_v26, %v888_v24  ;;  %v851_v28 = vpop.f32.mrf.mxu0 }
 0x178   : > { %v940_v30 = vpop.f32.mrf.mxu1 }
 0x179   : > { %v1014_v31 = vadd.f32 %v978_v27, %v480_v25  ;;  %v941_v32 = vadd.f32 %v940_v30, %v851_v28 }
 0x17b   : > { %1046 = vst [vmem:[#allocation2 + $0xf8] sm:$0xff] %v1014_v31  ;;  %v999_v33 = vadd.f32 %v941_v32, %v465_v29 }
 0x17d   : > { %1031 = vst [vmem:[#allocation2 + $0x8] sm:$0xff] %v999_v33  ;;  %v891_v34 = vpop.f32.mrf.mxu2 }
 0x17e   : > { %v980_v36 = vpop.f32.mrf.mxu3 }
 0x17f   : > { %v981_v37 = vadd.f32 %v980_v36, %v891_v34  ;;  %v853_v38 = vpop.f32.mrf.mxu0 }
 0x180   : > { %v942_v40 = vpop.f32.mrf.mxu1 }
 0x181   : > { %v1015_v41 = vadd.f32 %v981_v37, %v481_v35  ;;  %v943_v42 = vadd.f32 %v942_v40, %v853_v38 }
 0x183   : > { %1047 = vst [vmem:[#allocation2 + $0x20] sm:$0xff] %v1015_v41  ;;  %v1000_v43 = vadd.f32 %v943_v42, %v466_v39 }
 0x185   : > { %1032 = vst [vmem:[#allocation2 + $0x78] sm:$0xff] %v1000_v43  ;;  %v893_v44 = vpop.f32.mrf.mxu2 }
 0x186   : > { %v982_v46 = vpop.f32.mrf.mxu3 }
 0x187   : > { %v983_v47 = vadd.f32 %v982_v46, %v893_v44  ;;  %1052 = sbr.rel (%p1614_p12) target bundleno = 447 (0x1bf), region = 78 }
 0x189   : > { %v1016_v48 = vadd.f32 %v983_v47, %v482_v45 }
 0x18b   : > { %1048 = vst [vmem:[#allocation2 + $0x98] sm:$0xff] %v1016_v48 }
 0x18c   : > { %v2153_v49 = vld [vmem:[#allocation2 + $0xb0] sm:$0xff]  ;;  %v2155_v50 = vld [vmem:[#allocation2] sm:$0xff]  ;;  %v2157_v51 = vld [vmem:[#allocation2 + $0xd8] sm:$0xff] }
 0x18d   : > { %v1669_v52 = vpack.c.bf16 %v2155_v50, %v2153_v49  ;;  %v2161_v53 = vld [vmem:[#allocation2 + $0x18] sm:$0xff]  ;;  %v2163_v54 = vld [vmem:[#allocation2 + $0x50] sm:$0xff]  ;;  %v2165_v55 = vld [vmem:[#allocation2 + $0x68] sm:$0xff] }
 0x18e   : > { %v1674_v56 = vpack.c.bf16 %v2161_v53, %v2157_v51  ;;  %v1679_v57 = vpack.c.bf16 %v2165_v55, %v2163_v54  ;;  %v2171_v58 = vld [vmem:[#allocation2 + $0x30] sm:$0xff]  ;;  %v2173_v59 = vld [vmem:[#allocation2 + $0x48] sm:$0xff]  ;;  %v2175_v60 = vld [vmem:[#allocation2 + $0x80] sm:$0xff] }
 0x18f   : > { %1670 = vst [vmem:[%s2056_s7] sm:$0xff] %v1669_v52   ;;  %v1684_v61 = vpack.c.bf16 %v2173_v59, %v2171_v58  ;;  %v2180_v62 = vld [vmem:[#allocation2 + $0x88] sm:$0xff]  ;;  %v2184_v0 = vld [vmem:[#allocation2 + $0xb8] sm:$0xff]  ;;  %v2191_v3 = vld [vmem:[#allocation2 + $0x60] sm:$0xff] }
 0x190   : > { %v2182_v63 = vld [vmem:[#allocation2 + $0xe8] sm:$0xff]  ;;  %1746 = vst [vmem:[%s2056_s7 + $0x8] sm:$0xff] %v1674_v56   ;;  %v1689_v1 = vpack.c.bf16 %v2180_v62, %v2175_v60  ;;  %v2193_v4 = vld [vmem:[#allocation2 + $0xf0] sm:$0xff]  ;;  %v2200_v7 = vld [vmem:[#allocation2 + $0x78] sm:$0xff] }
 0x191   : > { %v1694_v2 = vpack.c.bf16 %v2184_v0, %v2182_v63  ;;  %v2195_v5 = vld [vmem:[#allocation2 + $0x8] sm:$0xff]  ;;  %1747 = vst [vmem:[%s2056_s7 + $0x10] sm:$0xff] %v1679_v57   ;;  %v1699_v6 = vpack.c.bf16 %v2193_v4, %v2191_v3  ;;  %v2202_v8 = vld [vmem:[#allocation2 + $0x38] sm:$0xff]  ;;  %v2209_v11 = vld [vmem:[#allocation2 + $0x40] sm:$0xff] }
 0x192   : > { %v2204_v9 = vld [vmem:[#allocation2 + $0x58] sm:$0xff]  ;;  %1748 = vst [vmem:[%s2056_s7 + $0x18] sm:$0xff] %v1684_v61   ;;  %v1704_v10 = vpack.c.bf16 %v2200_v7, %v2195_v5  ;;  %v2211_v12 = vld [vmem:[#allocation2 + $0xc8] sm:$0xff]  ;;  %v2213_v13 = vld [vmem:[#allocation2 + $0xe0] sm:$0xff] }
 0x193   : > { %1749 = vst [vmem:[%s2056_s7 + $0x20] sm:$0xff] %v1689_v1   ;;  %v1709_v14 = vpack.c.bf16 %v2204_v9, %v2202_v8  ;;  %v2218_v15 = vld [vmem:[#allocation2 + $0x90] sm:$0xff]  ;;  %v2222_v17 = vld [vmem:[#allocation2 + $0xc0] sm:$0xff]  ;;  %v1714_v18 = vpack.c.bf16 %v2211_v12, %v2209_v11  ;;  %v2227_v19 = vld [vmem:[#allocation2 + $0xa8] sm:$0xff] }
 0x194   : > { %v2220_v16 = vld [vmem:[#allocation2 + $0x70] sm:$0xff]  ;;  %1750 = vst [vmem:[%s2056_s7 + $0x28] sm:$0xff] %v1694_v2   ;;  %v1719_v21 = vpack.c.bf16 %v2218_v15, %v2213_v13  ;;  %v2236_v23 = vld [vmem:[#allocation2 + $0x28] sm:$0xff]  ;;  %v2241_v25 = vld [vmem:[#allocation2 + $0xa0] sm:$0xff] }
 0x195   : > { %v2229_v20 = vld [vmem:[#allocation2 + $0xd0] sm:$0xff]  ;;  %1751 = vst [vmem:[%s2056_s7 + $0x30] sm:$0xff] %v1699_v6   ;;  %v1724_v24 = vpack.c.bf16 %v2222_v17, %v2220_v16  ;;  %v2243_v26 = vld [vmem:[#allocation2 + $0xf8] sm:$0xff]  ;;  %v2248_v28 = vld [vmem:[#allocation2 + $0x20] sm:$0xff] }
 0x196   : > { %v2234_v22 = vld [vmem:[#allocation2 + $0x10] sm:$0xff]  ;;  %1752 = vst [vmem:[%s2056_s7 + $0x38] sm:$0xff] %v1704_v10   ;;  %v1729_v27 = vpack.c.bf16 %v2229_v20, %v2227_v19  ;;  %v2250_v29 = vld [vmem:[#allocation2 + $0x98] sm:$0xff]  ;;  %v1149_v31 = vld [vmem:[%s2051_s30] sm:$0xff]  ;;  %v1739_v32 = vpack.c.bf16 %v2243_v26, %v2241_v25 }
 0x197   : > { %1753 = vst [vmem:[%s2056_s7 + $0x40] sm:$0xff] %v1709_v14   ;;  %v1734_v30 = vpack.c.bf16 %v2236_v23, %v2234_v22  ;;  %v1150_v33 = vld [vmem:[%s2051_s30 + $0x8] sm:$0xff]  ;;  %v1744_v34 = vpack.c.bf16 %v2250_v29, %v2248_v28  ;;  %v1151_v35 = vld [vmem:[%s2051_s30 + $0x10] sm:$0xff]  ;;  %v1213_v36 = vadd.f32 %v1149_v31, %v2153_v49  ;;  %v1152_v37 = vld [vmem:[%s2051_s30 + $0x18] sm:$0xff] }
 0x198   : > { %1754 = vst [vmem:[%s2056_s7 + $0x48] sm:$0xff] %v1714_v18   ;;  %v1214_v38 = vadd.f32 %v1150_v33, %v2155_v50  ;;  %v1153_v39 = vld [vmem:[%s2051_s30 + $0x20] sm:$0xff]  ;;  %v1215_v40 = vadd.f32 %v1151_v35, %v2157_v51  ;;  %v1154_v41 = vld [vmem:[%s2051_s30 + $0x28] sm:$0xff]  ;;  %v1216_v42 = vadd.f32 %v1152_v37, %v2161_v53  ;;  %v1155_v43 = vld [vmem:[%s2051_s30 + $0x30] sm:$0xff] }
 0x199   : > { %1755 = vst [vmem:[%s2056_s7 + $0x50] sm:$0xff] %v1719_v21   ;;  %v1217_v44 = vadd.f32 %v1153_v39, %v2163_v54  ;;  %v1156_v45 = vld [vmem:[%s2051_s30 + $0x38] sm:$0xff]  ;;  %v1218_v46 = vadd.f32 %v1154_v41, %v2165_v55  ;;  %v1157_v47 = vld [vmem:[%s2051_s30 + $0x40] sm:$0xff]  ;;  %v1219_v48 = vadd.f32 %v1155_v43, %v2171_v58  ;;  %v1158_v49 = vld [vmem:[%s2051_s30 + $0x48] sm:$0xff] }
 0x19a   : > { %1756 = vst [vmem:[%s2056_s7 + $0x58] sm:$0xff] %v1724_v24   ;;  %v1220_v50 = vadd.f32 %v1156_v45, %v2173_v59  ;;  %v1159_v51 = vld [vmem:[%s2051_s30 + $0x50] sm:$0xff]  ;;  %v1221_v52 = vadd.f32 %v1157_v47, %v2175_v60  ;;  %v1160_v53 = vld [vmem:[%s2051_s30 + $0x58] sm:$0xff]  ;;  %v1222_v54 = vadd.f32 %v1158_v49, %v2180_v62  ;;  %v1161_v55 = vld [vmem:[%s2051_s30 + $0x60] sm:$0xff] }
 0x19b   : > { %1757 = vst [vmem:[%s2056_s7 + $0x60] sm:$0xff] %v1729_v27   ;;  %v1223_v56 = vadd.f32 %v1159_v51, %v2182_v63  ;;  %v1162_v57 = vld [vmem:[%s2051_s30 + $0x68] sm:$0xff]  ;;  %v1224_v58 = vadd.f32 %v1160_v53, %v2184_v0  ;;  %v1163_v59 = vld [vmem:[%s2051_s30 + $0x70] sm:$0xff]  ;;  %v1225_v60 = vadd.f32 %v1161_v55, %v2191_v3  ;;  %v1164_v61 = vld [vmem:[%s2051_s30 + $0x78] sm:$0xff] }
 0x19c   : > { %1758 = vst [vmem:[%s2056_s7 + $0x68] sm:$0xff] %v1734_v30   ;;  %v1226_v62 = vadd.f32 %v1162_v57, %v2193_v4  ;;  %v1165_v63 = vld [vmem:[%s2051_s30 + $0x80] sm:$0xff]  ;;  %v1227_v1 = vadd.f32 %v1163_v59, %v2195_v5  ;;  %v1166_v0 = vld [vmem:[%s2051_s30 + $0x88] sm:$0xff]  ;;  %v1228_v2 = vadd.f32 %v1164_v61, %v2200_v7  ;;  %v1167_v3 = vld [vmem:[%s2051_s30 + $0x90] sm:$0xff] }
 0x19d   : > { %1759 = vst [vmem:[%s2056_s7 + $0x70] sm:$0xff] %v1739_v32   ;;  %v1229_v6 = vadd.f32 %v1165_v63, %v2202_v8  ;;  %v1168_v4 = vld [vmem:[%s2051_s30 + $0x98] sm:$0xff]  ;;  %v1230_v10 = vadd.f32 %v1166_v0, %v2204_v9  ;;  %v1169_v5 = vld [vmem:[%s2051_s30 + $0xa0] sm:$0xff]  ;;  %v1231_v14 = vadd.f32 %v1167_v3, %v2209_v11  ;;  %v1170_v7 = vld [vmem:[%s2051_s30 + $0xa8] sm:$0xff] }
 0x19e   : > { %1760 = vst [vmem:[%s2056_s7 + $0x78] sm:$0xff] %v1744_v34   ;;  %v1232_v18 = vadd.f32 %v1168_v4, %v2211_v12  ;;  %v1171_v8 = vld [vmem:[%s2051_s30 + $0xb0] sm:$0xff]  ;;  %v1233_v21 = vadd.f32 %v1169_v5, %v2213_v13  ;;  %v1172_v9 = vld [vmem:[%s2051_s30 + $0xb8] sm:$0xff]  ;;  %v1234_v24 = vadd.f32 %v1170_v7, %v2218_v15  ;;  %v1173_v11 = vld [vmem:[%s2051_s30 + $0xc0] sm:$0xff] }
 0x19f   : > { %1245 = vst [vmem:[%s2061_s15] sm:$0xff] %v1213_v36  ;;  %v1235_v27 = vadd.f32 %v1171_v8, %v2220_v16  ;;  %v1174_v12 = vld [vmem:[%s2051_s30 + $0xc8] sm:$0xff]  ;;  %v1236_v30 = vadd.f32 %v1172_v9, %v2222_v17  ;;  %v1175_v13 = vld [vmem:[%s2051_s30 + $0xd0] sm:$0xff]  ;;  %v1237_v31 = vadd.f32 %v1173_v11, %v2227_v19  ;;  %v1176_v15 = vld [vmem:[%s2051_s30 + $0xd8] sm:$0xff] }
 0x1a0   : > { %1246 = vst [vmem:[%s2061_s15 + $0x8] sm:$0xff] %v1214_v38  ;;  %v1238_v32 = vadd.f32 %v1174_v12, %v2229_v20  ;;  %v1177_v33 = vld [vmem:[%s2051_s30 + $0xe0] sm:$0xff]  ;;  %v1239_v16 = vadd.f32 %v1175_v13, %v2234_v22  ;;  %v1178_v17 = vld [vmem:[%s2051_s30 + $0xe8] sm:$0xff]  ;;  %v1240_v34 = vadd.f32 %v1176_v15, %v2236_v23  ;;  %v1179_v35 = vld [vmem:[%s2051_s30 + $0xf0] sm:$0xff] }
 0x1a1   : > { %1247 = vst [vmem:[%s2061_s15 + $0x10] sm:$0xff] %v1215_v40  ;;  %v1241_v19 = vadd.f32 %v1177_v33, %v2241_v25  ;;  %v1180_v36 = vld [vmem:[%s2051_s30 + $0xf8] sm:$0xff]  ;;  %v1242_v20 = vadd.f32 %v1178_v17, %v2243_v26  ;;  %v1243_v37 = vadd.f32 %v1179_v35, %v2248_v28 }
 0x1a2   : > { %1248 = vst [vmem:[%s2061_s15 + $0x18] sm:$0xff] %v1216_v42  ;;  %v1244_v22 = vadd.f32 %v1180_v36, %v2250_v29 }
 0x1a3   : > { %1249 = vst [vmem:[%s2061_s15 + $0x20] sm:$0xff] %v1217_v44 }
 0x1a4   : > { %1250 = vst [vmem:[%s2061_s15 + $0x28] sm:$0xff] %v1218_v46 }
 0x1a5   : > { %1251 = vst [vmem:[%s2061_s15 + $0x30] sm:$0xff] %v1219_v48 }
 0x1a6   : > { %1252 = vst [vmem:[%s2061_s15 + $0x38] sm:$0xff] %v1220_v50 }
 0x1a7   : > { %1253 = vst [vmem:[%s2061_s15 + $0x40] sm:$0xff] %v1221_v52 }
 0x1a8   : > { %1254 = vst [vmem:[%s2061_s15 + $0x48] sm:$0xff] %v1222_v54 }
 0x1a9   : > { %1255 = vst [vmem:[%s2061_s15 + $0x50] sm:$0xff] %v1223_v56 }
 0x1aa   : > { %1256 = vst [vmem:[%s2061_s15 + $0x58] sm:$0xff] %v1224_v58 }
 0x1ab   : > { %1257 = vst [vmem:[%s2061_s15 + $0x60] sm:$0xff] %v1225_v60 }
 0x1ac   : > { %1258 = vst [vmem:[%s2061_s15 + $0x68] sm:$0xff] %v1226_v62 }
 0x1ad   : > { %1259 = vst [vmem:[%s2061_s15 + $0x70] sm:$0xff] %v1227_v1 }
 0x1ae   : > { %1260 = vst [vmem:[%s2061_s15 + $0x78] sm:$0xff] %v1228_v2 }
 0x1af   : > { %1261 = vst [vmem:[%s2061_s15 + $0x80] sm:$0xff] %v1229_v6 }
 0x1b0   : > { %1262 = vst [vmem:[%s2061_s15 + $0x88] sm:$0xff] %v1230_v10 }
 0x1b1   : > { %1263 = vst [vmem:[%s2061_s15 + $0x90] sm:$0xff] %v1231_v14 }
 0x1b2   : > { %1264 = vst [vmem:[%s2061_s15 + $0x98] sm:$0xff] %v1232_v18 }
 0x1b3   : > { %1265 = vst [vmem:[%s2061_s15 + $0xa0] sm:$0xff] %v1233_v21 }
 0x1b4   : > { %1266 = vst [vmem:[%s2061_s15 + $0xa8] sm:$0xff] %v1234_v24 }
 0x1b5   : > { %1267 = vst [vmem:[%s2061_s15 + $0xb0] sm:$0xff] %v1235_v27 }
 0x1b6   : > { %1268 = vst [vmem:[%s2061_s15 + $0xb8] sm:$0xff] %v1236_v30 }
 0x1b7   : > { %1269 = vst [vmem:[%s2061_s15 + $0xc0] sm:$0xff] %v1237_v31 }
 0x1b8   : > { %1270 = vst [vmem:[%s2061_s15 + $0xc8] sm:$0xff] %v1238_v32 }
 0x1b9   : > { %1271 = vst [vmem:[%s2061_s15 + $0xd0] sm:$0xff] %v1239_v16 }
 0x1ba   : > { %1272 = vst [vmem:[%s2061_s15 + $0xd8] sm:$0xff] %v1240_v34 }
 0x1bb   : > { %1273 = vst [vmem:[%s2061_s15 + $0xe0] sm:$0xff] %v1241_v19 }
 0x1bc   : > { %1274 = vst [vmem:[%s2061_s15 + $0xe8] sm:$0xff] %v1242_v20 }
 0x1bd   : > { %1275 = vst [vmem:[%s2061_s15 + $0xf0] sm:$0xff] %v1243_v37 }
 0x1be   : > { %1276 = vst [vmem:[%s2061_s15 + $0xf8] sm:$0xff] %v1244_v22 }
 0x1bf PF: > { %s15_s21 = sadd.s32 1, %s1888_s21   ;;  %s2387_s15 = smov %s1868_s16 }
 0x1c0   : > { %p12_p13 = scmp.ge.s32.totalorder %s15_s21, 6   ;;  %s2388_s16 = smov %s1967_s28 }
 0x1c1   : > { %s2389_s17 = smov %s1880_s19  ;;  %s2390_s18 = smov %s1884_s20 }
 0x1c2   : > { %s2391_s19 = smov %s2394_s22  ;;  %s2392_s20 = smov %s2398_s23 }
 0x1c3   :  { %14 = sbr.rel (!%p12_p13) target bundleno = 4 (0x4), region = 129 }

// kernel: lightgcl_forward.10
= control target key start
LH: loop header
LB: loop body
LE: loop exit
PB: predicated region body
PF: predicated region fallthrough
CT: control target
= control target key end

     0   :  { %s733_s9 = smov 0   ;;  %s735_s10 = smov 0   ;;  %s845_s0 = inlined_call_operand.vmem [shape: bf16[64,48], index: 0, kind: input, shape index: {}]   ;;  %s846_s1 = inlined_call_operand.vmem [shape: bf16[48,384], index: 1, kind: input, shape index: {}]   ;;  %s847_s2 = inlined_call_operand.vmem [shape: f32[64,1], index: 2, kind: output, shape index: {}]  }
   0x1   :  { %s737_s11 = smov 0   ;;  %s739_s12 = smov 0  }
   0x2   :  { %s741_s13 = smov 0   ;;  %s743_s14 = smov 0  }
   0x3   :  { %s745_s15 = smov 0  }
   0x4 LB: > { %s21_s16 = sadd.s32 1, %s705_s13  ;;  %s24_s17 = sadd.s32 1, %s709_s14  ;;  %s713_s15 = sphi %s745_s15, %s12_s15   ;;  %s709_s14 = sphi %s743_s14, %s853_s14   ;;  %s705_s13 = sphi %s741_s13, %s852_s13   ;;  %s701_s12 = sphi %s739_s12, %s851_s12   ;;  %s697_s11 = sphi %s737_s11, %s850_s11   ;;  %s693_s10 = sphi %s735_s10, %s849_s10   ;;  %s689_s9 = sphi %s733_s9, %s848_s9  }
   0x5   : > { %p22_p0 = scmp.ge.s32.totalorder %s21_s16, 3  ;;  %s57_s18 = sadd.s32 1, %s693_s10 }
   0x6   : > { %p64_p1 = scmp.ne.s32.totalorder %s693_s10, %s689_s9  ;;  %p65_p2 = scmp.eq.s32.totalorder %s713_s15, 0 }
   0x7   : > { %s855_s16 = smov (%p22_p0, %s21_s16), 0  ;;  %s857_s17 = smov (!%p22_p0, %s24_s17), %s709_s14 }
   0x8   : > { %s54_s19 = ssub.s32 %s705_s13, %s855_s16  ;;  %p66_p3 = por %p65_p2, %p64_p1 }
   0x9   : > { %p26_p4 = scmp.ge.s32.totalorder %s857_s17, 2  ;;  %p55_p5 = scmp.eq.s32.totalorder %s54_s19, 0 }
   0xa   : > { %p530_p6 = scmp.ge.s32.totalorder %s713_s15, 6 }
   0xb   : > { %s859_s17 = smov (%p26_p4, %s857_s17), 0 }
   0xc   : > { %s782_s20 = scalar_select %p55_p5, %s693_s10, %s57_s18  }
   0xd   : > { %116 = sbr.rel (%p530_p6) target bundleno = 29 (0x1d), region = 16 }
  0x12   : > { %128 = sbr.rel (!%p66_p3) target bundleno = 29 (0x1d), region = 24  ;;  %s130_s21 = sand.u32 (%p66_p3), 1, %s693_s10  }
  0x13   : > { %s531_s22 = sshll.u32 (%p66_p3), %s705_s13, 2  ;;  %s571_s23 = smul.u32 (%p66_p3), 24, %s130_s21 }
  0x14   : > { %s134_s26 = scalar_lea.vmem (%p66_p3), %s846_s1, %s531_s22 }
  0x15   : > { %v151_v0 = vld [vmem:[%s134_s26] sm:$0xf] (%p66_p3)  ;;  %v153_v1 = vld [vmem:[%s134_s26 + $0xc] sm:$0xf] (%p66_p3)  ;;  %v155_v2 = vld [vmem:[%s134_s26 + $0x18] sm:$0xf] (%p66_p3) }
  0x16   : > { %s132_s27 = scalar_lea.vmem (%p66_p3), [#allocation4], %s571_s23  ;;  %v157_v3 = vld [vmem:[%s134_s26 + $0x24] sm:$0xf] (%p66_p3)  ;;  %v159_v4 = vld [vmem:[%s134_s26 + $0x30] sm:$0xf] (%p66_p3) }
  0x17   : > { %152 = vst [vmem:[%s132_s27] sm:$0xf] %v151_v0  ;;  %v161_v5 = vld [vmem:[%s134_s26 + $0x3c] sm:$0xf] }
  0x18   : > { %154 = vst [vmem:[%s132_s27 + $0x4] sm:$0xf] %v153_v1 }
  0x19   : > { %156 = vst [vmem:[%s132_s27 + $0x8] sm:$0xf] %v155_v2 }
  0x1a   : > { %158 = vst [vmem:[%s132_s27 + $0xc] sm:$0xf] %v157_v3 }
  0x1b   : > { %160 = vst [vmem:[%s132_s27 + $0x10] sm:$0xf] %v159_v4 }
  0x1c   : > { %162 = vst [vmem:[%s132_s27 + $0x14] sm:$0xf] %v161_v5 }
  0x1d PF: > { %p532_p7 = scmp.ge.s32.totalorder %s713_s15, 1  ;;  %p197_p8 = scmp.lt.s32.totalorder %s713_s15, 7 }
  0x1f   : > { %p198_p9 = pnand %p532_p7, %p197_p8 }
  0x20   : > { %s204_s28 = sand.u32 (!%p198_p9), 1, %s689_s9   ;;  %s533_s29 = sshll.u32 (!%p198_p9), %s701_s12, 2 }
  0x21   : > { %201 = sbr.rel (%p198_p9) target bundleno = 582 (0x246), region = 65  ;;  %p231_p10 = scmp.lt.s32.totalorder (!%p198_p9), %s533_s29, 7 }
  0x22   : > { %s572_s30 = smul.u32 (!%p198_p9), 24, %s204_s28  ;;  %p537_p11 = scmp.ne.s32.totalorder (!%p198_p9), %s697_s11, 0 }
  0x24   : > { %s206_s21 = scalar_lea.vmem (!%p198_p9), [#allocation4], %s572_s30 }
  0x26   : > { %s861_s29 = smov (!%p231_p10, %s533_s29), 7  ;;  %246 = sbr.rel (%p537_p11) target bundleno = 52 (0x34), region = 73 }
  0x27   : > { %s534_s3 = sshll.u32 %s861_s29, 2  ;;  %s536_s4 = sshll.u32 %s861_s29, 3 }
  0x28   : > { %s234_s7 = scalar_lea.vmem %s845_s0, %s534_s3  ;;  %s800_s19 = scalar_lea.vmem %s847_s2, %s536_s4 }
  0x2b   : > { %vm247_vm0 = vcmask 7168   ;;  %v715_v6 = vmov -inf   ;;  %v716_v7 = vmov 0.0  }
  0x2c   : > { %248 = vst.msk [vmem:[#allocation2] sm:$0xff] %vm247_vm0, %v715_v6 }
  0x2d   : > { %249 = vst.msk [vmem:[#allocation2 + $0x8] sm:$0xff] %vm247_vm0, %v715_v6 }
  0x2e   : > { %250 = vst.msk [vmem:[#allocation2 + $0x10] sm:$0xff] %vm247_vm0, %v715_v6 }
  0x2f   : > { %251 = vst.msk [vmem:[#allocation2 + $0x18] sm:$0xff] %vm247_vm0, %v715_v6 }
  0x30   : > { %252 = vst.msk [vmem:[#allocation3] sm:$0xff] %vm247_vm0, %v716_v7 }
  0x31   : > { %253 = vst.msk [vmem:[#allocation3 + $0x8] sm:$0xff] %vm247_vm0, %v716_v7 }
  0x32   : > { %254 = vst.msk [vmem:[#allocation3 + $0x10] sm:$0xff] %vm247_vm0, %v716_v7 }
  0x33   : > { %255 = vst.msk [vmem:[#allocation3 + $0x18] sm:$0xff] %vm247_vm0, %v716_v7 }
  0x34 PF: > { %v567_v8 = vld [vmem:[%s206_s21 + $0x10] sm:$0xff]  ;;  %v566_v9 = vld [vmem:[%s206_s21 + $0x8] sm:$0xff]  ;;  %v565_v10 = vld [vmem:[%s206_s21] sm:$0xff]  ;;  %vm294_vm1 = vcmask 392192   ;;  %v717_v21 = vmov 0   ;;  %vm404_vm2 = vcmask 7168  }
  0x35   : > { %306 = vmatpush.bf16.msra.mxu0 %v567_v8  ;;  %568 = vmatpush.bf16.msra.mxu1 %v567_v8  ;;  %v563_v11 = vld [vmem:[%s234_s7] sm:$0xff]  ;;  %v564_v12 = vld [vmem:[%s234_s7 + $0x8] sm:$0xff]  ;;  %v803_v22 = vld [vmem:[#allocation2 + $0x10] sm:$0xff]  ;;  %p560_p12 = scmp.ne.s32.totalorder %s697_s11, 2 }
  0x36   : > { %633 = vset.pattern.permute.xlu0 %v717_v21  ;;  %632 = vset.pattern.permute.xlu2 %v717_v21  ;;  %v324_v23 = vld [vmem:[#allocation2] sm:$0xff]  ;;  %v327_v30 = vld [vmem:[#allocation2 + $0x18] sm:$0xff]  ;;  %v325_v31 = vld [vmem:[#allocation2 + $0x8] sm:$0xff] }
  0x37   : > { %634 = vset.pattern.permute.xlu1 %v717_v21  ;;  %v352_v57 = vld [vmem:[#allocation3] sm:$0xff] }
  0x38   : > { %v353_v62 = vld [vmem:[#allocation3 + $0x8] sm:$0xff] }
  0x39   : > { %307 = vmatpush.bf16.msra.mxu0 %v566_v9  ;;  %569 = vmatpush.bf16.msra.mxu1 %v566_v9  ;;  %v354_v5 = vld [vmem:[#allocation3 + $0x10] sm:$0xff] }
  0x3d   : > { %308 = vmatpush.bf16.msra.mxu0 %v565_v10  ;;  %570 = vmatpush.bf16.msra.mxu1 %v565_v10  ;;  %v355_v10 = vld [vmem:[#allocation3 + $0x18] sm:$0xff] }
  0x40   : > { %558 = vmatmul.msk.bf16.vlgmr.msra.gmra.mxu0 %vm294_vm1, %v563_v11  ;;  %559 = vmatmul.msk.bf16.vlgmr.msra.gmra.mxu1 %vm294_vm1, %v564_v12 }
  0xbd   : > { %v310_v13 = vpop.f32.mrf.mxu0  ;;  %v315_v14 = vpop.f32.mrf.mxu1 }
  0xbe   : > { %v320_v15 = vmul.f32 5.0, %v310_v13  ;;  %v322_v16 = vmul.f32 5.0, %v315_v14 }
  0xc0   : > { %332 = vmax.xlane.f32.xlu1 %v322_v16  ;;  %328 = vmax.xlane.f32.xlu0 %v320_v15 }
  0xc5   : > { %v312_v17 = vpop.f32.mrf.mxu0  ;;  %v317_v18 = vpop.f32.mrf.mxu1 }
  0xc6   : > { %v321_v19 = vmul.f32 5.0, %v312_v17  ;;  %v323_v20 = vmul.f32 5.0, %v317_v18 }
  0xc8   : > { %334 = vmax.xlane.f32.xlu1 %v323_v20  ;;  %330 = vmax.xlane.f32.xlu0 %v321_v19 }
 0x133   : > { %v333_v24 = vpop.xlane.xlu1 %332  ;;  %v329_v25 = vpop.xlane.xlu0 %328 }
 0x134   : > { %v338_v26 = vmax.f32 %v803_v22, %v333_v24  ;;  %v336_v27 = vmax.f32 %v324_v23, %v329_v25 }
 0x136   : > { %v342_v28 = vsub.f32 %v803_v22, %v338_v26  ;;  %411 = vst.msk [vmem:[#allocation2 + $0x10] sm:$0xff] %vm404_vm2, %v338_v26  ;;  %v340_v29 = vsub.f32 %v324_v23, %v336_v27  ;;  %362 = vperm.xlu2 %632, %v336_v27   ;;  %372 = vperm.xlu0 %633, %v338_v26  }
 0x137   : > { %409 = vst.msk [vmem:[#allocation2] sm:$0xff] %vm404_vm2, %v336_v27 }
 0x138   : > { %v344_v54 = vmul.f32 1.442695, %v340_v29  ;;  %v348_v2 = vmul.f32 1.442695, %v342_v28 }
 0x13b   : > { %v335_v32 = vpop.xlane.xlu1 %334  ;;  %v331_v33 = vpop.xlane.xlu0 %330 }
 0x13c   : > { %v339_v34 = vmax.f32 %v327_v30, %v335_v32  ;;  %v337_v35 = vmax.f32 %v325_v31, %v331_v33 }
 0x13e   : > { %v343_v36 = vsub.f32 %v327_v30, %v339_v34  ;;  %412 = vst.msk [vmem:[#allocation2 + $0x18] sm:$0xff] %vm404_vm2, %v339_v34  ;;  %v341_v37 = vsub.f32 %v325_v31, %v337_v35  ;;  %377 = vperm.xlu1 %634, %v339_v34   ;;  %367 = vperm.xlu2 %632, %v337_v35  }
 0x13f   : > { %410 = vst.msk [vmem:[#allocation2 + $0x8] sm:$0xff] %vm404_vm2, %v337_v35 }
 0x140   : > { %v346_v55 = vmul.f32 1.442695, %v341_v37  ;;  %v350_v3 = vmul.f32 1.442695, %v343_v36 }
 0x190   : > { %v363_v38 = vpop.permute.xlu2 %362 }
 0x191   : > { %v380_v39 = vsub.f32 %v320_v15, %v363_v38 }
 0x193   : > { %v384_v40 = vmul.f32 1.442695, %v380_v39 }
 0x195   : > { %635 = vpow2.f32 %v384_v40 }
 0x198   : > { %v368_v41 = vpop.permute.xlu2 %367 }
 0x199   : > { %v381_v42 = vsub.f32 %v321_v19, %v368_v41 }
 0x19b   : > { %v636_v43 = vpop.eup %635  ;;  %v386_v44 = vmul.f32 1.442695, %v381_v42 }
 0x19c   : > { %392 = vadd.xlane.f32.xlu2 %v636_v43 }
 0x19d   : > { %637 = vpow2.f32 %v386_v44 }
 0x1a3   : > { %v638_v45 = vpop.eup %637 }
 0x1a4   : > { %394 = vadd.xlane.f32.xlu1 %v638_v45 }
 0x1a8   : > { %v373_v46 = vpop.permute.xlu0 %372 }
 0x1a9   : > { %v382_v47 = vsub.f32 %v322_v16, %v373_v46 }
 0x1ab   : > { %v388_v48 = vmul.f32 1.442695, %v382_v47 }
 0x1ad   : > { %639 = vpow2.f32 %v388_v48 }
 0x1b0   : > { %v378_v49 = vpop.permute.xlu1 %377 }
 0x1b1   : > { %v383_v50 = vsub.f32 %v323_v20, %v378_v49 }
 0x1b3   : > { %v640_v51 = vpop.eup %639  ;;  %v390_v52 = vmul.f32 1.442695, %v383_v50 }
 0x1b4   : > { %396 = vadd.xlane.f32.xlu0 %v640_v51 }
 0x1b5   : > { %641 = vpow2.f32 %v390_v52 }
 0x1b6   : > { %643 = vpow2.f32 %v344_v54 }
 0x1b7   : > { %645 = vpow2.f32 %v346_v55 }
 0x1b8   : > { %647 = vpow2.f32 %v348_v2 }
 0x1b9   : > { %649 = vpow2.f32 %v350_v3 }
 0x1bb   : > { %v642_v53 = vpop.eup %641 }
 0x1bc   : > { %398 = vadd.xlane.f32.xlu2 %v642_v53  ;;  %v644_v56 = vpop.eup %643 }
 0x1bd   : > { %v356_v58 = vmul.f32 %v644_v56, %v352_v57  ;;  %v646_v61 = vpop.eup %645 }
 0x1be   : > { %v357_v63 = vmul.f32 %v646_v61, %v353_v62  ;;  %v648_v4 = vpop.eup %647 }
 0x1bf   : > { %v358_v6 = vmul.f32 %v648_v4, %v354_v5  ;;  %v650_v9 = vpop.eup %649 }
 0x1c0   : > { %v359_v11 = vmul.f32 %v650_v9, %v355_v10 }
 0x20f   : > { %v393_v59 = vpop.xlane.xlu2 %392 }
 0x210   : > { %v400_v60 = vadd.f32 %v393_v59, %v356_v58 }
 0x212   : > { %405 = vst.msk [vmem:[#allocation3] sm:$0xff] %vm404_vm2, %v400_v60 }
 0x217   : > { %v395_v0 = vpop.xlane.xlu1 %394 }
 0x218   : > { %v401_v1 = vadd.f32 %v395_v0, %v357_v63 }
 0x21a   : > { %406 = vst.msk [vmem:[#allocation3 + $0x8] sm:$0xff] %vm404_vm2, %v401_v1 }
 0x227   : > { %v397_v7 = vpop.xlane.xlu0 %396 }
 0x228   : > { %v402_v8 = vadd.f32 %v397_v7, %v358_v6 }
 0x22a   : > { %407 = vst.msk [vmem:[#allocation3 + $0x10] sm:$0xff] %vm404_vm2, %v402_v8 }
 0x22e   : > { %416 = sbr.rel (%p560_p12) target bundleno = 582 (0x246), region = 77 }
 0x22f   : > { %v399_v12 = vpop.xlane.xlu2 %398 }
 0x230   : > { %v403_v13 = vadd.f32 %v399_v12, %v359_v11 }
 0x232   : > { %408 = vst.msk [vmem:[#allocation3 + $0x18] sm:$0xff] %vm404_vm2, %v403_v13 }
 0x233   : > { %v421_v14 = vld [vmem:[#allocation3] sm:$0xff]  ;;  %v422_v15 = vld [vmem:[#allocation3 + $0x8] sm:$0xff]  ;;  %v423_v16 = vld [vmem:[#allocation3 + $0x10] sm:$0xff] }
 0x234   : > { %651 = vlog2.f32 %v421_v14  ;;  %v417_v19 = vld [vmem:[#allocation2] sm:$0xff]  ;;  %v418_v22 = vld [vmem:[#allocation2 + $0x8] sm:$0xff]  ;;  %v419_v25 = vld [vmem:[#allocation2 + $0x10] sm:$0xff] }
 0x235   : > { %653 = vlog2.f32 %v422_v15  ;;  %v420_v29 = vld [vmem:[#allocation2 + $0x18] sm:$0xff] }
 0x236   : > { %655 = vlog2.f32 %v423_v16 }
 0x239   : > { %v424_v17 = vld [vmem:[#allocation3 + $0x18] sm:$0xff] }
 0x23a   : > { %657 = vlog2.f32 %v424_v17  ;;  %v652_v18 = vpop.eup %651 }
 0x23b   : > { %v654_v20 = vpop.eup %653  ;;  %v426_v21 = vmul.f32 0.6931472, %v652_v18 }
 0x23c   : > { %v656_v23 = vpop.eup %655  ;;  %v428_v24 = vmul.f32 0.6931472, %v654_v20 }
 0x23d   : > { %v433_v27 = vadd.f32 %v426_v21, %v417_v19  ;;  %v430_v28 = vmul.f32 0.6931472, %v656_v23 }
 0x23e   : > { %v434_v30 = vadd.f32 %v428_v24, %v418_v22 }
 0x23f   : > { %437 = vst.msk [vmem:[%s800_s19] sm:$0xff] %vm404_vm2, %v433_v27  ;;  %v435_v32 = vadd.f32 %v430_v28, %v419_v25 }
 0x240   : > { %v658_v26 = vpop.eup %657  ;;  %438 = vst.msk [vmem:[%s800_s19 + $0x8] sm:$0xff] %vm404_vm2, %v434_v30 }
 0x241   : > { %v432_v31 = vmul.f32 0.6931472, %v658_v26  ;;  %439 = vst.msk [vmem:[%s800_s19 + $0x10] sm:$0xff] %vm404_vm2, %v435_v32 }
 0x243   : > { %v436_v33 = vadd.f32 %v432_v31, %v420_v29 }
 0x245   : > { %440 = vst.msk [vmem:[%s800_s19 + $0x18] sm:$0xff] %vm404_vm2, %v436_v33 }
 0x246 PF: > { %s12_s15 = sadd.s32 1, %s713_s15   ;;  %s848_s9 = smov %s693_s10 }
 0x247   : > { %p9_p13 = scmp.ge.s32.totalorder %s12_s15, 8   ;;  %s849_s10 = smov %s782_s20 }
 0x248   : > { %s850_s11 = smov %s705_s13  ;;  %s851_s12 = smov %s709_s14 }
 0x249   : > { %s852_s13 = smov %s855_s16  ;;  %s853_s14 = smov %s859_s17 }
 0x24a   :  { %11 = sbr.rel (!%p9_p13) target bundleno = 4 (0x4), region = 115 }

</bundles_post_ra>
